<compile_context>
chip_gen: v5e
topology: v5e:2x2
jax: 0.10.0
libtpu: 0.0.40
codegen_flags: <defaults>
</compile_context>

<pallas_src>
import functools
import math

import jax
import jax.numpy as jnp
from jax.experimental import pallas as pl
from jax.experimental.pallas import tpu as pltpu

_LN_EPS = 1e-5
_TILE_F = 512      # preferred d_ff tile (multiple of 128)
_TILE_V = 2048     # preferred vocab tile (multiple of 128)


def _pick_tile(total, preferred):
    tile = total if total <= preferred else preferred
    # TODO(synk): pad the trailing axis if `total` is not a multiple of the
    # tile (e.g. real GPT-2 vocab 50257); the toy config divides evenly.
    assert total % tile == 0, (total, tile)
    return tile


# ----------------------------------------------------------------------------
# Pallas kernels
# ----------------------------------------------------------------------------
def _layernorm(x, gamma, beta, eps=_LN_EPS):
    mu = jnp.mean(x, axis=-1, keepdims=True)
    xc = x - mu
    var = jnp.mean(xc * xc, axis=-1, keepdims=True)
    return xc * jax.lax.rsqrt(var + eps) * gamma + beta


def attn_addnorm_kernel(x_ref, wqkv_ref, bqkv_ref, wo_ref, bo_ref,
                        g_ref, b_ref, o_ref, *, n_heads, scale):
    # One batch element per grid step.  The whole attention sub-layer
    # (QKV proj, per-head causal attention, output proj, residual + LayerNorm)
    # stays resident in VMEM: no HBM round trips for qkv / per-head context
    # and no XLA transpose glue between kernels.
    x = x_ref[0]                                       # (T, D) f32
    T, D = x.shape
    dh = D // n_heads

    xb = x.astype(jnp.bfloat16)
    qkv = (jnp.dot(xb, wqkv_ref[...], preferred_element_type=jnp.float32)
           + bqkv_ref[...])                            # (T, 3D) f32

    row = jax.lax.broadcasted_iota(jnp.int32, (T, T), 0)
    col = jax.lax.broadcasted_iota(jnp.int32, (T, T), 1)
    causal = col <= row

    ctx_heads = []
    for h in range(n_heads):                           # static unroll, H small
        q = qkv[:, h * dh:(h + 1) * dh].astype(jnp.bfloat16)
        k = qkv[:, D + h * dh:D + (h + 1) * dh].astype(jnp.bfloat16)
        v = qkv[:, 2 * D + h * dh:2 * D + (h + 1) * dh].astype(jnp.bfloat16)
        # contraction expressed directly -> no explicit k.T materialization
        s = jax.lax.dot_general(q, k, (((1,), (1,)), ((), ())),
                                preferred_element_type=jnp.float32) * scale
        s = jnp.where(causal, s, -1e9)                 # causal mask, f32
        s = s - jnp.max(s, axis=-1, keepdims=True)
        p = jnp.exp(s)
        p = p * pl.reciprocal(jnp.sum(p, axis=-1, keepdims=True), approx=True)
        ctx_heads.append(jnp.dot(p.astype(jnp.bfloat16), v,
                                 preferred_element_type=jnp.float32))
    ctx = jnp.concatenate(ctx_heads, axis=-1).astype(jnp.bfloat16)  # (T, D)

    attn = (jnp.dot(ctx, wo_ref[...], preferred_element_type=jnp.float32)
            + bo_ref[...])
    o_ref[0] = _layernorm(x + attn, g_ref[...], b_ref[...])
    # TODO(synk): for T >= 1024 switch to a flash-style online-softmax kernel
    # tiled over (q_tile, kv_tile) instead of materializing full (T,T) scores.


def ffn_addnorm_kernel(x_ref, w1_ref, b1_ref, w2_ref, b2_ref, g_ref, b_ref,
                       o_ref, acc_ref):
    # grid = (B, d_ff // TILE_F); the d_ff axis is a reduction into acc_ref.
    f = pl.program_id(1)

    @pl.when(f == 0)
    def _():
        acc_ref[...] = jnp.zeros_like(acc_ref)

    xb = x_ref[0].astype(jnp.bfloat16)
    h = (jnp.dot(xb, w1_ref[...], preferred_element_type=jnp.float32)
         + b1_ref[...])
    h = jnp.maximum(h, 0.0).astype(jnp.bfloat16)   # ReLU (see TODO re: GELU)
    acc_ref[...] += jnp.dot(h, w2_ref[...], preferred_element_type=jnp.float32)

    @pl.when(f == pl.num_programs(1) - 1)
    def _():
        y = x_ref[0] + acc_ref[...] + b2_ref[...]
        o_ref[0] = _layernorm(y, g_ref[...], b_ref[...])


def fc_kernel(x_ref, w_ref, b_ref, o_ref):
    # LM head, tiled over vocab: x (1,T,D), w (D,TILE_V), out (1,T,TILE_V).
    xb = x_ref[0].astype(jnp.bfloat16)
    o_ref[0] = (jnp.dot(xb, w_ref[...], preferred_element_type=jnp.float32)
                + b_ref[...])


# ----------------------------------------------------------------------------
# pallas_call wrappers
# ----------------------------------------------------------------------------
def run_attn_addnorm(x, w_qkv, b_qkv, wo, bo, g, b, n_heads):
    B, T, D = x.shape
    N = w_qkv.shape[1]
    scale = 1.0 / math.sqrt(D // n_heads)
    return pl.pallas_call(
        functools.partial(attn_addnorm_kernel, n_heads=n_heads, scale=scale),
        out_shape=jax.ShapeDtypeStruct((B, T, D), jnp.float32),
        grid=(B,),
        in_specs=[pl.BlockSpec((1, T, D), lambda i: (i, 0, 0)),
                  pl.BlockSpec((D, N), lambda i: (0, 0)),
                  pl.BlockSpec((1, N), lambda i: (0, 0)),
                  pl.BlockSpec((D, D), lambda i: (0, 0)),
                  pl.BlockSpec((1, D), lambda i: (0, 0)),
                  pl.BlockSpec((1, D), lambda i: (0, 0)),
                  pl.BlockSpec((1, D), lambda i: (0, 0))],
        out_specs=pl.BlockSpec((1, T, D), lambda i: (i, 0, 0)),
        compiler_params=pltpu.CompilerParams(dimension_semantics=("parallel",)),
    )(x, w_qkv, b_qkv, wo, bo, g, b)


def run_ffn_addnorm(x, w1, b1, w2, b2, g, b):
    B, T, D = x.shape
    F = w1.shape[1]
    tf = _pick_tile(F, _TILE_F)
    return pl.pallas_call(
        ffn_addnorm_kernel,
        out_shape=jax.ShapeDtypeStruct((B, T, D), jnp.float32),
        grid=(B, F // tf),
        in_specs=[pl.BlockSpec((1, T, D), lambda i, f: (i, 0, 0)),
                  pl.BlockSpec((D, tf), lambda i, f: (0, f)),
                  pl.BlockSpec((1, tf), lambda i, f: (0, f)),
                  pl.BlockSpec((tf, D), lambda i, f: (f, 0)),
                  pl.BlockSpec((1, D), lambda i, f: (0, 0)),
                  pl.BlockSpec((1, D), lambda i, f: (0, 0)),
                  pl.BlockSpec((1, D), lambda i, f: (0, 0))],
        out_specs=pl.BlockSpec((1, T, D), lambda i, f: (i, 0, 0)),
        scratch_shapes=[pltpu.VMEM((T, D), jnp.float32)],
        compiler_params=pltpu.CompilerParams(
            dimension_semantics=("parallel", "arbitrary")),
    )(x, w1, b1, w2, b2, g, b)


def run_fc(x, w, b):
    B, T, D = x.shape
    V = w.shape[1]
    tv = _pick_tile(V, _TILE_V)
    return pl.pallas_call(
        fc_kernel,
        out_shape=jax.ShapeDtypeStruct((B, T, V), jnp.float32),
        grid=(B, V // tv),
        in_specs=[pl.BlockSpec((1, T, D), lambda i, v: (i, 0, 0)),
                  pl.BlockSpec((D, tv), lambda i, v: (0, v)),
                  pl.BlockSpec((1, tv), lambda i, v: (0, v))],
        out_specs=pl.BlockSpec((1, T, tv), lambda i, v: (i, 0, v)),
        compiler_params=pltpu.CompilerParams(
            dimension_semantics=("parallel", "parallel")),
    )(x, w, b)


# ----------------------------------------------------------------------------
# Model
# ----------------------------------------------------------------------------
def transformer_block(x, p, n_heads):
    h1 = run_attn_addnorm(x, p["w_qkv"], p["b_qkv"], p["wo"], p["bo"],
                          p["ln1_g"], p["ln1_b"], n_heads)
    return run_ffn_addnorm(h1, p["w1"], p["b1"], p["w2"], p["b2"],
                           p["ln2_g"], p["ln2_b"])


def gpt2_forward(params, idx, n_heads):
    # idx: (B, T) int32 token ids
    _, T = idx.shape
    tok = jnp.take(params["wte"], idx, axis=0)               # embedding gather (glue)
    pos = params["wpe"][:T][None, :, :]
    x = (tok + pos).astype(jnp.float32)
    for blk in params["blocks"]:
        x = transformer_block(x, blk, n_heads)
    return run_fc(x, params["fc_w"], params["fc_b"])         # (B, T, V)


def init_params(key, vocab_size, d_model, d_ff, n_heads, n_layers, block_size):
    def nrm(k, shape, std=0.02, dtype=jnp.float32):
        return (std * jax.random.normal(k, shape, dtype=jnp.float32)).astype(dtype)

    keys = iter(jax.random.split(key, 3 + 4 * n_layers))
    params = {
        "wte": nrm(next(keys), (vocab_size, d_model)),
        "wpe": nrm(next(keys), (block_size, d_model)),
        "fc_w": nrm(next(keys), (d_model, vocab_size), dtype=jnp.bfloat16),
        "fc_b": jnp.zeros((1, vocab_size), jnp.float32),
        "blocks": [],
    }
    for _ in range(n_layers):
        blk = {
            "w_qkv": nrm(next(keys), (d_model, 3 * d_model), dtype=jnp.bfloat16),
            "b_qkv": jnp.zeros((1, 3 * d_model), jnp.float32),
            "wo": nrm(next(keys), (d_model, d_model), dtype=jnp.bfloat16),
            "bo": jnp.zeros((1, d_model), jnp.float32),
            "ln1_g": jnp.ones((1, d_model), jnp.float32),
            "ln1_b": jnp.zeros((1, d_model), jnp.float32),
            "w1": nrm(next(keys), (d_model, d_ff), dtype=jnp.bfloat16),
            "b1": jnp.zeros((1, d_ff), jnp.float32),
            "w2": nrm(next(keys), (d_ff, d_model), dtype=jnp.bfloat16),
            "b2": jnp.zeros((1, d_model), jnp.float32),
            "ln2_g": jnp.ones((1, d_model), jnp.float32),
            "ln2_b": jnp.zeros((1, d_model), jnp.float32),
        }
        params["blocks"].append(blk)
    return params


if __name__ == "__main__":
    # Small, lane-dense config consistent with
    # GPT2(vocab_size, d_model, d_ff, n_heads, n_layers, block_size, dropout).
    vocab_size, d_model, d_ff, n_heads, n_layers, block_size = 256, 128, 256, 4, 2, 16
    B, T = 2, 16

    key = jax.random.PRNGKey(0)
    pkey, ikey = jax.random.split(key)
    params = init_params(pkey, vocab_size, d_model, d_ff, n_heads, n_layers,
                         block_size)
    idx = jax.random.randint(ikey, (B, T), 0, vocab_size, dtype=jnp.int32)

    fwd = jax.jit(gpt2_forward, static_argnums=(2,))
    logits = fwd(params, idx, n_heads)
    jax.block_until_ready(logits)
    assert logits.shape == (B, T, vocab_size)
    assert bool(jnp.all(jnp.isfinite(logits)))
    print("KERNEL_OK")
</pallas_src>

<mosaic_0001>
module attributes {stable_mosaic.version = 11 : i64} {
  func.func @ffn_addnorm_kernel(%arg0: i32, %arg1: i32, %arg2: memref<1x16x128xf32, #tpu.memory_space<vmem>>, %arg3: memref<128x256xbf16, #tpu.memory_space<vmem>>, %arg4: memref<1x256xf32, #tpu.memory_space<vmem>>, %arg5: memref<256x128xbf16, #tpu.memory_space<vmem>>, %arg6: memref<1x128xf32, #tpu.memory_space<vmem>>, %arg7: memref<1x128xf32, #tpu.memory_space<vmem>>, %arg8: memref<1x128xf32, #tpu.memory_space<vmem>>, %arg9: memref<1x16x128xf32, #tpu.memory_space<vmem>>, %arg10: memref<16x128xf32, #tpu.memory_space<vmem>>) attributes {dimension_semantics = [#tpu.dimension_semantics<parallel>, #tpu.dimension_semantics<arbitrary>], iteration_bounds = array<i64: 2, 1>, scalar_prefetch = 0 : i64, scratch_operands = 1 : i64, tpu.core_type = #tpu.core_type<tc>, window_params = [{transform_indices = @transform_0, window_bounds = array<i64: 1, 16, 128>}, {transform_indices = @transform_1, window_bounds = array<i64: 128, 256>}, {transform_indices = @transform_2, window_bounds = array<i64: 1, 256>}, {transform_indices = @transform_3, window_bounds = array<i64: 256, 128>}, {pipeline_mode = #tpu.pipeline_mode<synchronous>, transform_indices = @transform_4, window_bounds = array<i64: 1, 128>}, {pipeline_mode = #tpu.pipeline_mode<synchronous>, transform_indices = @transform_5, window_bounds = array<i64: 1, 128>}, {pipeline_mode = #tpu.pipeline_mode<synchronous>, transform_indices = @transform_6, window_bounds = array<i64: 1, 128>}, {transform_indices = @transform_7, window_bounds = array<i64: 1, 16, 128>}]} {
    %c0_i32 = arith.constant 0 : i32
    %0 = arith.cmpi eq, %arg1, %c0_i32 : i32
    %1 = arith.extui %0 : i1 to i32
    %c0_i32_0 = arith.constant 0 : i32
    %2 = arith.cmpi ne, %1, %c0_i32_0 : i32
    scf.if %2 {
      %cst_17 = arith.constant 0.000000e+00 : f32
      %22 = vector.broadcast %cst_17 : f32 to vector<16x128xf32>
      %c0_18 = arith.constant 0 : index
      %c0_19 = arith.constant 0 : index
      %23 = vector.load %arg10[%c0_18, %c0_19] : memref<16x128xf32, #tpu.memory_space<vmem>>, vector<16x128xf32>
      tpu.vector_store %arg10[%c0_18, %c0_19], %22 {strides = array<i32>} : memref<16x128xf32, #tpu.memory_space<vmem>>, vector<16x128xf32>,
    } else {
    }
    %c0 = arith.constant 0 : index
    %c0_1 = arith.constant 0 : index
    %c0_2 = arith.constant 0 : index
    %3 = vector.load %arg2[%c0, %c0_1, %c0_2] : memref<1x16x128xf32, #tpu.memory_space<vmem>>, vector<1x16x128xf32>
    %4 = vector.shape_cast %3 : vector<1x16x128xf32> to vector<16x128xf32>
    %5 = arith.truncf %4 : vector<16x128xf32> to vector<16x128xbf16>
    %c0_3 = arith.constant 0 : index
    %c0_4 = arith.constant 0 : index
    %6 = vector.load %arg3[%c0_3, %c0_4] : memref<128x256xbf16, #tpu.memory_space<vmem>>, vector<128x256xbf16>
    %cst = arith.constant dense<0.000000e+00> : vector<16x256xf32>
    %7 = tpu.matmul %5, %6, %cst {dimension_numbers = #tpu.dot_dimension_numbers<[1], [0], [0], [1], [0, 0, 1, 1], [], []>} : vector<16x128xbf16>, vector<128x256xbf16>, vector<16x256xf32> -> vector<16x256xf32>
    %c0_5 = arith.constant 0 : index
    %c0_6 = arith.constant 0 : index
    %8 = vector.load %arg4[%c0_5, %c0_6] : memref<1x256xf32, #tpu.memory_space<vmem>>, vector<1x256xf32>
    %9 = vector.broadcast %8 : vector<1x256xf32> to vector<16x256xf32>
    %10 = arith.addf %7, %9 : vector<16x256xf32>
    %cst_7 = arith.constant 0.000000e+00 : f32
    %11 = vector.broadcast %cst_7 : f32 to vector<16x256xf32>
    %12 = arith.maximumf %10, %11 : vector<16x256xf32>
    %13 = arith.truncf %12 : vector<16x256xf32> to vector<16x256xbf16>
    %c0_8 = arith.constant 0 : index
    %c0_9 = arith.constant 0 : index
    %14 = vector.load %arg10[%c0_8, %c0_9] : memref<16x128xf32, #tpu.memory_space<vmem>>, vector<16x128xf32>
    %c0_10 = arith.constant 0 : index
    %c0_11 = arith.constant 0 : index
    %15 = vector.load %arg5[%c0_10, %c0_11] : memref<256x128xbf16, #tpu.memory_space<vmem>>, vector<256x128xbf16>
    %cst_12 = arith.constant dense<0.000000e+00> : vector<16x128xf32>
    %16 = tpu.matmul %13, %15, %cst_12 {dimension_numbers = #tpu.dot_dimension_numbers<[1], [0], [0], [1], [0, 0, 1, 1], [], []>} : vector<16x256xbf16>, vector<256x128xbf16>, vector<16x128xf32> -> vector<16x128xf32>
    %17 = arith.addf %14, %16 : vector<16x128xf32>
    %c0_13 = arith.constant 0 : index
    %c0_14 = arith.constant 0 : index
    %18 = vector.load %arg10[%c0_13, %c0_14] : memref<16x128xf32, #tpu.memory_space<vmem>>, vector<16x128xf32>
    tpu.vector_store %arg10[%c0_13, %c0_14], %17 {strides = array<i32>} : memref<16x128xf32, #tpu.memory_space<vmem>>, vector<16x128xf32>,
    %c0_i32_15 = arith.constant 0 : i32
    %19 = arith.cmpi eq, %arg1, %c0_i32_15 : i32
    %20 = arith.extui %19 : i1 to i32
    %c0_i32_16 = arith.constant 0 : i32
    %21 = arith.cmpi ne, %20, %c0_i32_16 : i32
    scf.if %21 {
      %c0_17 = arith.constant 0 : index
      %c0_18 = arith.constant 0 : index
      %c0_19 = arith.constant 0 : index
      %22 = vector.load %arg2[%c0_17, %c0_18, %c0_19] : memref<1x16x128xf32, #tpu.memory_space<vmem>>, vector<1x16x128xf32>
      %23 = vector.shape_cast %22 : vector<1x16x128xf32> to vector<16x128xf32>
      %c0_20 = arith.constant 0 : index
      %c0_21 = arith.constant 0 : index
      %24 = vector.load %arg10[%c0_20, %c0_21] : memref<16x128xf32, #tpu.memory_space<vmem>>, vector<16x128xf32>
      %25 = arith.addf %23, %24 : vector<16x128xf32>
      %c0_22 = arith.constant 0 : index
      %c0_23 = arith.constant 0 : index
      %26 = vector.load %arg6[%c0_22, %c0_23] : memref<1x128xf32, #tpu.memory_space<vmem>>, vector<1x128xf32>
      %27 = vector.broadcast %26 : vector<1x128xf32> to vector<16x128xf32>
      %28 = arith.addf %25, %27 : vector<16x128xf32>
      %c0_24 = arith.constant 0 : index
      %c0_25 = arith.constant 0 : index
      %29 = vector.load %arg7[%c0_24, %c0_25] : memref<1x128xf32, #tpu.memory_space<vmem>>, vector<1x128xf32>
      %c0_26 = arith.constant 0 : index
      %c0_27 = arith.constant 0 : index
      %30 = vector.load %arg8[%c0_26, %c0_27] : memref<1x128xf32, #tpu.memory_space<vmem>>, vector<1x128xf32>
      %cst_28 = arith.constant dense<0.000000e+00> : vector<16xf32>
      %31 = vector.multi_reduction <add>, %28, %cst_28 [1] : vector<16x128xf32> to vector<16xf32>
      %32 = vector.shape_cast %31 : vector<16xf32> to vector<16x1xf32>
      %cst_29 = arith.constant 1.280000e+02 : f32
      %33 = vector.broadcast %cst_29 : f32 to vector<16x1xf32>
      %34 = arith.divf %32, %33 : vector<16x1xf32>
      %35 = vector.broadcast %34 : vector<16x1xf32> to vector<16x128xf32>
      %36 = arith.subf %28, %35 : vector<16x128xf32>
      %37 = arith.mulf %36, %36 : vector<16x128xf32>
      %cst_30 = arith.constant dense<0.000000e+00> : vector<16xf32>
      %38 = vector.multi_reduction <add>, %37, %cst_30 [1] : vector<16x128xf32> to vector<16xf32>
      %39 = vector.shape_cast %38 : vector<16xf32> to vector<16x1xf32>
      %cst_31 = arith.constant 1.280000e+02 : f32
      %40 = vector.broadcast %cst_31 : f32 to vector<16x1xf32>
      %41 = arith.divf %39, %40 : vector<16x1xf32>
      %cst_32 = arith.constant 9.99999974E-6 : f32
      %42 = vector.broadcast %cst_32 : f32 to vector<16x1xf32>
      %43 = arith.addf %41, %42 : vector<16x1xf32>
      %44 = math.rsqrt %43 : vector<16x1xf32>
      %45 = vector.broadcast %44 : vector<16x1xf32> to vector<16x128xf32>
      %46 = arith.mulf %36, %45 : vector<16x128xf32>
      %47 = vector.broadcast %29 : vector<1x128xf32> to vector<16x128xf32>
      %48 = arith.mulf %46, %47 : vector<16x128xf32>
      %49 = vector.broadcast %30 : vector<1x128xf32> to vector<16x128xf32>
      %50 = arith.addf %48, %49 : vector<16x128xf32>
      %c0_33 = arith.constant 0 : index
      %c0_34 = arith.constant 0 : index
      %c0_35 = arith.constant 0 : index
      %51 = vector.load %arg9[%c0_33, %c0_34, %c0_35] : memref<1x16x128xf32, #tpu.memory_space<vmem>>, vector<1x16x128xf32>
      %52 = vector.shape_cast %51 : vector<1x16x128xf32> to vector<16x128xf32>
      %53 = vector.shape_cast %50 : vector<16x128xf32> to vector<1x16x128xf32>
      tpu.vector_store %arg9[%c0_33, %c0_34, %c0_35], %53 {strides = array<i32>} : memref<1x16x128xf32, #tpu.memory_space<vmem>>, vector<1x16x128xf32>,
    } else {
    }
    return
  }
  func.func @transform_0(%arg0: i32, %arg1: i32) -> (i32, i32, i32) {
    %c0_i32 = arith.constant 0 : i32
    %c0_i32_0 = arith.constant 0 : i32
    %c0_i32_1 = arith.constant 0 : i32
    return %arg0, %c0_i32, %c0_i32_0 : i32, i32, i32
  }
  func.func @transform_1(%arg0: i32, %arg1: i32) -> (i32, i32) {
    %c0_i32 = arith.constant 0 : i32
    %c0_i32_0 = arith.constant 0 : i32
    return %c0_i32, %arg1 : i32, i32
  }
  func.func @transform_2(%arg0: i32, %arg1: i32) -> (i32, i32) {
    %c0_i32 = arith.constant 0 : i32
    %c0_i32_0 = arith.constant 0 : i32
    return %c0_i32, %arg1 : i32, i32
  }
  func.func @transform_3(%arg0: i32, %arg1: i32) -> (i32, i32) {
    %c0_i32 = arith.constant 0 : i32
    %c0_i32_0 = arith.constant 0 : i32
    return %arg1, %c0_i32 : i32, i32
  }
  func.func @transform_4(%arg0: i32, %arg1: i32) -> (i32, i32) {
    %c0_i32 = arith.constant 0 : i32
    %c0_i32_0 = arith.constant 0 : i32
    %c0_i32_1 = arith.constant 0 : i32
    return %c0_i32, %c0_i32_0 : i32, i32
  }
  func.func @transform_5(%arg0: i32, %arg1: i32) -> (i32, i32) {
    %c0_i32 = arith.constant 0 : i32
    %c0_i32_0 = arith.constant 0 : i32
    %c0_i32_1 = arith.constant 0 : i32
    return %c0_i32, %c0_i32_0 : i32, i32
  }
  func.func @transform_6(%arg0: i32, %arg1: i32) -> (i32, i32) {
    %c0_i32 = arith.constant 0 : i32
    %c0_i32_0 = arith.constant 0 : i32
    %c0_i32_1 = arith.constant 0 : i32
    return %c0_i32, %c0_i32_0 : i32, i32
  }
  func.func @transform_7(%arg0: i32, %arg1: i32) -> (i32, i32, i32) {
    %c0_i32 = arith.constant 0 : i32
    %c0_i32_0 = arith.constant 0 : i32
    %c0_i32_1 = arith.constant 0 : i32
    return %arg0, %c0_i32, %c0_i32_0 : i32, i32, i32
  }
}

module attributes {stable_mosaic.version = 11 : i64} {
  func.func @attn_addnorm_kernel(%arg0: i32, %arg1: memref<1x16x128xf32, #tpu.memory_space<vmem>>, %arg2: memref<128x384xbf16, #tpu.memory_space<vmem>>, %arg3: memref<1x384xf32, #tpu.memory_space<vmem>>, %arg4: memref<128x128xbf16, #tpu.memory_space<vmem>>, %arg5: memref<1x128xf32, #tpu.memory_space<vmem>>, %arg6: memref<1x128xf32, #tpu.memory_space<vmem>>, %arg7: memref<1x128xf32, #tpu.memory_space<vmem>>, %arg8: memref<1x16x128xf32, #tpu.memory_space<vmem>>) attributes {dimension_semantics = [#tpu.dimension_semantics<parallel>], iteration_bounds = array<i64: 2>, scalar_prefetch = 0 : i64, scratch_operands = 0 : i64, tpu.core_type = #tpu.core_type<tc>, window_params = [{transform_indices = @transform_0, window_bounds = array<i64: 1, 16, 128>}, {pipeline_mode = #tpu.pipeline_mode<synchronous>, transform_indices = @transform_1, window_bounds = array<i64: 128, 384>}, {pipeline_mode = #tpu.pipeline_mode<synchronous>, transform_indices = @transform_2, window_bounds = array<i64: 1, 384>}, {pipeline_mode = #tpu.pipeline_mode<synchronous>, transform_indices = @transform_3, window_bounds = array<i64: 128, 128>}, {pipeline_mode = #tpu.pipeline_mode<synchronous>, transform_indices = @transform_4, window_bounds = array<i64: 1, 128>}, {pipeline_mode = #tpu.pipeline_mode<synchronous>, transform_indices = @transform_5, window_bounds = array<i64: 1, 128>}, {pipeline_mode = #tpu.pipeline_mode<synchronous>, transform_indices = @transform_6, window_bounds = array<i64: 1, 128>}, {transform_indices = @transform_7, window_bounds = array<i64: 1, 16, 128>}]} {
    %c0 = arith.constant 0 : index
    %c0_0 = arith.constant 0 : index
    %c0_1 = arith.constant 0 : index
    %0 = vector.load %arg1[%c0, %c0_0, %c0_1] : memref<1x16x128xf32, #tpu.memory_space<vmem>>, vector<1x16x128xf32>
    %1 = vector.shape_cast %0 : vector<1x16x128xf32> to vector<16x128xf32>
    %2 = arith.truncf %1 : vector<16x128xf32> to vector<16x128xbf16>
    %c0_2 = arith.constant 0 : index
    %c0_3 = arith.constant 0 : index
    %3 = vector.load %arg2[%c0_2, %c0_3] : memref<128x384xbf16, #tpu.memory_space<vmem>>, vector<128x384xbf16>
    %cst = arith.constant dense<0.000000e+00> : vector<16x384xf32>
    %4 = tpu.matmul %2, %3, %cst {dimension_numbers = #tpu.dot_dimension_numbers<[1], [0], [0], [1], [0, 0, 1, 1], [], []>} : vector<16x128xbf16>, vector<128x384xbf16>, vector<16x384xf32> -> vector<16x384xf32>
    %c0_4 = arith.constant 0 : index
    %c0_5 = arith.constant 0 : index
    %5 = vector.load %arg3[%c0_4, %c0_5] : memref<1x384xf32, #tpu.memory_space<vmem>>, vector<1x384xf32>
    %6 = vector.broadcast %5 : vector<1x384xf32> to vector<16x384xf32>
    %7 = arith.addf %4, %6 : vector<16x384xf32>
    %8 = tpu.iota {dimensions = array<i32: 0>} : vector<16x16xi32>
    %9 = tpu.iota {dimensions = array<i32: 1>} : vector<16x16xi32>
    %10 = arith.cmpi sle, %9, %8 : vector<16x16xi32>
    %11 = vector.extract_strided_slice %7 {offsets = [0, 0], sizes = [16, 32], strides = [1, 1]} : vector<16x384xf32> to vector<16x32xf32>
    %12 = arith.truncf %11 : vector<16x32xf32> to vector<16x32xbf16>
    %13 = vector.extract_strided_slice %7 {offsets = [0, 128], sizes = [16, 32], strides = [1, 1]} : vector<16x384xf32> to vector<16x32xf32>
    %14 = arith.truncf %13 : vector<16x32xf32> to vector<16x32xbf16>
    %15 = vector.extract_strided_slice %7 {offsets = [0, 256], sizes = [16, 32], strides = [1, 1]} : vector<16x384xf32> to vector<16x32xf32>
    %16 = arith.truncf %15 : vector<16x32xf32> to vector<16x32xbf16>
    %cst_6 = arith.constant dense<0.000000e+00> : vector<16x16xf32>
    %17 = tpu.matmul %12, %14, %cst_6 {dimension_numbers = #tpu.dot_dimension_numbers<[1], [1], [0], [0], [0, 0, 1, 0], [], []>} : vector<16x32xbf16>, vector<16x32xbf16>, vector<16x16xf32> -> vector<16x16xf32>
    %cst_7 = arith.constant 0.176776692 : f32
    %18 = vector.broadcast %cst_7 : f32 to vector<16x16xf32>
    %19 = arith.mulf %17, %18 : vector<16x16xf32>
    %cst_8 = arith.constant -1.000000e+09 : f32
    %20 = vector.broadcast %cst_8 : f32 to vector<16x16xf32>
    %21 = arith.select %10, %19, %20 : vector<16x16xi1>, vector<16x16xf32>
    %cst_9 = arith.constant dense<0xFF800000> : vector<16xf32>
    %22 = vector.multi_reduction <maximumf>, %21, %cst_9 [1] : vector<16x16xf32> to vector<16xf32>
    %23 = vector.shape_cast %22 : vector<16xf32> to vector<16x1xf32>
    %24 = vector.broadcast %23 : vector<16x1xf32> to vector<16x16xf32>
    %25 = arith.subf %21, %24 : vector<16x16xf32>
    %26 = math.exp %25 : vector<16x16xf32>
    %cst_10 = arith.constant dense<0.000000e+00> : vector<16xf32>
    %27 = vector.multi_reduction <add>, %26, %cst_10 [1] : vector<16x16xf32> to vector<16xf32>
    %28 = vector.shape_cast %27 : vector<16xf32> to vector<16x1xf32>
    %29 = tpu.reciprocal %28 {approx = true} : vector<16x1xf32> -> vector<16x1xf32>
    %30 = vector.broadcast %29 : vector<16x1xf32> to vector<16x16xf32>
    %31 = arith.mulf %26, %30 : vector<16x16xf32>
    %32 = arith.truncf %31 : vector<16x16xf32> to vector<16x16xbf16>
    %cst_11 = arith.constant dense<0.000000e+00> : vector<16x32xf32>
    %33 = tpu.matmul %32, %16, %cst_11 {dimension_numbers = #tpu.dot_dimension_numbers<[1], [0], [0], [1], [0, 0, 1, 1], [], []>} : vector<16x16xbf16>, vector<16x32xbf16>, vector<16x32xf32> -> vector<16x32xf32>
    %34 = vector.extract_strided_slice %7 {offsets = [0, 32], sizes = [16, 32], strides = [1, 1]} : vector<16x384xf32> to vector<16x32xf32>
    %35 = arith.truncf %34 : vector<16x32xf32> to vector<16x32xbf16>
    %36 = vector.extract_strided_slice %7 {offsets = [0, 160], sizes = [16, 32], strides = [1, 1]} : vector<16x384xf32> to vector<16x32xf32>
    %37 = arith.truncf %36 : vector<16x32xf32> to vector<16x32xbf16>
    %38 = vector.extract_strided_slice %7 {offsets = [0, 288], sizes = [16, 32], strides = [1, 1]} : vector<16x384xf32> to vector<16x32xf32>
    %39 = arith.truncf %38 : vector<16x32xf32> to vector<16x32xbf16>
    %cst_12 = arith.constant dense<0.000000e+00> : vector<16x16xf32>
    %40 = tpu.matmul %35, %37, %cst_12 {dimension_numbers = #tpu.dot_dimension_numbers<[1], [1], [0], [0], [0, 0, 1, 0], [], []>} : vector<16x32xbf16>, vector<16x32xbf16>, vector<16x16xf32> -> vector<16x16xf32>
    %cst_13 = arith.constant 0.176776692 : f32
    %41 = vector.broadcast %cst_13 : f32 to vector<16x16xf32>
    %42 = arith.mulf %40, %41 : vector<16x16xf32>
    %cst_14 = arith.constant -1.000000e+09 : f32
    %43 = vector.broadcast %cst_14 : f32 to vector<16x16xf32>
    %44 = arith.select %10, %42, %43 : vector<16x16xi1>, vector<16x16xf32>
    %cst_15 = arith.constant dense<0xFF800000> : vector<16xf32>
    %45 = vector.multi_reduction <maximumf>, %44, %cst_15 [1] : vector<16x16xf32> to vector<16xf32>
    %46 = vector.shape_cast %45 : vector<16xf32> to vector<16x1xf32>
    %47 = vector.broadcast %46 : vector<16x1xf32> to vector<16x16xf32>
    %48 = arith.subf %44, %47 : vector<16x16xf32>
    %49 = math.exp %48 : vector<16x16xf32>
    %cst_16 = arith.constant dense<0.000000e+00> : vector<16xf32>
    %50 = vector.multi_reduction <add>, %49, %cst_16 [1] : vector<16x16xf32> to vector<16xf32>
    %51 = vector.shape_cast %50 : vector<16xf32> to vector<16x1xf32>
    %52 = tpu.reciprocal %51 {approx = true} : vector<16x1xf32> -> vector<16x1xf32>
    %53 = vector.broadcast %52 : vector<16x1xf32> to vector<16x16xf32>
    %54 = arith.mulf %49, %53 : vector<16x16xf32>
    %55 = arith.truncf %54 : vector<16x16xf32> to vector<16x16xbf16>
    %cst_17 = arith.constant dense<0.000000e+00> : vector<16x32xf32>
    %56 = tpu.matmul %55, %39, %cst_17 {dimension_numbers = #tpu.dot_dimension_numbers<[1], [0], [0], [1], [0, 0, 1, 1], [], []>} : vector<16x16xbf16>, vector<16x32xbf16>, vector<16x32xf32> -> vector<16x32xf32>
    %57 = vector.extract_strided_slice %7 {offsets = [0, 64], sizes = [16, 32], strides = [1, 1]} : vector<16x384xf32> to vector<16x32xf32>
    %58 = arith.truncf %57 : vector<16x32xf32> to vector<16x32xbf16>
    %59 = vector.extract_strided_slice %7 {offsets = [0, 192], sizes = [16, 32], strides = [1, 1]} : vector<16x384xf32> to vector<16x32xf32>
    %60 = arith.truncf %59 : vector<16x32xf32> to vector<16x32xbf16>
    %61 = vector.extract_strided_slice %7 {offsets = [0, 320], sizes = [16, 32], strides = [1, 1]} : vector<16x384xf32> to vector<16x32xf32>
    %62 = arith.truncf %61 : vector<16x32xf32> to vector<16x32xbf16>
    %cst_18 = arith.constant dense<0.000000e+00> : vector<16x16xf32>
    %63 = tpu.matmul %58, %60, %cst_18 {dimension_numbers = #tpu.dot_dimension_numbers<[1], [1], [0], [0], [0, 0, 1, 0], [], []>} : vector<16x32xbf16>, vector<16x32xbf16>, vector<16x16xf32> -> vector<16x16xf32>
    %cst_19 = arith.constant 0.176776692 : f32
    %64 = vector.broadcast %cst_19 : f32 to vector<16x16xf32>
    %65 = arith.mulf %63, %64 : vector<16x16xf32>
    %cst_20 = arith.constant -1.000000e+09 : f32
    %66 = vector.broadcast %cst_20 : f32 to vector<16x16xf32>
    %67 = arith.select %10, %65, %66 : vector<16x16xi1>, vector<16x16xf32>
    %cst_21 = arith.constant dense<0xFF800000> : vector<16xf32>
    %68 = vector.multi_reduction <maximumf>, %67, %cst_21 [1] : vector<16x16xf32> to vector<16xf32>
    %69 = vector.shape_cast %68 : vector<16xf32> to vector<16x1xf32>
    %70 = vector.broadcast %69 : vector<16x1xf32> to vector<16x16xf32>
    %71 = arith.subf %67, %70 : vector<16x16xf32>
    %72 = math.exp %71 : vector<16x16xf32>
    %cst_22 = arith.constant dense<0.000000e+00> : vector<16xf32>
    %73 = vector.multi_reduction <add>, %72, %cst_22 [1] : vector<16x16xf32> to vector<16xf32>
    %74 = vector.shape_cast %73 : vector<16xf32> to vector<16x1xf32>
    %75 = tpu.reciprocal %74 {approx = true} : vector<16x1xf32> -> vector<16x1xf32>
    %76 = vector.broadcast %75 : vector<16x1xf32> to vector<16x16xf32>
    %77 = arith.mulf %72, %76 : vector<16x16xf32>
    %78 = arith.truncf %77 : vector<16x16xf32> to vector<16x16xbf16>
    %cst_23 = arith.constant dense<0.000000e+00> : vector<16x32xf32>
    %79 = tpu.matmul %78, %62, %cst_23 {dimension_numbers = #tpu.dot_dimension_numbers<[1], [0], [0], [1], [0, 0, 1, 1], [], []>} : vector<16x16xbf16>, vector<16x32xbf16>, vector<16x32xf32> -> vector<16x32xf32>
    %80 = vector.extract_strided_slice %7 {offsets = [0, 96], sizes = [16, 32], strides = [1, 1]} : vector<16x384xf32> to vector<16x32xf32>
    %81 = arith.truncf %80 : vector<16x32xf32> to vector<16x32xbf16>
    %82 = vector.extract_strided_slice %7 {offsets = [0, 224], sizes = [16, 32], strides = [1, 1]} : vector<16x384xf32> to vector<16x32xf32>
    %83 = arith.truncf %82 : vector<16x32xf32> to vector<16x32xbf16>
    %84 = vector.extract_strided_slice %7 {offsets = [0, 352], sizes = [16, 32], strides = [1, 1]} : vector<16x384xf32> to vector<16x32xf32>
    %85 = arith.truncf %84 : vector<16x32xf32> to vector<16x32xbf16>
    %cst_24 = arith.constant dense<0.000000e+00> : vector<16x16xf32>
    %86 = tpu.matmul %81, %83, %cst_24 {dimension_numbers = #tpu.dot_dimension_numbers<[1], [1], [0], [0], [0, 0, 1, 0], [], []>} : vector<16x32xbf16>, vector<16x32xbf16>, vector<16x16xf32> -> vector<16x16xf32>
    %cst_25 = arith.constant 0.176776692 : f32
    %87 = vector.broadcast %cst_25 : f32 to vector<16x16xf32>
    %88 = arith.mulf %86, %87 : vector<16x16xf32>
    %cst_26 = arith.constant -1.000000e+09 : f32
    %89 = vector.broadcast %cst_26 : f32 to vector<16x16xf32>
    %90 = arith.select %10, %88, %89 : vector<16x16xi1>, vector<16x16xf32>
    %cst_27 = arith.constant dense<0xFF800000> : vector<16xf32>
    %91 = vector.multi_reduction <maximumf>, %90, %cst_27 [1] : vector<16x16xf32> to vector<16xf32>
    %92 = vector.shape_cast %91 : vector<16xf32> to vector<16x1xf32>
    %93 = vector.broadcast %92 : vector<16x1xf32> to vector<16x16xf32>
    %94 = arith.subf %90, %93 : vector<16x16xf32>
    %95 = math.exp %94 : vector<16x16xf32>
    %cst_28 = arith.constant dense<0.000000e+00> : vector<16xf32>
    %96 = vector.multi_reduction <add>, %95, %cst_28 [1] : vector<16x16xf32> to vector<16xf32>
    %97 = vector.shape_cast %96 : vector<16xf32> to vector<16x1xf32>
    %98 = tpu.reciprocal %97 {approx = true} : vector<16x1xf32> -> vector<16x1xf32>
    %99 = vector.broadcast %98 : vector<16x1xf32> to vector<16x16xf32>
    %100 = arith.mulf %95, %99 : vector<16x16xf32>
    %101 = arith.truncf %100 : vector<16x16xf32> to vector<16x16xbf16>
    %cst_29 = arith.constant dense<0.000000e+00> : vector<16x32xf32>
    %102 = tpu.matmul %101, %85, %cst_29 {dimension_numbers = #tpu.dot_dimension_numbers<[1], [0], [0], [1], [0, 0, 1, 1], [], []>} : vector<16x16xbf16>, vector<16x32xbf16>, vector<16x32xf32> -> vector<16x32xf32>
    %103 = tpu.concatenate %33, %56, %79, %102 in 1 : vector<16x32xf32>, vector<16x32xf32>, vector<16x32xf32>, vector<16x32xf32> -> vector<16x128xf32>
    %104 = arith.truncf %103 : vector<16x128xf32> to vector<16x128xbf16>
    %c0_30 = arith.constant 0 : index
    %c0_31 = arith.constant 0 : index
    %105 = vector.load %arg4[%c0_30, %c0_31] : memref<128x128xbf16, #tpu.memory_space<vmem>>, vector<128x128xbf16>
    %cst_32 = arith.constant dense<0.000000e+00> : vector<16x128xf32>
    %106 = tpu.matmul %104, %105, %cst_32 {dimension_numbers = #tpu.dot_dimension_numbers<[1], [0], [0], [1], [0, 0, 1, 1], [], []>} : vector<16x128xbf16>, vector<128x128xbf16>, vector<16x128xf32> -> vector<16x128xf32>
    %c0_33 = arith.constant 0 : index
    %c0_34 = arith.constant 0 : index
    %107 = vector.load %arg5[%c0_33, %c0_34] : memref<1x128xf32, #tpu.memory_space<vmem>>, vector<1x128xf32>
    %108 = vector.broadcast %107 : vector<1x128xf32> to vector<16x128xf32>
    %109 = arith.addf %106, %108 : vector<16x128xf32>
    %110 = arith.addf %1, %109 : vector<16x128xf32>
    %c0_35 = arith.constant 0 : index
    %c0_36 = arith.constant 0 : index
    %111 = vector.load %arg6[%c0_35, %c0_36] : memref<1x128xf32, #tpu.memory_space<vmem>>, vector<1x128xf32>
    %c0_37 = arith.constant 0 : index
    %c0_38 = arith.constant 0 : index
    %112 = vector.load %arg7[%c0_37, %c0_38] : memref<1x128xf32, #tpu.memory_space<vmem>>, vector<1x128xf32>
    %cst_39 = arith.constant dense<0.000000e+00> : vector<16xf32>
    %113 = vector.multi_reduction <add>, %110, %cst_39 [1] : vector<16x128xf32> to vector<16xf32>
    %114 = vector.shape_cast %113 : vector<16xf32> to vector<16x1xf32>
    %cst_40 = arith.constant 1.280000e+02 : f32
    %115 = vector.broadcast %cst_40 : f32 to vector<16x1xf32>
    %116 = arith.divf %114, %115 : vector<16x1xf32>
    %117 = vector.broadcast %116 : vector<16x1xf32> to vector<16x128xf32>
    %118 = arith.subf %110, %117 : vector<16x128xf32>
    %119 = arith.mulf %118, %118 : vector<16x128xf32>
    %cst_41 = arith.constant dense<0.000000e+00> : vector<16xf32>
    %120 = vector.multi_reduction <add>, %119, %cst_41 [1] : vector<16x128xf32> to vector<16xf32>
    %121 = vector.shape_cast %120 : vector<16xf32> to vector<16x1xf32>
    %cst_42 = arith.constant 1.280000e+02 : f32
    %122 = vector.broadcast %cst_42 : f32 to vector<16x1xf32>
    %123 = arith.divf %121, %122 : vector<16x1xf32>
    %cst_43 = arith.constant 9.99999974E-6 : f32
    %124 = vector.broadcast %cst_43 : f32 to vector<16x1xf32>
    %125 = arith.addf %123, %124 : vector<16x1xf32>
    %126 = math.rsqrt %125 : vector<16x1xf32>
    %127 = vector.broadcast %126 : vector<16x1xf32> to vector<16x128xf32>
    %128 = arith.mulf %118, %127 : vector<16x128xf32>
    %129 = vector.broadcast %111 : vector<1x128xf32> to vector<16x128xf32>
    %130 = arith.mulf %128, %129 : vector<16x128xf32>
    %131 = vector.broadcast %112 : vector<1x128xf32> to vector<16x128xf32>
    %132 = arith.addf %130, %131 : vector<16x128xf32>
    %c0_44 = arith.constant 0 : index
    %c0_45 = arith.constant 0 : index
    %c0_46 = arith.constant 0 : index
    %133 = vector.load %arg8[%c0_44, %c0_45, %c0_46] : memref<1x16x128xf32, #tpu.memory_space<vmem>>, vector<1x16x128xf32>
    %134 = vector.shape_cast %133 : vector<1x16x128xf32> to vector<16x128xf32>
    %135 = vector.shape_cast %132 : vector<16x128xf32> to vector<1x16x128xf32>
    tpu.vector_store %arg8[%c0_44, %c0_45, %c0_46], %135 {strides = array<i32>} : memref<1x16x128xf32, #tpu.memory_space<vmem>>, vector<1x16x128xf32>,
    return
  }
  func.func @transform_0(%arg0: i32) -> (i32, i32, i32) {
    %c0_i32 = arith.constant 0 : i32
    %c0_i32_0 = arith.constant 0 : i32
    %c0_i32_1 = arith.constant 0 : i32
    return %arg0, %c0_i32, %c0_i32_0 : i32, i32, i32
  }
  func.func @transform_1(%arg0: i32) -> (i32, i32) {
    %c0_i32 = arith.constant 0 : i32
    %c0_i32_0 = arith.constant 0 : i32
    %c0_i32_1 = arith.constant 0 : i32
    return %c0_i32, %c0_i32_0 : i32, i32
  }
  func.func @transform_2(%arg0: i32) -> (i32, i32) {
    %c0_i32 = arith.constant 0 : i32
    %c0_i32_0 = arith.constant 0 : i32
    %c0_i32_1 = arith.constant 0 : i32
    return %c0_i32, %c0_i32_0 : i32, i32
  }
  func.func @transform_3(%arg0: i32) -> (i32, i32) {
    %c0_i32 = arith.constant 0 : i32
    %c0_i32_0 = arith.constant 0 : i32
    %c0_i32_1 = arith.constant 0 : i32
    return %c0_i32, %c0_i32_0 : i32, i32
  }
  func.func @transform_4(%arg0: i32) -> (i32, i32) {
    %c0_i32 = arith.constant 0 : i32
    %c0_i32_0 = arith.constant 0 : i32
    %c0_i32_1 = arith.constant 0 : i32
    return %c0_i32, %c0_i32_0 : i32, i32
  }
  func.func @transform_5(%arg0: i32) -> (i32, i32) {
    %c0_i32 = arith.constant 0 : i32
    %c0_i32_0 = arith.constant 0 : i32
    %c0_i32_1 = arith.constant 0 : i32
    return %c0_i32, %c0_i32_0 : i32, i32
  }
  func.func @transform_6(%arg0: i32) -> (i32, i32) {
    %c0_i32 = arith.constant 0 : i32
    %c0_i32_0 = arith.constant 0 : i32
    %c0_i32_1 = arith.constant 0 : i32
    return %c0_i32, %c0_i32_0 : i32, i32
  }
  func.func @transform_7(%arg0: i32) -> (i32, i32, i32) {
    %c0_i32 = arith.constant 0 : i32
    %c0_i32_0 = arith.constant 0 : i32
    %c0_i32_1 = arith.constant 0 : i32
    return %arg0, %c0_i32, %c0_i32_0 : i32, i32, i32
  }
}

module attributes {stable_mosaic.version = 11 : i64} {
  func.func @attn_addnorm_kernel(%arg0: i32, %arg1: memref<1x16x128xf32, #tpu.memory_space<vmem>>, %arg2: memref<128x384xbf16, #tpu.memory_space<vmem>>, %arg3: memref<1x384xf32, #tpu.memory_space<vmem>>, %arg4: memref<128x128xbf16, #tpu.memory_space<vmem>>, %arg5: memref<1x128xf32, #tpu.memory_space<vmem>>, %arg6: memref<1x128xf32, #tpu.memory_space<vmem>>, %arg7: memref<1x128xf32, #tpu.memory_space<vmem>>, %arg8: memref<1x16x128xf32, #tpu.memory_space<vmem>>) attributes {dimension_semantics = [#tpu.dimension_semantics<parallel>], iteration_bounds = array<i64: 2>, scalar_prefetch = 0 : i64, scratch_operands = 0 : i64, tpu.core_type = #tpu.core_type<tc>, window_params = [{transform_indices = @transform_0, window_bounds = array<i64: 1, 16, 128>}, {pipeline_mode = #tpu.pipeline_mode<synchronous>, transform_indices = @transform_1, window_bounds = array<i64: 128, 384>}, {pipeline_mode = #tpu.pipeline_mode<synchronous>, transform_indices = @transform_2, window_bounds = array<i64: 1, 384>}, {pipeline_mode = #tpu.pipeline_mode<synchronous>, transform_indices = @transform_3, window_bounds = array<i64: 128, 128>}, {pipeline_mode = #tpu.pipeline_mode<synchronous>, transform_indices = @transform_4, window_bounds = array<i64: 1, 128>}, {pipeline_mode = #tpu.pipeline_mode<synchronous>, transform_indices = @transform_5, window_bounds = array<i64: 1, 128>}, {pipeline_mode = #tpu.pipeline_mode<synchronous>, transform_indices = @transform_6, window_bounds = array<i64: 1, 128>}, {transform_indices = @transform_7, window_bounds = array<i64: 1, 16, 128>}]} {
    %c0 = arith.constant 0 : index
    %c0_0 = arith.constant 0 : index
    %c0_1 = arith.constant 0 : index
    %0 = vector.load %arg1[%c0, %c0_0, %c0_1] : memref<1x16x128xf32, #tpu.memory_space<vmem>>, vector<1x16x128xf32>
    %1 = vector.shape_cast %0 : vector<1x16x128xf32> to vector<16x128xf32>
    %2 = arith.truncf %1 : vector<16x128xf32> to vector<16x128xbf16>
    %c0_2 = arith.constant 0 : index
    %c0_3 = arith.constant 0 : index
    %3 = vector.load %arg2[%c0_2, %c0_3] : memref<128x384xbf16, #tpu.memory_space<vmem>>, vector<128x384xbf16>
    %cst = arith.constant dense<0.000000e+00> : vector<16x384xf32>
    %4 = tpu.matmul %2, %3, %cst {dimension_numbers = #tpu.dot_dimension_numbers<[1], [0], [0], [1], [0, 0, 1, 1], [], []>} : vector<16x128xbf16>, vector<128x384xbf16>, vector<16x384xf32> -> vector<16x384xf32>
    %c0_4 = arith.constant 0 : index
    %c0_5 = arith.constant 0 : index
    %5 = vector.load %arg3[%c0_4, %c0_5] : memref<1x384xf32, #tpu.memory_space<vmem>>, vector<1x384xf32>
    %6 = vector.broadcast %5 : vector<1x384xf32> to vector<16x384xf32>
    %7 = arith.addf %4, %6 : vector<16x384xf32>
    %8 = tpu.iota {dimensions = array<i32: 0>} : vector<16x16xi32>
    %9 = tpu.iota {dimensions = array<i32: 1>} : vector<16x16xi32>
    %10 = arith.cmpi sle, %9, %8 : vector<16x16xi32>
    %11 = vector.extract_strided_slice %7 {offsets = [0, 0], sizes = [16, 32], strides = [1, 1]} : vector<16x384xf32> to vector<16x32xf32>
    %12 = arith.truncf %11 : vector<16x32xf32> to vector<16x32xbf16>
    %13 = vector.extract_strided_slice %7 {offsets = [0, 128], sizes = [16, 32], strides = [1, 1]} : vector<16x384xf32> to vector<16x32xf32>
    %14 = arith.truncf %13 : vector<16x32xf32> to vector<16x32xbf16>
    %15 = vector.extract_strided_slice %7 {offsets = [0, 256], sizes = [16, 32], strides = [1, 1]} : vector<16x384xf32> to vector<16x32xf32>
    %16 = arith.truncf %15 : vector<16x32xf32> to vector<16x32xbf16>
    %cst_6 = arith.constant dense<0.000000e+00> : vector<16x16xf32>
    %17 = tpu.matmul %12, %14, %cst_6 {dimension_numbers = #tpu.dot_dimension_numbers<[1], [1], [0], [0], [0, 0, 1, 0], [], []>} : vector<16x32xbf16>, vector<16x32xbf16>, vector<16x16xf32> -> vector<16x16xf32>
    %cst_7 = arith.constant 0.176776692 : f32
    %18 = vector.broadcast %cst_7 : f32 to vector<16x16xf32>
    %19 = arith.mulf %17, %18 : vector<16x16xf32>
    %cst_8 = arith.constant -1.000000e+09 : f32
    %20 = vector.broadcast %cst_8 : f32 to vector<16x16xf32>
    %21 = arith.select %10, %19, %20 : vector<16x16xi1>, vector<16x16xf32>
    %cst_9 = arith.constant dense<0xFF800000> : vector<16xf32>
    %22 = vector.multi_reduction <maximumf>, %21, %cst_9 [1] : vector<16x16xf32> to vector<16xf32>
    %23 = vector.shape_cast %22 : vector<16xf32> to vector<16x1xf32>
    %24 = vector.broadcast %23 : vector<16x1xf32> to vector<16x16xf32>
    %25 = arith.subf %21, %24 : vector<16x16xf32>
    %26 = math.exp %25 : vector<16x16xf32>
    %cst_10 = arith.constant dense<0.000000e+00> : vector<16xf32>
    %27 = vector.multi_reduction <add>, %26, %cst_10 [1] : vector<16x16xf32> to vector<16xf32>
    %28 = vector.shape_cast %27 : vector<16xf32> to vector<16x1xf32>
    %29 = tpu.reciprocal %28 {approx = true} : vector<16x1xf32> -> vector<16x1xf32>
    %30 = vector.broadcast %29 : vector<16x1xf32> to vector<16x16xf32>
    %31 = arith.mulf %26, %30 : vector<16x16xf32>
    %32 = arith.truncf %31 : vector<16x16xf32> to vector<16x16xbf16>
    %cst_11 = arith.constant dense<0.000000e+00> : vector<16x32xf32>
    %33 = tpu.matmul %32, %16, %cst_11 {dimension_numbers = #tpu.dot_dimension_numbers<[1], [0], [0], [1], [0, 0, 1, 1], [], []>} : vector<16x16xbf16>, vector<16x32xbf16>, vector<16x32xf32> -> vector<16x32xf32>
    %34 = vector.extract_strided_slice %7 {offsets = [0, 32], sizes = [16, 32], strides = [1, 1]} : vector<16x384xf32> to vector<16x32xf32>
    %35 = arith.truncf %34 : vector<16x32xf32> to vector<16x32xbf16>
    %36 = vector.extract_strided_slice %7 {offsets = [0, 160], sizes = [16, 32], strides = [1, 1]} : vector<16x384xf32> to vector<16x32xf32>
    %37 = arith.truncf %36 : vector<16x32xf32> to vector<16x32xbf16>
    %38 = vector.extract_strided_slice %7 {offsets = [0, 288], sizes = [16, 32], strides = [1, 1]} : vector<16x384xf32> to vector<16x32xf32>
    %39 = arith.truncf %38 : vector<16x32xf32> to vector<16x32xbf16>
    %cst_12 = arith.constant dense<0.000000e+00> : vector<16x16xf32>
    %40 = tpu.matmul %35, %37, %cst_12 {dimension_numbers = #tpu.dot_dimension_numbers<[1], [1], [0], [0], [0, 0, 1, 0], [], []>} : vector<16x32xbf16>, vector<16x32xbf16>, vector<16x16xf32> -> vector<16x16xf32>
    %cst_13 = arith.constant 0.176776692 : f32
    %41 = vector.broadcast %cst_13 : f32 to vector<16x16xf32>
    %42 = arith.mulf %40, %41 : vector<16x16xf32>
    %cst_14 = arith.constant -1.000000e+09 : f32
    %43 = vector.broadcast %cst_14 : f32 to vector<16x16xf32>
    %44 = arith.select %10, %42, %43 : vector<16x16xi1>, vector<16x16xf32>
    %cst_15 = arith.constant dense<0xFF800000> : vector<16xf32>
    %45 = vector.multi_reduction <maximumf>, %44, %cst_15 [1] : vector<16x16xf32> to vector<16xf32>
    %46 = vector.shape_cast %45 : vector<16xf32> to vector<16x1xf32>
    %47 = vector.broadcast %46 : vector<16x1xf32> to vector<16x16xf32>
    %48 = arith.subf %44, %47 : vector<16x16xf32>
    %49 = math.exp %48 : vector<16x16xf32>
    %cst_16 = arith.constant dense<0.000000e+00> : vector<16xf32>
    %50 = vector.multi_reduction <add>, %49, %cst_16 [1] : vector<16x16xf32> to vector<16xf32>
    %51 = vector.shape_cast %50 : vector<16xf32> to vector<16x1xf32>
    %52 = tpu.reciprocal %51 {approx = true} : vector<16x1xf32> -> vector<16x1xf32>
    %53 = vector.broadcast %52 : vector<16x1xf32> to vector<16x16xf32>
    %54 = arith.mulf %49, %53 : vector<16x16xf32>
    %55 = arith.truncf %54 : vector<16x16xf32> to vector<16x16xbf16>
    %cst_17 = arith.constant dense<0.000000e+00> : vector<16x32xf32>
    %56 = tpu.matmul %55, %39, %cst_17 {dimension_numbers = #tpu.dot_dimension_numbers<[1], [0], [0], [1], [0, 0, 1, 1], [], []>} : vector<16x16xbf16>, vector<16x32xbf16>, vector<16x32xf32> -> vector<16x32xf32>
    %57 = vector.extract_strided_slice %7 {offsets = [0, 64], sizes = [16, 32], strides = [1, 1]} : vector<16x384xf32> to vector<16x32xf32>
    %58 = arith.truncf %57 : vector<16x32xf32> to vector<16x32xbf16>
    %59 = vector.extract_strided_slice %7 {offsets = [0, 192], sizes = [16, 32], strides = [1, 1]} : vector<16x384xf32> to vector<16x32xf32>
    %60 = arith.truncf %59 : vector<16x32xf32> to vector<16x32xbf16>
    %61 = vector.extract_strided_slice %7 {offsets = [0, 320], sizes = [16, 32], strides = [1, 1]} : vector<16x384xf32> to vector<16x32xf32>
    %62 = arith.truncf %61 : vector<16x32xf32> to vector<16x32xbf16>
    %cst_18 = arith.constant dense<0.000000e+00> : vector<16x16xf32>
    %63 = tpu.matmul %58, %60, %cst_18 {dimension_numbers = #tpu.dot_dimension_numbers<[1], [1], [0], [0], [0, 0, 1, 0], [], []>} : vector<16x32xbf16>, vector<16x32xbf16>, vector<16x16xf32> -> vector<16x16xf32>
    %cst_19 = arith.constant 0.176776692 : f32
    %64 = vector.broadcast %cst_19 : f32 to vector<16x16xf32>
    %65 = arith.mulf %63, %64 : vector<16x16xf32>
    %cst_20 = arith.constant -1.000000e+09 : f32
    %66 = vector.broadcast %cst_20 : f32 to vector<16x16xf32>
    %67 = arith.select %10, %65, %66 : vector<16x16xi1>, vector<16x16xf32>
    %cst_21 = arith.constant dense<0xFF800000> : vector<16xf32>
    %68 = vector.multi_reduction <maximumf>, %67, %cst_21 [1] : vector<16x16xf32> to vector<16xf32>
    %69 = vector.shape_cast %68 : vector<16xf32> to vector<16x1xf32>
    %70 = vector.broadcast %69 : vector<16x1xf32> to vector<16x16xf32>
    %71 = arith.subf %67, %70 : vector<16x16xf32>
    %72 = math.exp %71 : vector<16x16xf32>
    %cst_22 = arith.constant dense<0.000000e+00> : vector<16xf32>
    %73 = vector.multi_reduction <add>, %72, %cst_22 [1] : vector<16x16xf32> to vector<16xf32>
    %74 = vector.shape_cast %73 : vector<16xf32> to vector<16x1xf32>
    %75 = tpu.reciprocal %74 {approx = true} : vector<16x1xf32> -> vector<16x1xf32>
    %76 = vector.broadcast %75 : vector<16x1xf32> to vector<16x16xf32>
    %77 = arith.mulf %72, %76 : vector<16x16xf32>
    %78 = arith.truncf %77 : vector<16x16xf32> to vector<16x16xbf16>
    %cst_23 = arith.constant dense<0.000000e+00> : vector<16x32xf32>
    %79 = tpu.matmul %78, %62, %cst_23 {dimension_numbers = #tpu.dot_dimension_numbers<[1], [0], [0], [1], [0, 0, 1, 1], [], []>} : vector<16x16xbf16>, vector<16x32xbf16>, vector<16x32xf32> -> vector<16x32xf32>
    %80 = vector.extract_strided_slice %7 {offsets = [0, 96], sizes = [16, 32], strides = [1, 1]} : vector<16x384xf32> to vector<16x32xf32>
    %81 = arith.truncf %80 : vector<16x32xf32> to vector<16x32xbf16>
    %82 = vector.extract_strided_slice %7 {offsets = [0, 224], sizes = [16, 32], strides = [1, 1]} : vector<16x384xf32> to vector<16x32xf32>
    %83 = arith.truncf %82 : vector<16x32xf32> to vector<16x32xbf16>
    %84 = vector.extract_strided_slice %7 {offsets = [0, 352], sizes = [16, 32], strides = [1, 1]} : vector<16x384xf32> to vector<16x32xf32>
    %85 = arith.truncf %84 : vector<16x32xf32> to vector<16x32xbf16>
    %cst_24 = arith.constant dense<0.000000e+00> : vector<16x16xf32>
    %86 = tpu.matmul %81, %83, %cst_24 {dimension_numbers = #tpu.dot_dimension_numbers<[1], [1], [0], [0], [0, 0, 1, 0], [], []>} : vector<16x32xbf16>, vector<16x32xbf16>, vector<16x16xf32> -> vector<16x16xf32>
    %cst_25 = arith.constant 0.176776692 : f32
    %87 = vector.broadcast %cst_25 : f32 to vector<16x16xf32>
    %88 = arith.mulf %86, %87 : vector<16x16xf32>
    %cst_26 = arith.constant -1.000000e+09 : f32
    %89 = vector.broadcast %cst_26 : f32 to vector<16x16xf32>
    %90 = arith.select %10, %88, %89 : vector<16x16xi1>, vector<16x16xf32>
    %cst_27 = arith.constant dense<0xFF800000> : vector<16xf32>
    %91 = vector.multi_reduction <maximumf>, %90, %cst_27 [1] : vector<16x16xf32> to vector<16xf32>
    %92 = vector.shape_cast %91 : vector<16xf32> to vector<16x1xf32>
    %93 = vector.broadcast %92 : vector<16x1xf32> to vector<16x16xf32>
    %94 = arith.subf %90, %93 : vector<16x16xf32>
    %95 = math.exp %94 : vector<16x16xf32>
    %cst_28 = arith.constant dense<0.000000e+00> : vector<16xf32>
    %96 = vector.multi_reduction <add>, %95, %cst_28 [1] : vector<16x16xf32> to vector<16xf32>
    %97 = vector.shape_cast %96 : vector<16xf32> to vector<16x1xf32>
    %98 = tpu.reciprocal %97 {approx = true} : vector<16x1xf32> -> vector<16x1xf32>
    %99 = vector.broadcast %98 : vector<16x1xf32> to vector<16x16xf32>
    %100 = arith.mulf %95, %99 : vector<16x16xf32>
    %101 = arith.truncf %100 : vector<16x16xf32> to vector<16x16xbf16>
    %cst_29 = arith.constant dense<0.000000e+00> : vector<16x32xf32>
    %102 = tpu.matmul %101, %85, %cst_29 {dimension_numbers = #tpu.dot_dimension_numbers<[1], [0], [0], [1], [0, 0, 1, 1], [], []>} : vector<16x16xbf16>, vector<16x32xbf16>, vector<16x32xf32> -> vector<16x32xf32>
    %103 = tpu.concatenate %33, %56, %79, %102 in 1 : vector<16x32xf32>, vector<16x32xf32>, vector<16x32xf32>, vector<16x32xf32> -> vector<16x128xf32>
    %104 = arith.truncf %103 : vector<16x128xf32> to vector<16x128xbf16>
    %c0_30 = arith.constant 0 : index
    %c0_31 = arith.constant 0 : index
    %105 = vector.load %arg4[%c0_30, %c0_31] : memref<128x128xbf16, #tpu.memory_space<vmem>>, vector<128x128xbf16>
    %cst_32 = arith.constant dense<0.000000e+00> : vector<16x128xf32>
    %106 = tpu.matmul %104, %105, %cst_32 {dimension_numbers = #tpu.dot_dimension_numbers<[1], [0], [0], [1], [0, 0, 1, 1], [], []>} : vector<16x128xbf16>, vector<128x128xbf16>, vector<16x128xf32> -> vector<16x128xf32>
    %c0_33 = arith.constant 0 : index
    %c0_34 = arith.constant 0 : index
    %107 = vector.load %arg5[%c0_33, %c0_34] : memref<1x128xf32, #tpu.memory_space<vmem>>, vector<1x128xf32>
    %108 = vector.broadcast %107 : vector<1x128xf32> to vector<16x128xf32>
    %109 = arith.addf %106, %108 : vector<16x128xf32>
    %110 = arith.addf %1, %109 : vector<16x128xf32>
    %c0_35 = arith.constant 0 : index
    %c0_36 = arith.constant 0 : index
    %111 = vector.load %arg6[%c0_35, %c0_36] : memref<1x128xf32, #tpu.memory_space<vmem>>, vector<1x128xf32>
    %c0_37 = arith.constant 0 : index
    %c0_38 = arith.constant 0 : index
    %112 = vector.load %arg7[%c0_37, %c0_38] : memref<1x128xf32, #tpu.memory_space<vmem>>, vector<1x128xf32>
    %cst_39 = arith.constant dense<0.000000e+00> : vector<16xf32>
    %113 = vector.multi_reduction <add>, %110, %cst_39 [1] : vector<16x128xf32> to vector<16xf32>
    %114 = vector.shape_cast %113 : vector<16xf32> to vector<16x1xf32>
    %cst_40 = arith.constant 1.280000e+02 : f32
    %115 = vector.broadcast %cst_40 : f32 to vector<16x1xf32>
    %116 = arith.divf %114, %115 : vector<16x1xf32>
    %117 = vector.broadcast %116 : vector<16x1xf32> to vector<16x128xf32>
    %118 = arith.subf %110, %117 : vector<16x128xf32>
    %119 = arith.mulf %118, %118 : vector<16x128xf32>
    %cst_41 = arith.constant dense<0.000000e+00> : vector<16xf32>
    %120 = vector.multi_reduction <add>, %119, %cst_41 [1] : vector<16x128xf32> to vector<16xf32>
    %121 = vector.shape_cast %120 : vector<16xf32> to vector<16x1xf32>
    %cst_42 = arith.constant 1.280000e+02 : f32
    %122 = vector.broadcast %cst_42 : f32 to vector<16x1xf32>
    %123 = arith.divf %121, %122 : vector<16x1xf32>
    %cst_43 = arith.constant 9.99999974E-6 : f32
    %124 = vector.broadcast %cst_43 : f32 to vector<16x1xf32>
    %125 = arith.addf %123, %124 : vector<16x1xf32>
    %126 = math.rsqrt %125 : vector<16x1xf32>
    %127 = vector.broadcast %126 : vector<16x1xf32> to vector<16x128xf32>
    %128 = arith.mulf %118, %127 : vector<16x128xf32>
    %129 = vector.broadcast %111 : vector<1x128xf32> to vector<16x128xf32>
    %130 = arith.mulf %128, %129 : vector<16x128xf32>
    %131 = vector.broadcast %112 : vector<1x128xf32> to vector<16x128xf32>
    %132 = arith.addf %130, %131 : vector<16x128xf32>
    %c0_44 = arith.constant 0 : index
    %c0_45 = arith.constant 0 : index
    %c0_46 = arith.constant 0 : index
    %133 = vector.load %arg8[%c0_44, %c0_45, %c0_46] : memref<1x16x128xf32, #tpu.memory_space<vmem>>, vector<1x16x128xf32>
    %134 = vector.shape_cast %133 : vector<1x16x128xf32> to vector<16x128xf32>
    %135 = vector.shape_cast %132 : vector<16x128xf32> to vector<1x16x128xf32>
    tpu.vector_store %arg8[%c0_44, %c0_45, %c0_46], %135 {strides = array<i32>} : memref<1x16x128xf32, #tpu.memory_space<vmem>>, vector<1x16x128xf32>,
    return
  }
  func.func @transform_0(%arg0: i32) -> (i32, i32, i32) {
    %c0_i32 = arith.constant 0 : i32
    %c0_i32_0 = arith.constant 0 : i32
    %c0_i32_1 = arith.constant 0 : i32
    return %arg0, %c0_i32, %c0_i32_0 : i32, i32, i32
  }
  func.func @transform_1(%arg0: i32) -> (i32, i32) {
    %c0_i32 = arith.constant 0 : i32
    %c0_i32_0 = arith.constant 0 : i32
    %c0_i32_1 = arith.constant 0 : i32
    return %c0_i32, %c0_i32_0 : i32, i32
  }
  func.func @transform_2(%arg0: i32) -> (i32, i32) {
    %c0_i32 = arith.constant 0 : i32
    %c0_i32_0 = arith.constant 0 : i32
    %c0_i32_1 = arith.constant 0 : i32
    return %c0_i32, %c0_i32_0 : i32, i32
  }
  func.func @transform_3(%arg0: i32) -> (i32, i32) {
    %c0_i32 = arith.constant 0 : i32
    %c0_i32_0 = arith.constant 0 : i32
    %c0_i32_1 = arith.constant 0 : i32
    return %c0_i32, %c0_i32_0 : i32, i32
  }
  func.func @transform_4(%arg0: i32) -> (i32, i32) {
    %c0_i32 = arith.constant 0 : i32
    %c0_i32_0 = arith.constant 0 : i32
    %c0_i32_1 = arith.constant 0 : i32
    return %c0_i32, %c0_i32_0 : i32, i32
  }
  func.func @transform_5(%arg0: i32) -> (i32, i32) {
    %c0_i32 = arith.constant 0 : i32
    %c0_i32_0 = arith.constant 0 : i32
    %c0_i32_1 = arith.constant 0 : i32
    return %c0_i32, %c0_i32_0 : i32, i32
  }
  func.func @transform_6(%arg0: i32) -> (i32, i32) {
    %c0_i32 = arith.constant 0 : i32
    %c0_i32_0 = arith.constant 0 : i32
    %c0_i32_1 = arith.constant 0 : i32
    return %c0_i32, %c0_i32_0 : i32, i32
  }
  func.func @transform_7(%arg0: i32) -> (i32, i32, i32) {
    %c0_i32 = arith.constant 0 : i32
    %c0_i32_0 = arith.constant 0 : i32
    %c0_i32_1 = arith.constant 0 : i32
    return %arg0, %c0_i32, %c0_i32_0 : i32, i32, i32
  }
}

module attributes {stable_mosaic.version = 11 : i64} {
  func.func @ffn_addnorm_kernel(%arg0: i32, %arg1: i32, %arg2: memref<1x16x128xf32, #tpu.memory_space<vmem>>, %arg3: memref<128x256xbf16, #tpu.memory_space<vmem>>, %arg4: memref<1x256xf32, #tpu.memory_space<vmem>>, %arg5: memref<256x128xbf16, #tpu.memory_space<vmem>>, %arg6: memref<1x128xf32, #tpu.memory_space<vmem>>, %arg7: memref<1x128xf32, #tpu.memory_space<vmem>>, %arg8: memref<1x128xf32, #tpu.memory_space<vmem>>, %arg9: memref<1x16x128xf32, #tpu.memory_space<vmem>>, %arg10: memref<16x128xf32, #tpu.memory_space<vmem>>) attributes {dimension_semantics = [#tpu.dimension_semantics<parallel>, #tpu.dimension_semantics<arbitrary>], iteration_bounds = array<i64: 2, 1>, scalar_prefetch = 0 : i64, scratch_operands = 1 : i64, tpu.core_type = #tpu.core_type<tc>, window_params = [{transform_indices = @transform_0, window_bounds = array<i64: 1, 16, 128>}, {transform_indices = @transform_1, window_bounds = array<i64: 128, 256>}, {transform_indices = @transform_2, window_bounds = array<i64: 1, 256>}, {transform_indices = @transform_3, window_bounds = array<i64: 256, 128>}, {pipeline_mode = #tpu.pipeline_mode<synchronous>, transform_indices = @transform_4, window_bounds = array<i64: 1, 128>}, {pipeline_mode = #tpu.pipeline_mode<synchronous>, transform_indices = @transform_5, window_bounds = array<i64: 1, 128>}, {pipeline_mode = #tpu.pipeline_mode<synchronous>, transform_indices = @transform_6, window_bounds = array<i64: 1, 128>}, {transform_indices = @transform_7, window_bounds = array<i64: 1, 16, 128>}]} {
    %c0_i32 = arith.constant 0 : i32
    %0 = arith.cmpi eq, %arg1, %c0_i32 : i32
    %1 = arith.extui %0 : i1 to i32
    %c0_i32_0 = arith.constant 0 : i32
    %2 = arith.cmpi ne, %1, %c0_i32_0 : i32
    scf.if %2 {
      %cst_17 = arith.constant 0.000000e+00 : f32
      %22 = vector.broadcast %cst_17 : f32 to vector<16x128xf32>
      %c0_18 = arith.constant 0 : index
      %c0_19 = arith.constant 0 : index
      %23 = vector.load %arg10[%c0_18, %c0_19] : memref<16x128xf32, #tpu.memory_space<vmem>>, vector<16x128xf32>
      tpu.vector_store %arg10[%c0_18, %c0_19], %22 {strides = array<i32>} : memref<16x128xf32, #tpu.memory_space<vmem>>, vector<16x128xf32>,
    } else {
    }
    %c0 = arith.constant 0 : index
    %c0_1 = arith.constant 0 : index
    %c0_2 = arith.constant 0 : index
    %3 = vector.load %arg2[%c0, %c0_1, %c0_2] : memref<1x16x128xf32, #tpu.memory_space<vmem>>, vector<1x16x128xf32>
    %4 = vector.shape_cast %3 : vector<1x16x128xf32> to vector<16x128xf32>
    %5 = arith.truncf %4 : vector<16x128xf32> to vector<16x128xbf16>
    %c0_3 = arith.constant 0 : index
    %c0_4 = arith.constant 0 : index
    %6 = vector.load %arg3[%c0_3, %c0_4] : memref<128x256xbf16, #tpu.memory_space<vmem>>, vector<128x256xbf16>
    %cst = arith.constant dense<0.000000e+00> : vector<16x256xf32>
    %7 = tpu.matmul %5, %6, %cst {dimension_numbers = #tpu.dot_dimension_numbers<[1], [0], [0], [1], [0, 0, 1, 1], [], []>} : vector<16x128xbf16>, vector<128x256xbf16>, vector<16x256xf32> -> vector<16x256xf32>
    %c0_5 = arith.constant 0 : index
    %c0_6 = arith.constant 0 : index
    %8 = vector.load %arg4[%c0_5, %c0_6] : memref<1x256xf32, #tpu.memory_space<vmem>>, vector<1x256xf32>
    %9 = vector.broadcast %8 : vector<1x256xf32> to vector<16x256xf32>
    %10 = arith.addf %7, %9 : vector<16x256xf32>
    %cst_7 = arith.constant 0.000000e+00 : f32
    %11 = vector.broadcast %cst_7 : f32 to vector<16x256xf32>
    %12 = arith.maximumf %10, %11 : vector<16x256xf32>
    %13 = arith.truncf %12 : vector<16x256xf32> to vector<16x256xbf16>
    %c0_8 = arith.constant 0 : index
    %c0_9 = arith.constant 0 : index
    %14 = vector.load %arg10[%c0_8, %c0_9] : memref<16x128xf32, #tpu.memory_space<vmem>>, vector<16x128xf32>
    %c0_10 = arith.constant 0 : index
    %c0_11 = arith.constant 0 : index
    %15 = vector.load %arg5[%c0_10, %c0_11] : memref<256x128xbf16, #tpu.memory_space<vmem>>, vector<256x128xbf16>
    %cst_12 = arith.constant dense<0.000000e+00> : vector<16x128xf32>
    %16 = tpu.matmul %13, %15, %cst_12 {dimension_numbers = #tpu.dot_dimension_numbers<[1], [0], [0], [1], [0, 0, 1, 1], [], []>} : vector<16x256xbf16>, vector<256x128xbf16>, vector<16x128xf32> -> vector<16x128xf32>
    %17 = arith.addf %14, %16 : vector<16x128xf32>
    %c0_13 = arith.constant 0 : index
    %c0_14 = arith.constant 0 : index
    %18 = vector.load %arg10[%c0_13, %c0_14] : memref<16x128xf32, #tpu.memory_space<vmem>>, vector<16x128xf32>
    tpu.vector_store %arg10[%c0_13, %c0_14], %17 {strides = array<i32>} : memref<16x128xf32, #tpu.memory_space<vmem>>, vector<16x128xf32>,
    %c0_i32_15 = arith.constant 0 : i32
    %19 = arith.cmpi eq, %arg1, %c0_i32_15 : i32
    %20 = arith.extui %19 : i1 to i32
    %c0_i32_16 = arith.constant 0 : i32
    %21 = arith.cmpi ne, %20, %c0_i32_16 : i32
    scf.if %21 {
      %c0_17 = arith.constant 0 : index
      %c0_18 = arith.constant 0 : index
      %c0_19 = arith.constant 0 : index
      %22 = vector.load %arg2[%c0_17, %c0_18, %c0_19] : memref<1x16x128xf32, #tpu.memory_space<vmem>>, vector<1x16x128xf32>
      %23 = vector.shape_cast %22 : vector<1x16x128xf32> to vector<16x128xf32>
      %c0_20 = arith.constant 0 : index
      %c0_21 = arith.constant 0 : index
      %24 = vector.load %arg10[%c0_20, %c0_21] : memref<16x128xf32, #tpu.memory_space<vmem>>, vector<16x128xf32>
      %25 = arith.addf %23, %24 : vector<16x128xf32>
      %c0_22 = arith.constant 0 : index
      %c0_23 = arith.constant 0 : index
      %26 = vector.load %arg6[%c0_22, %c0_23] : memref<1x128xf32, #tpu.memory_space<vmem>>, vector<1x128xf32>
      %27 = vector.broadcast %26 : vector<1x128xf32> to vector<16x128xf32>
      %28 = arith.addf %25, %27 : vector<16x128xf32>
      %c0_24 = arith.constant 0 : index
      %c0_25 = arith.constant 0 : index
      %29 = vector.load %arg7[%c0_24, %c0_25] : memref<1x128xf32, #tpu.memory_space<vmem>>, vector<1x128xf32>
      %c0_26 = arith.constant 0 : index
      %c0_27 = arith.constant 0 : index
      %30 = vector.load %arg8[%c0_26, %c0_27] : memref<1x128xf32, #tpu.memory_space<vmem>>, vector<1x128xf32>
      %cst_28 = arith.constant dense<0.000000e+00> : vector<16xf32>
      %31 = vector.multi_reduction <add>, %28, %cst_28 [1] : vector<16x128xf32> to vector<16xf32>
      %32 = vector.shape_cast %31 : vector<16xf32> to vector<16x1xf32>
      %cst_29 = arith.constant 1.280000e+02 : f32
      %33 = vector.broadcast %cst_29 : f32 to vector<16x1xf32>
      %34 = arith.divf %32, %33 : vector<16x1xf32>
      %35 = vector.broadcast %34 : vector<16x1xf32> to vector<16x128xf32>
      %36 = arith.subf %28, %35 : vector<16x128xf32>
      %37 = arith.mulf %36, %36 : vector<16x128xf32>
      %cst_30 = arith.constant dense<0.000000e+00> : vector<16xf32>
      %38 = vector.multi_reduction <add>, %37, %cst_30 [1] : vector<16x128xf32> to vector<16xf32>
      %39 = vector.shape_cast %38 : vector<16xf32> to vector<16x1xf32>
      %cst_31 = arith.constant 1.280000e+02 : f32
      %40 = vector.broadcast %cst_31 : f32 to vector<16x1xf32>
      %41 = arith.divf %39, %40 : vector<16x1xf32>
      %cst_32 = arith.constant 9.99999974E-6 : f32
      %42 = vector.broadcast %cst_32 : f32 to vector<16x1xf32>
      %43 = arith.addf %41, %42 : vector<16x1xf32>
      %44 = math.rsqrt %43 : vector<16x1xf32>
      %45 = vector.broadcast %44 : vector<16x1xf32> to vector<16x128xf32>
      %46 = arith.mulf %36, %45 : vector<16x128xf32>
      %47 = vector.broadcast %29 : vector<1x128xf32> to vector<16x128xf32>
      %48 = arith.mulf %46, %47 : vector<16x128xf32>
      %49 = vector.broadcast %30 : vector<1x128xf32> to vector<16x128xf32>
      %50 = arith.addf %48, %49 : vector<16x128xf32>
      %c0_33 = arith.constant 0 : index
      %c0_34 = arith.constant 0 : index
      %c0_35 = arith.constant 0 : index
      %51 = vector.load %arg9[%c0_33, %c0_34, %c0_35] : memref<1x16x128xf32, #tpu.memory_space<vmem>>, vector<1x16x128xf32>
      %52 = vector.shape_cast %51 : vector<1x16x128xf32> to vector<16x128xf32>
      %53 = vector.shape_cast %50 : vector<16x128xf32> to vector<1x16x128xf32>
      tpu.vector_store %arg9[%c0_33, %c0_34, %c0_35], %53 {strides = array<i32>} : memref<1x16x128xf32, #tpu.memory_space<vmem>>, vector<1x16x128xf32>,
    } else {
    }
    return
  }
  func.func @transform_0(%arg0: i32, %arg1: i32) -> (i32, i32, i32) {
    %c0_i32 = arith.constant 0 : i32
    %c0_i32_0 = arith.constant 0 : i32
    %c0_i32_1 = arith.constant 0 : i32
    return %arg0, %c0_i32, %c0_i32_0 : i32, i32, i32
  }
  func.func @transform_1(%arg0: i32, %arg1: i32) -> (i32, i32) {
    %c0_i32 = arith.constant 0 : i32
    %c0_i32_0 = arith.constant 0 : i32
    return %c0_i32, %arg1 : i32, i32
  }
  func.func @transform_2(%arg0: i32, %arg1: i32) -> (i32, i32) {
    %c0_i32 = arith.constant 0 : i32
    %c0_i32_0 = arith.constant 0 : i32
    return %c0_i32, %arg1 : i32, i32
  }
  func.func @transform_3(%arg0: i32, %arg1: i32) -> (i32, i32) {
    %c0_i32 = arith.constant 0 : i32
    %c0_i32_0 = arith.constant 0 : i32
    return %arg1, %c0_i32 : i32, i32
  }
  func.func @transform_4(%arg0: i32, %arg1: i32) -> (i32, i32) {
    %c0_i32 = arith.constant 0 : i32
    %c0_i32_0 = arith.constant 0 : i32
    %c0_i32_1 = arith.constant 0 : i32
    return %c0_i32, %c0_i32_0 : i32, i32
  }
  func.func @transform_5(%arg0: i32, %arg1: i32) -> (i32, i32) {
    %c0_i32 = arith.constant 0 : i32
    %c0_i32_0 = arith.constant 0 : i32
    %c0_i32_1 = arith.constant 0 : i32
    return %c0_i32, %c0_i32_0 : i32, i32
  }
  func.func @transform_6(%arg0: i32, %arg1: i32) -> (i32, i32) {
    %c0_i32 = arith.constant 0 : i32
    %c0_i32_0 = arith.constant 0 : i32
    %c0_i32_1 = arith.constant 0 : i32
    return %c0_i32, %c0_i32_0 : i32, i32
  }
  func.func @transform_7(%arg0: i32, %arg1: i32) -> (i32, i32, i32) {
    %c0_i32 = arith.constant 0 : i32
    %c0_i32_0 = arith.constant 0 : i32
    %c0_i32_1 = arith.constant 0 : i32
    return %arg0, %c0_i32, %c0_i32_0 : i32, i32, i32
  }
}

module attributes {stable_mosaic.version = 11 : i64} {
  func.func @fc_kernel(%arg0: i32, %arg1: i32, %arg2: memref<1x16x128xf32, #tpu.memory_space<vmem>>, %arg3: memref<128x256xbf16, #tpu.memory_space<vmem>>, %arg4: memref<1x256xf32, #tpu.memory_space<vmem>>, %arg5: memref<1x16x256xf32, #tpu.memory_space<vmem>>) attributes {dimension_semantics = [#tpu.dimension_semantics<parallel>, #tpu.dimension_semantics<parallel>], iteration_bounds = array<i64: 2, 1>, scalar_prefetch = 0 : i64, scratch_operands = 0 : i64, tpu.core_type = #tpu.core_type<tc>, window_params = [{transform_indices = @transform_0, window_bounds = array<i64: 1, 16, 128>}, {transform_indices = @transform_1, window_bounds = array<i64: 128, 256>}, {transform_indices = @transform_2, window_bounds = array<i64: 1, 256>}, {transform_indices = @transform_3, window_bounds = array<i64: 1, 16, 256>}]} {
    %c0 = arith.constant 0 : index
    %c0_0 = arith.constant 0 : index
    %c0_1 = arith.constant 0 : index
    %0 = vector.load %arg2[%c0, %c0_0, %c0_1] : memref<1x16x128xf32, #tpu.memory_space<vmem>>, vector<1x16x128xf32>
    %1 = vector.shape_cast %0 : vector<1x16x128xf32> to vector<16x128xf32>
    %2 = arith.truncf %1 : vector<16x128xf32> to vector<16x128xbf16>
    %c0_2 = arith.constant 0 : index
    %c0_3 = arith.constant 0 : index
    %3 = vector.load %arg3[%c0_2, %c0_3] : memref<128x256xbf16, #tpu.memory_space<vmem>>, vector<128x256xbf16>
    %cst = arith.constant dense<0.000000e+00> : vector<16x256xf32>
    %4 = tpu.matmul %2, %3, %cst {dimension_numbers = #tpu.dot_dimension_numbers<[1], [0], [0], [1], [0, 0, 1, 1], [], []>} : vector<16x128xbf16>, vector<128x256xbf16>, vector<16x256xf32> -> vector<16x256xf32>
    %c0_4 = arith.constant 0 : index
    %c0_5 = arith.constant 0 : index
    %5 = vector.load %arg4[%c0_4, %c0_5] : memref<1x256xf32, #tpu.memory_space<vmem>>, vector<1x256xf32>
    %6 = vector.broadcast %5 : vector<1x256xf32> to vector<16x256xf32>
    %7 = arith.addf %4, %6 : vector<16x256xf32>
    %c0_6 = arith.constant 0 : index
    %c0_7 = arith.constant 0 : index
    %c0_8 = arith.constant 0 : index
    %8 = vector.load %arg5[%c0_6, %c0_7, %c0_8] : memref<1x16x256xf32, #tpu.memory_space<vmem>>, vector<1x16x256xf32>
    %9 = vector.shape_cast %8 : vector<1x16x256xf32> to vector<16x256xf32>
    %10 = vector.shape_cast %7 : vector<16x256xf32> to vector<1x16x256xf32>
    tpu.vector_store %arg5[%c0_6, %c0_7, %c0_8], %10 {strides = array<i32>} : memref<1x16x256xf32, #tpu.memory_space<vmem>>, vector<1x16x256xf32>,
    return
  }
  func.func @transform_0(%arg0: i32, %arg1: i32) -> (i32, i32, i32) {
    %c0_i32 = arith.constant 0 : i32
    %c0_i32_0 = arith.constant 0 : i32
    %c0_i32_1 = arith.constant 0 : i32
    return %arg0, %c0_i32, %c0_i32_0 : i32, i32, i32
  }
  func.func @transform_1(%arg0: i32, %arg1: i32) -> (i32, i32) {
    %c0_i32 = arith.constant 0 : i32
    %c0_i32_0 = arith.constant 0 : i32
    return %c0_i32, %arg1 : i32, i32
  }
  func.func @transform_2(%arg0: i32, %arg1: i32) -> (i32, i32) {
    %c0_i32 = arith.constant 0 : i32
    %c0_i32_0 = arith.constant 0 : i32
    return %c0_i32, %arg1 : i32, i32
  }
  func.func @transform_3(%arg0: i32, %arg1: i32) -> (i32, i32, i32) {
    %c0_i32 = arith.constant 0 : i32
    %c0_i32_0 = arith.constant 0 : i32
    return %arg0, %c0_i32, %arg1 : i32, i32, i32
  }
}

</mosaic_0001>

<bundles_post_ra>
// kernel: gpt2_forward.6
= control target key start
LH: loop header
LB: loop body
LE: loop exit
PB: predicated region body
PF: predicated region fallthrough
CT: control target
= control target key end

     0   :  { %12 = vsyncpa [#allocation4], 0  ;;  %s1172_s24 = smov 0   ;;  %s1174_s25 = smov 0   ;;  %s1328_s0 = inlined_call_operand.vmem [shape: f32[2,16,128], index: 0, kind: input, shape index: {}]   ;;  %s1329_s1 = inlined_call_operand.vmem [shape: bf16[128,256], index: 1, kind: input, shape index: {}]   ;;  %s1330_s2 = inlined_call_operand.vmem [shape: f32[1,256], index: 2, kind: input, shape index: {}]   ;;  %s1331_s3 = inlined_call_operand.hbm [shape: bf16[256,128], index: 3, kind: input, shape index: {}]   ;;  %s1332_s4 = inlined_call_operand.vmem [shape: f32[1,128], index: 4, kind: input, shape index: {}]   ;;  %s1333_s5 = inlined_call_operand.vmem [shape: f32[1,128], index: 5, kind: input, shape index: {}]   ;;  %s1334_s6 = inlined_call_operand.vmem [shape: f32[1,128], index: 6, kind: input, shape index: {}]   ;;  %s1335_s7 = inlined_call_operand.vmem [shape: f32[2,16,128], index: 7, kind: output, shape index: {}]  }
   0x1   :  { %s1176_s26 = smov 0  }
   0x2 LB: > { %s846_s27 = sadd.s32 4294967295, %s1126_s26   ;;  %s30_s28 = sadd.s32 1, %s1122_s25  ;;  %s1126_s26 = sphi %s1176_s26, %s18_s26   ;;  %s1122_s25 = sphi %s1174_s25, %s1337_s25   ;;  %s1118_s24 = sphi %s1172_s24, %s1336_s24  }
   0x3   : > { %p32_p0 = scmp.ge.s32.totalorder %s30_s28, 2  ;;  %p848_p1 = scmp.ge.s32.totalorder %s1126_s26, 1 }
   0x4   : > { %p228_p2 = scmp.lt.s32.totalorder %s1126_s26, 3  ;;  %p1031_p4 = scmp.eq.s32.totalorder %s846_s27, 0 }
   0x5   : > { %s1339_s28 = smov (%p32_p0, %s30_s28), 0  ;;  %s259_s8 = sshll.u32 %s1331_s3, 4  ;;  %s260_s8 = int_to_ptr.hbm [resolvable:$true] %s259_s8 }
   0x6   : > { %p229_p3 = pnand %p848_p1, %p228_p2  ;;  %s1128_s9 = smov [#allocation3]  }
   0x7   : > { %s261_s10 = sshll.u32 %s1128_s9, 4  ;;  %s1129_s11 = smov 64   ;;  %s262_s10 = int_to_ptr.vmem [resolvable:$true] %s261_s10 }
   0x8   : > { %p1027_p5 = pneg %p229_p3  ;;  %s1130_s12 = smov 4  }
   0x9   : > { %294 = sbr.rel (%p229_p3) target bundleno = 603 (0x25b), region = 48 }
   0xa   : > { %p1028_p6 = pnand %p1031_p4, %p1027_p5 }
   0xc   : > { %1030 = dma.hbm_to_vmem [thread:$0]  (!%p1028_p6), %s260_s8, 2048, %s262_s10, [#allocation4], %s1129_s11, %s1129_s11, %s1130_s12  }
   0xe   : > { %1113 = dma.done.wait (%p1031_p4), [#allocation4], 2048  }
   0xf   : > { %1115 = vsyncadd (%p1031_p4), [#allocation4], 4294965248  ;;  %v917_v0 = vld [vmem:[%s1329_s1 + $0x70] sm:$0xf]  ;;  %v1006_v1 = vld [vmem:[%s1329_s1 + $0x74] sm:$0xf0] }
  0x10   : > { %v1005_v2 = vld [vmem:[%s1329_s1 + $0x74] sm:$0xf]  ;;  %v918_v3 = vor.u32 %v1006_v1, %v917_v0  ;;  %v919_v4 = vld [vmem:[%s1329_s1 + $0x78] sm:$0xf0]  ;;  %v909_v5 = vld [vmem:[%s1329_s1 + $0x60] sm:$0xf] }
  0x11   : > { %v1004_v6 = vld [vmem:[%s1329_s1 + $0x64] sm:$0xf0]  ;;  %v922_v7 = vor.u32 %v1005_v2, %v919_v4  ;;  %v1003_v8 = vld [vmem:[%s1329_s1 + $0x64] sm:$0xf]  ;;  %v911_v9 = vld [vmem:[%s1329_s1 + $0x68] sm:$0xf0] }
  0x12   : > { %469 = vmatpush.bf16.msra.mxu0 %v918_v3  ;;  %v910_v10 = vor.u32 %v1004_v6, %v909_v5  ;;  %v914_v11 = vor.u32 %v1003_v8, %v911_v9  ;;  %v901_v12 = vld [vmem:[%s1329_s1 + $0x50] sm:$0xf]  ;;  %v1002_v13 = vld [vmem:[%s1329_s1 + $0x54] sm:$0xf0]  ;;  %v1001_v14 = vld [vmem:[%s1329_s1 + $0x54] sm:$0xf] }
  0x13   : > { %483 = vmatpush.bf16.msra.mxu1 %v922_v7  ;;  %v903_v15 = vld [vmem:[%s1329_s1 + $0x58] sm:$0xf0]  ;;  %v902_v16 = vor.u32 %v1002_v13, %v901_v12  ;;  %v893_v18 = vld [vmem:[%s1329_s1 + $0x40] sm:$0xf]  ;;  %v1000_v19 = vld [vmem:[%s1329_s1 + $0x44] sm:$0xf0] }
  0x14   : > { %v906_v17 = vor.u32 %v1001_v14, %v903_v15  ;;  %v999_v20 = vld [vmem:[%s1329_s1 + $0x44] sm:$0xf]  ;;  %v895_v21 = vld [vmem:[%s1329_s1 + $0x48] sm:$0xf0]  ;;  %v894_v22 = vor.u32 %v1000_v19, %v893_v18  ;;  %v1014_v23 = vld [vmem:[#allocation3 + $0x38] sm:$0xff]  ;;  %p336_p7 = scmp.lt.s32.totalorder %s1118_s24, 1 }
  0x15   : > { %v1022_v24 = vld [vmem:[#allocation3 + $0x78] sm:$0xff]  ;;  %v898_v25 = vor.u32 %v999_v20, %v895_v21  ;;  %v885_v26 = vld [vmem:[%s1329_s1 + $0x30] sm:$0xf]  ;;  %v997_v28 = vld [vmem:[%s1329_s1 + $0x34] sm:$0xf]  ;;  %633 = vmatpush.bf16.msra.mxu2 %v1014_v23 }
  0x16   : > { %470 = vmatpush.bf16.msra.mxu0 %v910_v10  ;;  %v998_v27 = vld [vmem:[%s1329_s1 + $0x34] sm:$0xf0]  ;;  %v887_v29 = vld [vmem:[%s1329_s1 + $0x38] sm:$0xf0]  ;;  %647 = vmatpush.bf16.msra.mxu3 %v1022_v24  ;;  %v1013_v30 = vld [vmem:[#allocation3 + $0x30] sm:$0xff]  ;;  %s1341_s24 = smov (!%p336_p7, %s1118_s24), 1 }
  0x17   : > { %484 = vmatpush.bf16.msra.mxu1 %v914_v11  ;;  %v1021_v31 = vld [vmem:[#allocation3 + $0x70] sm:$0xff]  ;;  %v886_v32 = vor.u32 %v998_v27, %v885_v26  ;;  %v890_v33 = vor.u32 %v997_v28, %v887_v29  ;;  %v877_v34 = vld [vmem:[%s1329_s1 + $0x20] sm:$0xf]  ;;  %v996_v35 = vld [vmem:[%s1329_s1 + $0x24] sm:$0xf0]  ;;  %s989_s12 = sshll.u32 %s1341_s24, 4 }
  0x18   : > { %v995_v36 = vld [vmem:[%s1329_s1 + $0x24] sm:$0xf]  ;;  %v879_v37 = vld [vmem:[%s1329_s1 + $0x28] sm:$0xf0]  ;;  %v878_v40 = vor.u32 %v996_v35, %v877_v34  ;;  %v869_v42 = vld [vmem:[%s1329_s1 + $0x10] sm:$0xf]  ;;  %s340_s19 = scalar_lea.vmem %s1328_s0, %s989_s12  ;;  %s357_s16 = scalar_lea.vmem %s1335_s7, %s989_s12 }
  0x19   : > { %634 = vmatpush.bf16.msra.mxu2 %v1013_v30  ;;  %v1012_v38 = vld [vmem:[#allocation3 + $0x28] sm:$0xff]  ;;  %v882_v41 = vor.u32 %v995_v36, %v879_v37  ;;  %v994_v43 = vld [vmem:[%s1329_s1 + $0x14] sm:$0xf0]  ;;  %v993_v44 = vld [vmem:[%s1329_s1 + $0x14] sm:$0xf] }
  0x1a   : > { %471 = vmatpush.bf16.msra.mxu0 %v902_v16  ;;  %648 = vmatpush.bf16.msra.mxu3 %v1021_v31  ;;  %v1020_v39 = vld [vmem:[#allocation3 + $0x68] sm:$0xff]  ;;  %v871_v45 = vld [vmem:[%s1329_s1 + $0x18] sm:$0xf0]  ;;  %v1011_v46 = vld [vmem:[#allocation3 + $0x20] sm:$0xff]  ;;  %v870_v48 = vor.u32 %v994_v43, %v869_v42  ;;  %v1131_v31 = vmov 128.0  }
  0x1b   : > { %485 = vmatpush.bf16.msra.mxu1 %v906_v17  ;;  %v1019_v47 = vld [vmem:[#allocation3 + $0x60] sm:$0xff]  ;;  %v874_v49 = vor.u32 %v993_v44, %v871_v45  ;;  %v992_v51 = vld [vmem:[%s1329_s1 + $0x4] sm:$0xf0]  ;;  %v863_v53 = vld [vmem:[%s1329_s1 + $0x8] sm:$0xf0]  ;;  %1064 = vrcp.f32 %v1131_v31 }
  0x1c   : > { %v861_v50 = vld [vmem:[%s1329_s1] sm:$0xf]  ;;  %v991_v52 = vld [vmem:[%s1329_s1 + $0x4] sm:$0xf]  ;;  %v365_v56 = vld [vmem:[%s340_s19 + $0x8] sm:$0xff] }
  0x1d   : > { %635 = vmatpush.bf16.msra.mxu2 %v1012_v38  ;;  %v862_v54 = vor.u32 %v992_v51, %v861_v50  ;;  %v364_v55 = vld [vmem:[%s340_s19] sm:$0xff]  ;;  %v866_v57 = vor.u32 %v991_v52, %v863_v53  ;;  %v1010_v59 = vld [vmem:[#allocation3 + $0x18] sm:$0xff]  ;;  %v1009_v61 = vld [vmem:[#allocation3 + $0x10] sm:$0xff] }
  0x1e   : > { %472 = vmatpush.bf16.msra.mxu0 %v894_v22  ;;  %649 = vmatpush.bf16.msra.mxu3 %v1020_v39  ;;  %v366_v58 = vpack.c.bf16 %v365_v56, %v364_v55  ;;  %v1018_v60 = vld [vmem:[#allocation3 + $0x58] sm:$0xff]  ;;  %v1017_v62 = vld [vmem:[#allocation3 + $0x50] sm:$0xff]  ;;  %v1008_v63 = vld [vmem:[#allocation3 + $0x8] sm:$0xff] }
  0x1f   : > { %486 = vmatpush.bf16.msra.mxu1 %v898_v25  ;;  %v1016_v0 = vld [vmem:[#allocation3 + $0x48] sm:$0xff]  ;;  %v1007_v1 = vld [vmem:[#allocation3] sm:$0xff] }
  0x20   : > { %v1015_v2 = vld [vmem:[#allocation3 + $0x40] sm:$0xff] }
  0x21   : > { %636 = vmatpush.bf16.msra.mxu2 %v1011_v46  ;;  %v383_v3 = vld [vmem:[%s1330_s2] sm:$0x3] }
  0x22   : > { %473 = vmatpush.bf16.msra.mxu0 %v886_v32  ;;  %650 = vmatpush.bf16.msra.mxu3 %v1019_v47  ;;  %v385_v6 = vperm.slane %v383_v3, 0  ;;  %v386_v7 = vperm.slane %v383_v3, 1  ;;  %v1061_v23 = vld [vmem:[%s1332_s4] ss:$0 sm:$0xff]  ;;  %v1065_v32 = vpop.eup %1064 }
  0x23   : > { %487 = vmatpush.bf16.msra.mxu1 %v890_v33  ;;  %v687_v33 = vmul.f32 128.0, %v1065_v32  ;;  %vm691_vm0 = vweird.f32 %v1065_v32 }
  0x25   : > { %637 = vmatpush.bf16.msra.mxu2 %v1010_v59  ;;  %v688_v34 = vsub.f32 1.0, %v687_v33 }
  0x26   : > { %474 = vmatpush.bf16.msra.mxu0 %v878_v40  ;;  %651 = vmatpush.bf16.msra.mxu3 %v1018_v60  ;;  %v1062_v60 = vld [vmem:[%s1333_s5] ss:$0 sm:$0xff] }
  0x27   : > { %488 = vmatpush.bf16.msra.mxu1 %v882_v41  ;;  %v689_v35 = vmul.f32 %v1065_v32, %v688_v34 }
  0x29   : > { %638 = vmatpush.bf16.msra.mxu2 %v1009_v61  ;;  %v690_v36 = vadd.f32 %v1065_v32, %v689_v35 }
  0x2a   : > { %475 = vmatpush.bf16.msra.mxu0 %v870_v48  ;;  %652 = vmatpush.bf16.msra.mxu3 %v1017_v62 }
  0x2b   : > { %489 = vmatpush.bf16.msra.mxu1 %v874_v49  ;;  %v692_v37 = vsel %vm691_vm0, %v1065_v32, %v690_v36 }
  0x2d   : > { %639 = vmatpush.bf16.msra.mxu2 %v1008_v63  ;;  %v1063_v63 = vld [vmem:[%s1334_s6] ss:$0 sm:$0xff] }
  0x2e   : > { %476 = vmatpush.bf16.msra.mxu0 %v862_v54  ;;  %653 = vmatpush.bf16.msra.mxu3 %v1016_v0 }
  0x2f   : > { %490 = vmatpush.bf16.msra.mxu1 %v866_v57 }
  0x31   : > { %477 = vmatmul.bf16.vlgmr.msra.gmra.mxu0 %v366_v58  ;;  %640 = vmatpush.bf16.msra.mxu2 %v1007_v1 }
  0x32   : > { %491 = vmatmul.bf16.vlgmr.msra.gmra.mxu1 %v366_v58  ;;  %654 = vmatpush.bf16.msra.mxu3 %v1015_v2 }
  0xae   : > { %v478_v4 = vpop.f32.mrf.mxu0 }
  0xaf   : > { %v492_v5 = vpop.f32.mrf.mxu1  ;;  %v479_v8 = vadd.f32 %v478_v4, %v385_v6 }
  0xb0   : > { %v493_v9 = vadd.f32 %v492_v5, %v386_v7 }
  0xb1   : > { %v497_v14 = vmax.f32 %v479_v8, 0.0 }
  0xb2   : > { %v498_v16 = vmax.f32 %v493_v9, 0.0 }
  0xb6   : > { %v480_v10 = vpop.f32.mrf.mxu0 }
  0xb7   : > { %v481_v11 = vadd.f32 %v480_v10, %v385_v6  ;;  %v494_v12 = vpop.f32.mrf.mxu1 }
  0xb8   : > { %v495_v13 = vadd.f32 %v494_v12, %v386_v7 }
  0xb9   : > { %v499_v15 = vmax.f32 %v481_v11, 0.0 }
  0xba   : > { %v500_v17 = vmax.f32 %v495_v13, 0.0 }
  0xbb   : > { %v501_v18 = vpack.c.bf16 %v499_v15, %v497_v14 }
  0xbc   : > { %v502_v19 = vpack.c.bf16 %v500_v17, %v498_v16 }
  0xbd   : > { %641 = vmatmul.bf16.vlgmr.msra.gmra.mxu2 %v501_v18 }
  0xbe   : > { %655 = vmatmul.bf16.vlgmr.msra.gmra.mxu3 %v502_v19 }
 0x140   : > { %v642_v20 = vpop.f32.mrf.mxu2 }
 0x141   : > { %v656_v21 = vpop.f32.mrf.mxu3 }
 0x142   : > { %v657_v22 = vadd.f32 %v656_v21, %v642_v20 }
 0x144   : > { %v672_v24 = vadd.f32 %v657_v22, %v364_v55 }
 0x146   : > { %v678_v25 = vadd.f32 %v1061_v23, %v672_v24 }
 0x148   : > { %682 = vadd.xlane.f32.xlu0 %v678_v25  ;;  %v644_v26 = vpop.f32.mrf.mxu2 }
 0x149   : > { %v658_v27 = vpop.f32.mrf.mxu3 }
 0x14a   : > { %v659_v28 = vadd.f32 %v658_v27, %v644_v26 }
 0x14c   : > { %v673_v29 = vadd.f32 %v659_v28, %v365_v56 }
 0x14e   : > { %v679_v30 = vadd.f32 %v1061_v23, %v673_v29 }
 0x150   : > { %684 = vadd.xlane.f32.xlu0 %v679_v30 }
 0x1bb   : > { %v683_v38 = vpop.xlane.xlu0 %682 }
 0x1bc   : > { %v693_v39 = vmul.f32 %v692_v37, %v683_v38 }
 0x1be   : > { %v695_v40 = vsub.f32 %v678_v25, %v693_v39 }
 0x1c0   : > { %v697_v41 = vmul.f32 %v695_v40, %v695_v40 }
 0x1c2   : > { %699 = vadd.xlane.f32.xlu1 %v697_v41 }
 0x1c3   : > { %v685_v42 = vpop.xlane.xlu0 %684 }
 0x1c4   : > { %v694_v43 = vmul.f32 %v692_v37, %v685_v42 }
 0x1c6   : > { %v696_v44 = vsub.f32 %v679_v30, %v694_v43 }
 0x1c8   : > { %v698_v45 = vmul.f32 %v696_v44, %v696_v44 }
 0x1ca   : > { %701 = vadd.xlane.f32.xlu1 %v698_v45 }
 0x235   : > { %v700_v46 = vpop.xlane.xlu1 %699 }
 0x236   : > { %v703_v47 = vmul.f32 %v700_v46, %v692_v37 }
 0x238   : > { %v705_v48 = vadd.f32 1e-05, %v703_v47 }
 0x23a   : > { %1066 = vrsqrt.f32 %v705_v48  ;;  %vm713_vm2 = vweird.f32 %v705_v48 }
 0x23d   : > { %v702_v49 = vpop.xlane.xlu1 %701 }
 0x23e   : > { %v704_v50 = vmul.f32 %v702_v49, %v692_v37 }
 0x240   : > { %v1067_v51 = vpop.eup %1066  ;;  %v706_v52 = vadd.f32 1e-05, %v704_v50 }
 0x241   : > { %v708_v53 = vmul.f32 %v1067_v51, %v705_v48  ;;  %vm714_vm1 = vweird.f32 %v1067_v51 }
 0x242   : > { %1068 = vrsqrt.f32 %v706_v52  ;;  %vm715_vm3 = vmor %vm713_vm2, %vm714_vm1  ;;  %vm723_vm5 = vweird.f32 %v706_v52 }
 0x243   : > { %v709_v54 = vmul.f32 %v1067_v51, %v708_v53 }
 0x245   : > { %v710_v55 = vmul.f32 0.5, %v709_v54 }
 0x247   : > { %v711_v56 = vsub.f32 1.5, %v710_v55 }
 0x248   : > { %v1069_v57 = vpop.eup %1068 }
 0x249   : > { %v712_v58 = vmul.f32 %v1067_v51, %v711_v56  ;;  %v718_v59 = vmul.f32 %v1069_v57, %v706_v52  ;;  %vm724_vm4 = vweird.f32 %v1069_v57 }
 0x24a   : > { %vm725_vm6 = vmor %vm723_vm5, %vm724_vm4 }
 0x24b   : > { %v716_v61 = vsel %vm715_vm3, %v1067_v51, %v712_v58  ;;  %v719_v62 = vmul.f32 %v1069_v57, %v718_v59 }
 0x24c   : > { %v727_v0 = vmul.f32 %v716_v61, %v695_v40 }
 0x24d   : > { %v720_v1 = vmul.f32 0.5, %v719_v62 }
 0x24e   : > { %v732_v2 = vmul.f32 %v1062_v60, %v727_v0 }
 0x24f   : > { %v721_v3 = vsub.f32 1.5, %v720_v1 }
 0x250   : > { %v737_v4 = vadd.f32 %v1063_v63, %v732_v2 }
 0x251   : > { %v722_v5 = vmul.f32 %v1069_v57, %v721_v3 }
 0x252   : > { %739 = vst [vmem:[%s357_s16] sm:$0xff] %v737_v4 }
 0x253   : > { %v726_v6 = vsel %vm725_vm6, %v1069_v57, %v722_v5 }
 0x254   : > { %v728_v7 = vmul.f32 %v726_v6, %v696_v44 }
 0x256   : > { %v733_v8 = vmul.f32 %v1062_v60, %v728_v7 }
 0x258   : > { %v738_v9 = vadd.f32 %v1063_v63, %v733_v8 }
 0x25a   : > { %740 = vst [vmem:[%s357_s16 + $0x8] sm:$0xff] %v738_v9 }
 0x25b PF: > { %s18_s26 = sadd.s32 1, %s1126_s26   ;;  %s1336_s24 = smov %s1122_s25 }
 0x25c   : > { %p15_p8 = scmp.ge.s32.totalorder %s18_s26, 4   ;;  %s1337_s25 = smov %s1339_s28 }
 0x25e   :  { %17 = sbr.rel (!%p15_p8) target bundleno = 2 (0x2), region = 98 }
 0x263   :  { %762 = vsyncpa [#allocation4], 1 }
 0x264   :  { %764 = vsyncpa [#allocation4 + $0x1], 1 }

// kernel: gpt2_forward.8
= control target key start
LH: loop header
LB: loop body
LE: loop exit
PB: predicated region body
PF: predicated region fallthrough
CT: control target
= control target key end

     0   :  { %12 = vsyncpa [#allocation4], 0  ;;  %s1308_s0 = inlined_call_operand.vmem [shape: f32[2,16,128], index: 0, kind: input, shape index: {}]   ;;  %s1309_s1 = inlined_call_operand.hbm [shape: bf16[128,256], index: 1, kind: input, shape index: {}]   ;;  %s1310_s2 = inlined_call_operand.vmem [shape: f32[1,256], index: 2, kind: input, shape index: {}]   ;;  %s1311_s3 = inlined_call_operand.hbm [shape: bf16[256,128], index: 3, kind: input, shape index: {}]   ;;  %s1312_s4 = inlined_call_operand.vmem [shape: f32[1,128], index: 4, kind: input, shape index: {}]   ;;  %s1313_s5 = inlined_call_operand.vmem [shape: f32[1,128], index: 5, kind: input, shape index: {}]   ;;  %s1314_s6 = inlined_call_operand.vmem [shape: f32[1,128], index: 6, kind: input, shape index: {}]   ;;  %s1315_s7 = inlined_call_operand.vmem [shape: f32[2,16,128], index: 7, kind: output, shape index: {}]  }
   0x1   :  { %13 = vsyncpa [#allocation6], 0  ;;  %s1223_s24 = smov 0   ;;  %s1225_s25 = smov 0  }
   0x2   :  { %s1227_s26 = smov 0  }
   0x3 LB: > { %s847_s27 = sadd.s32 4294967295, %s1174_s26   ;;  %s31_s28 = sadd.s32 1, %s1170_s25  ;;  %s1174_s26 = sphi %s1227_s26, %s19_s26   ;;  %s1170_s25 = sphi %s1225_s25, %s1319_s25   ;;  %s1166_s24 = sphi %s1223_s24, %s1318_s24  }
   0x4   : > { %p33_p0 = scmp.ge.s32.totalorder %s31_s28, 2  ;;  %p849_p1 = scmp.ge.s32.totalorder %s1174_s26, 1 }
   0x5   : > { %p229_p2 = scmp.lt.s32.totalorder %s1174_s26, 3  ;;  %p1248_p4 = scmp.eq.s32.totalorder %s847_s27, 0 }
   0x6   : > { %s1321_s28 = smov (%p33_p0, %s31_s28), 0  ;;  %s243_s10 = sshll.u32 %s1309_s1, 4  ;;  %s244_s10 = int_to_ptr.hbm [resolvable:$true] %s243_s10 }
   0x7   : > { %p1244_p3 = pnand %p849_p1, %p229_p2  ;;  %s1176_s11 = smov [#allocation3]  }
   0x8   : > { %s245_s12 = sshll.u32 %s1176_s11, 4  ;;  %s268_s15 = sshll.u32 %s1311_s3, 4  ;;  %s246_s12 = int_to_ptr.vmem [resolvable:$true] %s245_s12  ;;  %s269_s15 = int_to_ptr.hbm [resolvable:$true] %s268_s15 }
   0x9   : > { %p1033_p5 = pneg %p1244_p3  ;;  %s1177_s16 = smov 128  }
   0xa   : > { %s1178_s17 = smov 8   ;;  %s1179_s18 = smov [#allocation5]  }
   0xb   : > { %p1034_p6 = pnand %p1248_p4, %p1033_p5  ;;  %s270_s19 = sshll.u32 %s1179_s18, 4  ;;  %s271_s19 = int_to_ptr.vmem [resolvable:$true] %s270_s19 }
   0xc   : > { %s1180_s20 = smov 64   ;;  %s1181_s21 = smov 4  }
   0xd   : > { %1036 = dma.hbm_to_vmem [thread:$0]  (!%p1034_p6), %s244_s10, 2048, %s246_s12, [#allocation4], %s1177_s16, %s1177_s16, %s1178_s17  }
   0xe   : > { %1039 = dma.hbm_to_vmem [thread:$0]  (!%p1034_p6), %s269_s15, 2048, %s271_s19, [#allocation6], %s1180_s20, %s1180_s20, %s1181_s21  }
   0xf   : > { %303 = sbr.rel (%p1244_p3) target bundleno = 611 (0x263), region = 48 }
  0x14   : > { %1157 = dma.done.wait (%p1248_p4), [#allocation4], 2048  }
  0x15   : > { %1159 = vsyncadd (%p1248_p4), [#allocation4], 4294965248 }
  0x16   : > { %1161 = dma.done.wait (%p1248_p4), [#allocation6], 2048  }
  0x17   : > { %1163 = vsyncadd (%p1248_p4), [#allocation6], 4294965248  ;;  %v919_v0 = vld [vmem:[#allocation3 + $0x70] sm:$0xf]  ;;  %v1008_v1 = vld [vmem:[#allocation3 + $0x74] sm:$0xf0] }
  0x18   : > { %v1007_v2 = vld [vmem:[#allocation3 + $0x74] sm:$0xf]  ;;  %v920_v3 = vor.u32 %v1008_v1, %v919_v0  ;;  %v921_v4 = vld [vmem:[#allocation3 + $0x78] sm:$0xf0]  ;;  %v911_v5 = vld [vmem:[#allocation3 + $0x60] sm:$0xf] }
  0x19   : > { %v1006_v6 = vld [vmem:[#allocation3 + $0x64] sm:$0xf0]  ;;  %v924_v7 = vor.u32 %v1007_v2, %v921_v4  ;;  %v1005_v8 = vld [vmem:[#allocation3 + $0x64] sm:$0xf]  ;;  %v913_v9 = vld [vmem:[#allocation3 + $0x68] sm:$0xf0] }
  0x1a   : > { %473 = vmatpush.bf16.msra.mxu0 %v920_v3  ;;  %v912_v10 = vor.u32 %v1006_v6, %v911_v5  ;;  %v916_v11 = vor.u32 %v1005_v8, %v913_v9  ;;  %v903_v12 = vld [vmem:[#allocation3 + $0x50] sm:$0xf]  ;;  %v1004_v13 = vld [vmem:[#allocation3 + $0x54] sm:$0xf0]  ;;  %v1003_v14 = vld [vmem:[#allocation3 + $0x54] sm:$0xf] }
  0x1b   : > { %487 = vmatpush.bf16.msra.mxu1 %v924_v7  ;;  %v905_v15 = vld [vmem:[#allocation3 + $0x58] sm:$0xf0]  ;;  %v904_v16 = vor.u32 %v1004_v13, %v903_v12  ;;  %v895_v18 = vld [vmem:[#allocation3 + $0x40] sm:$0xf]  ;;  %v1002_v19 = vld [vmem:[#allocation3 + $0x44] sm:$0xf0] }
  0x1c   : > { %v908_v17 = vor.u32 %v1003_v14, %v905_v15  ;;  %v1001_v20 = vld [vmem:[#allocation3 + $0x44] sm:$0xf]  ;;  %v897_v21 = vld [vmem:[#allocation3 + $0x48] sm:$0xf0]  ;;  %v896_v22 = vor.u32 %v1002_v19, %v895_v18  ;;  %v1016_v23 = vld [vmem:[#allocation5 + $0x38] sm:$0xff]  ;;  %p345_p7 = scmp.lt.s32.totalorder %s1166_s24, 1 }
  0x1d   : > { %v1024_v24 = vld [vmem:[#allocation5 + $0x78] sm:$0xff]  ;;  %v900_v25 = vor.u32 %v1001_v20, %v897_v21  ;;  %v887_v26 = vld [vmem:[#allocation3 + $0x30] sm:$0xf]  ;;  %v999_v28 = vld [vmem:[#allocation3 + $0x34] sm:$0xf]  ;;  %637 = vmatpush.bf16.msra.mxu2 %v1016_v23 }
  0x1e   : > { %474 = vmatpush.bf16.msra.mxu0 %v912_v10  ;;  %v1000_v27 = vld [vmem:[#allocation3 + $0x34] sm:$0xf0]  ;;  %v889_v29 = vld [vmem:[#allocation3 + $0x38] sm:$0xf0]  ;;  %651 = vmatpush.bf16.msra.mxu3 %v1024_v24  ;;  %v1015_v30 = vld [vmem:[#allocation5 + $0x30] sm:$0xff]  ;;  %s1323_s24 = smov (!%p345_p7, %s1166_s24), 1 }
  0x1f   : > { %488 = vmatpush.bf16.msra.mxu1 %v916_v11  ;;  %v1023_v31 = vld [vmem:[#allocation5 + $0x70] sm:$0xff]  ;;  %v888_v32 = vor.u32 %v1000_v27, %v887_v26  ;;  %v892_v33 = vor.u32 %v999_v28, %v889_v29  ;;  %v879_v34 = vld [vmem:[#allocation3 + $0x20] sm:$0xf]  ;;  %v998_v35 = vld [vmem:[#allocation3 + $0x24] sm:$0xf0]  ;;  %s991_s22 = sshll.u32 %s1323_s24, 4 }
  0x20   : > { %v997_v36 = vld [vmem:[#allocation3 + $0x24] sm:$0xf]  ;;  %v881_v37 = vld [vmem:[#allocation3 + $0x28] sm:$0xf0]  ;;  %v880_v40 = vor.u32 %v998_v35, %v879_v34  ;;  %v871_v42 = vld [vmem:[#allocation3 + $0x10] sm:$0xf]  ;;  %s349_s29 = scalar_lea.vmem %s1308_s0, %s991_s22  ;;  %s361_s17 = scalar_lea.vmem %s1315_s7, %s991_s22 }
  0x21   : > { %638 = vmatpush.bf16.msra.mxu2 %v1015_v30  ;;  %v1014_v38 = vld [vmem:[#allocation5 + $0x28] sm:$0xff]  ;;  %v884_v41 = vor.u32 %v997_v36, %v881_v37  ;;  %v996_v43 = vld [vmem:[#allocation3 + $0x14] sm:$0xf0]  ;;  %v995_v44 = vld [vmem:[#allocation3 + $0x14] sm:$0xf] }
  0x22   : > { %475 = vmatpush.bf16.msra.mxu0 %v904_v16  ;;  %652 = vmatpush.bf16.msra.mxu3 %v1023_v31  ;;  %v1022_v39 = vld [vmem:[#allocation5 + $0x68] sm:$0xff]  ;;  %v873_v45 = vld [vmem:[#allocation3 + $0x18] sm:$0xf0]  ;;  %v1013_v46 = vld [vmem:[#allocation5 + $0x20] sm:$0xff]  ;;  %v872_v48 = vor.u32 %v996_v43, %v871_v42  ;;  %v1182_v31 = vmov 128.0  }
  0x23   : > { %489 = vmatpush.bf16.msra.mxu1 %v908_v17  ;;  %v1021_v47 = vld [vmem:[#allocation5 + $0x60] sm:$0xff]  ;;  %v876_v49 = vor.u32 %v995_v44, %v873_v45  ;;  %v994_v51 = vld [vmem:[#allocation3 + $0x4] sm:$0xf0]  ;;  %v865_v53 = vld [vmem:[#allocation3 + $0x8] sm:$0xf0]  ;;  %1078 = vrcp.f32 %v1182_v31 }
  0x24   : > { %v863_v50 = vld [vmem:[#allocation3] sm:$0xf]  ;;  %v993_v52 = vld [vmem:[#allocation3 + $0x4] sm:$0xf]  ;;  %v369_v56 = vld [vmem:[%s349_s29 + $0x8] sm:$0xff] }
  0x25   : > { %639 = vmatpush.bf16.msra.mxu2 %v1014_v38  ;;  %v864_v54 = vor.u32 %v994_v51, %v863_v50  ;;  %v368_v55 = vld [vmem:[%s349_s29] sm:$0xff]  ;;  %v868_v57 = vor.u32 %v993_v52, %v865_v53  ;;  %v1012_v59 = vld [vmem:[#allocation5 + $0x18] sm:$0xff]  ;;  %v1011_v61 = vld [vmem:[#allocation5 + $0x10] sm:$0xff] }
  0x26   : > { %476 = vmatpush.bf16.msra.mxu0 %v896_v22  ;;  %653 = vmatpush.bf16.msra.mxu3 %v1022_v39  ;;  %v370_v58 = vpack.c.bf16 %v369_v56, %v368_v55  ;;  %v1020_v60 = vld [vmem:[#allocation5 + $0x58] sm:$0xff]  ;;  %v1019_v62 = vld [vmem:[#allocation5 + $0x50] sm:$0xff]  ;;  %v1010_v63 = vld [vmem:[#allocation5 + $0x8] sm:$0xff] }
  0x27   : > { %490 = vmatpush.bf16.msra.mxu1 %v900_v25  ;;  %v1018_v0 = vld [vmem:[#allocation5 + $0x48] sm:$0xff]  ;;  %v1009_v1 = vld [vmem:[#allocation5] sm:$0xff] }
  0x28   : > { %v1017_v2 = vld [vmem:[#allocation5 + $0x40] sm:$0xff] }
  0x29   : > { %640 = vmatpush.bf16.msra.mxu2 %v1013_v46  ;;  %v387_v3 = vld [vmem:[%s1310_s2] sm:$0x3] }
  0x2a   : > { %477 = vmatpush.bf16.msra.mxu0 %v888_v32  ;;  %654 = vmatpush.bf16.msra.mxu3 %v1021_v47  ;;  %v389_v6 = vperm.slane %v387_v3, 0  ;;  %v390_v7 = vperm.slane %v387_v3, 1  ;;  %v1075_v23 = vld [vmem:[%s1312_s4] ss:$0 sm:$0xff]  ;;  %v1079_v32 = vpop.eup %1078 }
  0x2b   : > { %491 = vmatpush.bf16.msra.mxu1 %v892_v33  ;;  %v691_v33 = vmul.f32 128.0, %v1079_v32  ;;  %vm695_vm0 = vweird.f32 %v1079_v32 }
  0x2d   : > { %641 = vmatpush.bf16.msra.mxu2 %v1012_v59  ;;  %v692_v34 = vsub.f32 1.0, %v691_v33 }
  0x2e   : > { %478 = vmatpush.bf16.msra.mxu0 %v880_v40  ;;  %655 = vmatpush.bf16.msra.mxu3 %v1020_v60  ;;  %v1076_v60 = vld [vmem:[%s1313_s5] ss:$0 sm:$0xff] }
  0x2f   : > { %492 = vmatpush.bf16.msra.mxu1 %v884_v41  ;;  %v693_v35 = vmul.f32 %v1079_v32, %v692_v34 }
  0x31   : > { %642 = vmatpush.bf16.msra.mxu2 %v1011_v61  ;;  %v694_v36 = vadd.f32 %v1079_v32, %v693_v35 }
  0x32   : > { %479 = vmatpush.bf16.msra.mxu0 %v872_v48  ;;  %656 = vmatpush.bf16.msra.mxu3 %v1019_v62 }
  0x33   : > { %493 = vmatpush.bf16.msra.mxu1 %v876_v49  ;;  %v696_v37 = vsel %vm695_vm0, %v1079_v32, %v694_v36 }
  0x35   : > { %643 = vmatpush.bf16.msra.mxu2 %v1010_v63  ;;  %v1077_v63 = vld [vmem:[%s1314_s6] ss:$0 sm:$0xff] }
  0x36   : > { %480 = vmatpush.bf16.msra.mxu0 %v864_v54  ;;  %657 = vmatpush.bf16.msra.mxu3 %v1018_v0 }
  0x37   : > { %494 = vmatpush.bf16.msra.mxu1 %v868_v57 }
  0x39   : > { %481 = vmatmul.bf16.vlgmr.msra.gmra.mxu0 %v370_v58  ;;  %644 = vmatpush.bf16.msra.mxu2 %v1009_v1 }
  0x3a   : > { %495 = vmatmul.bf16.vlgmr.msra.gmra.mxu1 %v370_v58  ;;  %658 = vmatpush.bf16.msra.mxu3 %v1017_v2 }
  0xb6   : > { %v482_v4 = vpop.f32.mrf.mxu0 }
  0xb7   : > { %v496_v5 = vpop.f32.mrf.mxu1  ;;  %v483_v8 = vadd.f32 %v482_v4, %v389_v6 }
  0xb8   : > { %v497_v9 = vadd.f32 %v496_v5, %v390_v7 }
  0xb9   : > { %v501_v14 = vmax.f32 %v483_v8, 0.0 }
  0xba   : > { %v502_v16 = vmax.f32 %v497_v9, 0.0 }
  0xbe   : > { %v484_v10 = vpop.f32.mrf.mxu0 }
  0xbf   : > { %v485_v11 = vadd.f32 %v484_v10, %v389_v6  ;;  %v498_v12 = vpop.f32.mrf.mxu1 }
  0xc0   : > { %v499_v13 = vadd.f32 %v498_v12, %v390_v7 }
  0xc1   : > { %v503_v15 = vmax.f32 %v485_v11, 0.0 }
  0xc2   : > { %v504_v17 = vmax.f32 %v499_v13, 0.0 }
  0xc3   : > { %v505_v18 = vpack.c.bf16 %v503_v15, %v501_v14 }
  0xc4   : > { %v506_v19 = vpack.c.bf16 %v504_v17, %v502_v16 }
  0xc5   : > { %645 = vmatmul.bf16.vlgmr.msra.gmra.mxu2 %v505_v18 }
  0xc6   : > { %659 = vmatmul.bf16.vlgmr.msra.gmra.mxu3 %v506_v19 }
 0x148   : > { %v646_v20 = vpop.f32.mrf.mxu2 }
 0x149   : > { %v660_v21 = vpop.f32.mrf.mxu3 }
 0x14a   : > { %v661_v22 = vadd.f32 %v660_v21, %v646_v20 }
 0x14c   : > { %v676_v24 = vadd.f32 %v661_v22, %v368_v55 }
 0x14e   : > { %v682_v25 = vadd.f32 %v1075_v23, %v676_v24 }
 0x150   : > { %686 = vadd.xlane.f32.xlu0 %v682_v25  ;;  %v648_v26 = vpop.f32.mrf.mxu2 }
 0x151   : > { %v662_v27 = vpop.f32.mrf.mxu3 }
 0x152   : > { %v663_v28 = vadd.f32 %v662_v27, %v648_v26 }
 0x154   : > { %v677_v29 = vadd.f32 %v663_v28, %v369_v56 }
 0x156   : > { %v683_v30 = vadd.f32 %v1075_v23, %v677_v29 }
 0x158   : > { %688 = vadd.xlane.f32.xlu0 %v683_v30 }
 0x1c3   : > { %v687_v38 = vpop.xlane.xlu0 %686 }
 0x1c4   : > { %v697_v39 = vmul.f32 %v696_v37, %v687_v38 }
 0x1c6   : > { %v699_v40 = vsub.f32 %v682_v25, %v697_v39 }
 0x1c8   : > { %v701_v41 = vmul.f32 %v699_v40, %v699_v40 }
 0x1ca   : > { %703 = vadd.xlane.f32.xlu1 %v701_v41 }
 0x1cb   : > { %v689_v42 = vpop.xlane.xlu0 %688 }
 0x1cc   : > { %v698_v43 = vmul.f32 %v696_v37, %v689_v42 }
 0x1ce   : > { %v700_v44 = vsub.f32 %v683_v30, %v698_v43 }
 0x1d0   : > { %v702_v45 = vmul.f32 %v700_v44, %v700_v44 }
 0x1d2   : > { %705 = vadd.xlane.f32.xlu1 %v702_v45 }
 0x23d   : > { %v704_v46 = vpop.xlane.xlu1 %703 }
 0x23e   : > { %v707_v47 = vmul.f32 %v704_v46, %v696_v37 }
 0x240   : > { %v709_v48 = vadd.f32 1e-05, %v707_v47 }
 0x242   : > { %1080 = vrsqrt.f32 %v709_v48  ;;  %vm717_vm2 = vweird.f32 %v709_v48 }
 0x245   : > { %v706_v49 = vpop.xlane.xlu1 %705 }
 0x246   : > { %v708_v50 = vmul.f32 %v706_v49, %v696_v37 }
 0x248   : > { %v1081_v51 = vpop.eup %1080  ;;  %v710_v52 = vadd.f32 1e-05, %v708_v50 }
 0x249   : > { %v712_v53 = vmul.f32 %v1081_v51, %v709_v48  ;;  %vm718_vm1 = vweird.f32 %v1081_v51 }
 0x24a   : > { %1082 = vrsqrt.f32 %v710_v52  ;;  %vm719_vm3 = vmor %vm717_vm2, %vm718_vm1  ;;  %vm727_vm5 = vweird.f32 %v710_v52 }
 0x24b   : > { %v713_v54 = vmul.f32 %v1081_v51, %v712_v53 }
 0x24d   : > { %v714_v55 = vmul.f32 0.5, %v713_v54 }
 0x24f   : > { %v715_v56 = vsub.f32 1.5, %v714_v55 }
 0x250   : > { %v1083_v57 = vpop.eup %1082 }
 0x251   : > { %v716_v58 = vmul.f32 %v1081_v51, %v715_v56  ;;  %v722_v59 = vmul.f32 %v1083_v57, %v710_v52  ;;  %vm728_vm4 = vweird.f32 %v1083_v57 }
 0x252   : > { %vm729_vm6 = vmor %vm727_vm5, %vm728_vm4 }
 0x253   : > { %v720_v61 = vsel %vm719_vm3, %v1081_v51, %v716_v58  ;;  %v723_v62 = vmul.f32 %v1083_v57, %v722_v59 }
 0x254   : > { %v731_v0 = vmul.f32 %v720_v61, %v699_v40 }
 0x255   : > { %v724_v1 = vmul.f32 0.5, %v723_v62 }
 0x256   : > { %v736_v2 = vmul.f32 %v1076_v60, %v731_v0 }
 0x257   : > { %v725_v3 = vsub.f32 1.5, %v724_v1 }
 0x258   : > { %v741_v4 = vadd.f32 %v1077_v63, %v736_v2 }
 0x259   : > { %v726_v5 = vmul.f32 %v1083_v57, %v725_v3 }
 0x25a   : > { %743 = vst [vmem:[%s361_s17] sm:$0xff] %v741_v4 }
 0x25b   : > { %v730_v6 = vsel %vm729_vm6, %v1083_v57, %v726_v5 }
 0x25c   : > { %v732_v7 = vmul.f32 %v730_v6, %v700_v44 }
 0x25e   : > { %v737_v8 = vmul.f32 %v1076_v60, %v732_v7 }
 0x260   : > { %v742_v9 = vadd.f32 %v1077_v63, %v737_v8 }
 0x262   : > { %744 = vst [vmem:[%s361_s17 + $0x8] sm:$0xff] %v742_v9 }
 0x263 PF: > { %s19_s26 = sadd.s32 1, %s1174_s26   ;;  %s1318_s24 = smov %s1170_s25 }
 0x264   : > { %p16_p8 = scmp.ge.s32.totalorder %s19_s26, 4   ;;  %s1319_s25 = smov %s1321_s28 }
 0x266   :  { %18 = sbr.rel (!%p16_p8) target bundleno = 3 (0x3), region = 100 }
 0x26b   :  { %766 = vsyncpa [#allocation4], 1 }
 0x26c   :  { %768 = vsyncpa [#allocation4 + $0x1], 1 }
 0x26d   :  { %769 = vsyncpa [#allocation6], 1 }

// kernel: gpt2_forward.5
= control target key start
LH: loop header
LB: loop body
LE: loop exit
PB: predicated region body
PF: predicated region fallthrough
CT: control target
= control target key end

     0   :  { %12 = vsyncpa [#allocation3], 0  ;;  %s1400_s24 = smov 0   ;;  %s1697_s0 = inlined_call_operand.vmem [shape: f32[2,16,128], index: 0, kind: input, shape index: {}]   ;;  %s1698_s1 = inlined_call_operand.vmem [shape: bf16[128,384], index: 1, kind: input, shape index: {}]   ;;  %s1699_s2 = inlined_call_operand.vmem [shape: f32[1,384], index: 2, kind: input, shape index: {}]   ;;  %s1700_s3 = inlined_call_operand.hbm [shape: bf16[128,128], index: 3, kind: input, shape index: {}]   ;;  %s1701_s4 = inlined_call_operand.vmem [shape: f32[1,128], index: 4, kind: input, shape index: {}]   ;;  %s1702_s5 = inlined_call_operand.vmem [shape: f32[1,128], index: 5, kind: input, shape index: {}]   ;;  %s1703_s6 = inlined_call_operand.vmem [shape: f32[1,128], index: 6, kind: input, shape index: {}]   ;;  %s1704_s7 = inlined_call_operand.vmem [shape: f32[2,16,128], index: 7, kind: output, shape index: {}]  }
   0x1 LB: > { %s218_s27 = sshll.u32 %s1700_s3, 4  ;;  %s1409_s28 = sadd.s32 4294967295, %s1351_s24   ;;  %s1351_s24 = sphi %s1400_s24, %s18_s24   ;;  %s219_s27 = int_to_ptr.hbm [resolvable:$true] %s218_s27 }
   0x2   : > { %p1049_p0 = scmp.ge.s32.totalorder %s1351_s24, 1  ;;  %p201_p1 = scmp.lt.s32.totalorder %s1351_s24, 3 }
   0x3   : > { %p1238_p2 = scmp.eq.s32.totalorder %s1409_s28, 0  ;;  %s1353_s29 = smov [#allocation2]  }
   0x4   : > { %p202_p3 = pnand %p1049_p0, %p201_p1  ;;  %s220_s30 = sshll.u32 %s1353_s29, 4  ;;  %s221_s30 = int_to_ptr.vmem [resolvable:$true] %s220_s30 }
   0x5   : > { %s1354_s8 = smov 64   ;;  %s1355_s9 = smov 4  }
   0x6   : > { %p1234_p4 = pneg %p202_p3  ;;  %253 = sbr.rel (%p202_p3) target bundleno = 1690 (0x69a), region = 48 }
   0x8   : > { %p1235_p5 = pnand %p1238_p2, %p1234_p4 }
   0xa   : > { %1237 = dma.hbm_to_vmem [thread:$0]  (!%p1235_p5), %s219_s27, 1024, %s221_s30, [#allocation3], %s1354_s8, %s1354_s8, %s1355_s9  }
   0xb   : > { %1346 = dma.done.wait (%p1238_p2), [#allocation3], 1024  }
   0xc   : > { %1348 = vsyncadd (%p1238_p2), [#allocation3], 4294966272  ;;  %v1144_v0 = vld [vmem:[%s1698_s1 + $0xa8] sm:$0xf]  ;;  %v1220_v1 = vld [vmem:[%s1698_s1 + $0xb0] sm:$0xf0] }
   0xd   : > { %v1219_v2 = vld [vmem:[%s1698_s1 + $0xac] sm:$0xf]  ;;  %v1145_v3 = vor.u32 %v1220_v1, %v1144_v0  ;;  %v1146_v4 = vld [vmem:[%s1698_s1 + $0xb4] sm:$0xf0]  ;;  %v1132_v5 = vld [vmem:[%s1698_s1 + $0x90] sm:$0xf] }
   0xe   : > { %v1217_v6 = vld [vmem:[%s1698_s1 + $0x98] sm:$0xf0]  ;;  %v1149_v7 = vor.u32 %v1219_v2, %v1146_v4  ;;  %v1216_v8 = vld [vmem:[%s1698_s1 + $0x94] sm:$0xf]  ;;  %v1134_v9 = vld [vmem:[%s1698_s1 + $0x9c] sm:$0xf0] }
   0xf   : > { %468 = vmatpush.bf16.msra.mxu0 %v1145_v3  ;;  %v1133_v10 = vor.u32 %v1217_v6, %v1132_v5  ;;  %v1137_v11 = vor.u32 %v1216_v8, %v1134_v9  ;;  %v1120_v12 = vld [vmem:[%s1698_s1 + $0x78] sm:$0xf]  ;;  %v1214_v13 = vld [vmem:[%s1698_s1 + $0x80] sm:$0xf0]  ;;  %v1213_v14 = vld [vmem:[%s1698_s1 + $0x7c] sm:$0xf] }
  0x10   : > { %482 = vmatpush.bf16.msra.mxu1 %v1149_v7  ;;  %v1122_v15 = vld [vmem:[%s1698_s1 + $0x84] sm:$0xf0]  ;;  %v1121_v16 = vor.u32 %v1214_v13, %v1120_v12  ;;  %v1108_v18 = vld [vmem:[%s1698_s1 + $0x60] sm:$0xf]  ;;  %v1211_v19 = vld [vmem:[%s1698_s1 + $0x68] sm:$0xf0] }
  0x11   : > { %v1125_v17 = vor.u32 %v1213_v14, %v1122_v15  ;;  %v1210_v20 = vld [vmem:[%s1698_s1 + $0x64] sm:$0xf]  ;;  %v1110_v21 = vld [vmem:[%s1698_s1 + $0x6c] sm:$0xf0]  ;;  %p286_p6 = scmp.lt.s32.totalorder %s1409_s28, 1  ;;  %v1109_v22 = vor.u32 %v1211_v19, %v1108_v18  ;;  %vm520_vm0 = vcmask 261120  }
  0x12   : > { %v1096_v23 = vld [vmem:[%s1698_s1 + $0x48] sm:$0xf]  ;;  %v1152_v24 = vld [vmem:[%s1698_s1 + $0xb0] sm:$0xf]  ;;  %v1221_v25 = vld [vmem:[%s1698_s1 + $0xb8] sm:$0xf0]  ;;  %v1113_v26 = vor.u32 %v1210_v20, %v1110_v21 }
  0x13   : > { %469 = vmatpush.bf16.msra.mxu0 %v1133_v10  ;;  %v1208_v27 = vld [vmem:[%s1698_s1 + $0x50] sm:$0xf0]  ;;  %v1153_v28 = vor.u32 %v1221_v25, %v1152_v24  ;;  %v1140_v29 = vld [vmem:[%s1698_s1 + $0x98] sm:$0xf]  ;;  %v1218_v30 = vld [vmem:[%s1698_s1 + $0xa0] sm:$0xf0] }
  0x14   : > { %483 = vmatpush.bf16.msra.mxu1 %v1137_v11  ;;  %v1207_v31 = vld [vmem:[%s1698_s1 + $0x4c] sm:$0xf]  ;;  %v1098_v32 = vld [vmem:[%s1698_s1 + $0x54] sm:$0xf0]  ;;  %v1141_v33 = vor.u32 %v1218_v30, %v1140_v29  ;;  %v1097_v34 = vor.u32 %v1208_v27, %v1096_v23  ;;  %s1706_s28 = smov (!%p286_p6, %s1409_s28), 1  ;;  %s1356_s8 = smov 96  }
  0x15   : > { %496 = vmatpush.bf16.msra.mxu2 %v1153_v28  ;;  %v1128_v35 = vld [vmem:[%s1698_s1 + $0x80] sm:$0xf]  ;;  %v1215_v36 = vld [vmem:[%s1698_s1 + $0x88] sm:$0xf0]  ;;  %v1101_v37 = vor.u32 %v1207_v31, %v1098_v32  ;;  %v1084_v38 = vld [vmem:[%s1698_s1 + $0x30] sm:$0xf] }
  0x16   : > { %v1205_v39 = vld [vmem:[%s1698_s1 + $0x38] sm:$0xf0]  ;;  %v1204_v40 = vld [vmem:[%s1698_s1 + $0x34] sm:$0xf]  ;;  %v1086_v41 = vld [vmem:[%s1698_s1 + $0x3c] sm:$0xf0]  ;;  %v1129_v42 = vor.u32 %v1215_v36, %v1128_v35 }
  0x17   : > { %470 = vmatpush.bf16.msra.mxu0 %v1121_v16  ;;  %v1085_v43 = vor.u32 %v1205_v39, %v1084_v38  ;;  %v1116_v44 = vld [vmem:[%s1698_s1 + $0x68] sm:$0xf]  ;;  %v1212_v45 = vld [vmem:[%s1698_s1 + $0x70] sm:$0xf0]  ;;  %v1089_v46 = vor.u32 %v1204_v40, %v1086_v41  ;;  %v1072_v47 = vld [vmem:[%s1698_s1 + $0x18] sm:$0xf] }
  0x18   : > { %484 = vmatpush.bf16.msra.mxu1 %v1125_v17  ;;  %v1202_v48 = vld [vmem:[%s1698_s1 + $0x20] sm:$0xf0]  ;;  %s1196_s15 = sshll.u32 %s1706_s28, 4  ;;  %v1201_v49 = vld [vmem:[%s1698_s1 + $0x1c] sm:$0xf]  ;;  %v1117_v51 = vor.u32 %v1212_v45, %v1116_v44  ;;  %s1357_s9 = smov 64  }
  0x19   : > { %497 = vmatpush.bf16.msra.mxu2 %v1141_v33  ;;  %v1074_v50 = vld [vmem:[%s1698_s1 + $0x24] sm:$0xf0]  ;;  %v1073_v52 = vor.u32 %v1202_v48, %v1072_v47  ;;  %s290_s22 = scalar_lea.vmem %s1697_s0, %s1196_s15  ;;  %v1104_v53 = vld [vmem:[%s1698_s1 + $0x50] sm:$0xf]  ;;  %v1209_v54 = vld [vmem:[%s1698_s1 + $0x58] sm:$0xf0]  ;;  %v510_v33 = vlaneseq  ;;  %s295_s20 = scalar_lea.vmem %s1704_s7, %s1196_s15 }
  0x1a   : > { %v1077_v55 = vor.u32 %v1201_v49, %v1074_v50  ;;  %v1060_v56 = vld [vmem:[%s1698_s1] sm:$0xf]  ;;  %v1199_v57 = vld [vmem:[%s1698_s1 + $0x8] sm:$0xf0]  ;;  %v1198_v58 = vld [vmem:[%s1698_s1 + $0x4] sm:$0xf]  ;;  %v1105_v61 = vor.u32 %v1209_v54, %v1104_v53 }
  0x1b   : > { %471 = vmatpush.bf16.msra.mxu0 %v1109_v22  ;;  %v1062_v59 = vld [vmem:[%s1698_s1 + $0xc] sm:$0xf0]  ;;  %v1552_v60 = vld [vmem:[%s290_s22] sm:$0xff]  ;;  %v1061_v62 = vor.u32 %v1199_v57, %v1060_v56  ;;  %v1554_v63 = vld [vmem:[%s290_s22 + $0x8] sm:$0xff]  ;;  %s1358_s10 = smov 32   ;;  %v1595_v35 = vand.u32 127, %v510_v33 }
  0x1c   : > { %485 = vmatpush.bf16.msra.mxu1 %v1113_v26  ;;  %v1092_v0 = vld [vmem:[%s1698_s1 + $0x38] sm:$0xf]  ;;  %v1206_v1 = vld [vmem:[%s1698_s1 + $0x40] sm:$0xf0]  ;;  %v1065_v2 = vor.u32 %v1198_v58, %v1062_v59  ;;  %v299_v3 = vpack.c.bf16 %v1554_v63, %v1552_v60  ;;  %v1080_v5 = vld [vmem:[%s1698_s1 + $0x20] sm:$0xf] }
  0x1d   : > { %498 = vmatpush.bf16.msra.mxu2 %v1129_v42  ;;  %v1093_v4 = vor.u32 %v1206_v1, %v1092_v0  ;;  %v1203_v6 = vld [vmem:[%s1698_s1 + $0x28] sm:$0xf0]  ;;  %v1068_v8 = vld [vmem:[%s1698_s1 + $0x8] sm:$0xf]  ;;  %v1200_v9 = vld [vmem:[%s1698_s1 + $0x10] sm:$0xf0] }
  0x1e   : > { %v1081_v7 = vor.u32 %v1203_v6, %v1080_v5  ;;  %v1069_v10 = vor.u32 %v1200_v9, %v1068_v8  ;;  %v332_v12 = vld [vmem:[%s1699_s2] sm:$0x7]  ;;  %vm545_vm2 = vcmask 130048   ;;  %vm828_vm4 = vcmask 523264  }
  0x1f   : > { %472 = vmatpush.bf16.msra.mxu0 %v1097_v34  ;;  %v335_v14 = vperm.slane %v332_v12, 1  ;;  %v334_v18 = vperm.slane %v332_v12, 0  ;;  %v336_v26 = vperm.slane %v332_v12, 2  ;;  %v1593_v34 = vshrl.u32 %v510_v33, 7 }
  0x20   : > { %486 = vmatpush.bf16.msra.mxu1 %v1101_v37  ;;  %vm831_vm5 = vcmask 785408  }
  0x21   : > { %499 = vmatpush.bf16.msra.mxu2 %v1117_v51  ;;  %vm515_vm1 = vcmp.le.s32.totalorder %v1595_v35, %v1593_v34  ;;  %v1604_v40 = vadd.s32 8, %v1593_v34 }
  0x23   : > { %473 = vmatpush.bf16.msra.mxu0 %v1085_v43  ;;  %vm516_vm3 = vcmp.le.s32.totalorder %v1595_v35, %v1604_v40 }
  0x24   : > { %487 = vmatpush.bf16.msra.mxu1 %v1089_v46 }
  0x25   : > { %500 = vmatpush.bf16.msra.mxu2 %v1105_v61 }
  0x27   : > { %474 = vmatpush.bf16.msra.mxu0 %v1073_v52 }
  0x28   : > { %488 = vmatpush.bf16.msra.mxu1 %v1077_v55 }
  0x29   : > { %501 = vmatpush.bf16.msra.mxu2 %v1093_v4 }
  0x2b   : > { %475 = vmatpush.bf16.msra.mxu0 %v1061_v62 }
  0x2c   : > { %489 = vmatpush.bf16.msra.mxu1 %v1065_v2 }
  0x2d   : > { %502 = vmatpush.bf16.msra.mxu2 %v1081_v7 }
  0x2e   : > { %476 = vmatmul.bf16.vlgmr.msra.gmra.mxu0 %v299_v3 }
  0x2f   : > { %490 = vmatmul.bf16.vlgmr.msra.gmra.mxu1 %v299_v3 }
  0x31   : > { %503 = vmatpush.bf16.msra.mxu2 %v1069_v10 }
  0x34   : > { %504 = vmatmul.bf16.vlgmr.msra.gmra.mxu2 %v299_v3 }
  0xab   : > { %v477_v13 = vpop.f32.mrf.mxu0 }
  0xac   : > { %v491_v11 = vpop.f32.mrf.mxu1  ;;  %v478_v22 = vadd.f32 %v477_v13, %v334_v18 }
  0xad   : > { %v492_v16 = vadd.f32 %v491_v11, %v335_v14 }
  0xb3   : > { %v479_v20 = vpop.f32.mrf.mxu0 }
  0xb4   : > { %v493_v15 = vpop.f32.mrf.mxu1  ;;  %v480_v23 = vadd.f32 %v479_v20, %v334_v18 }
  0xb5   : > { %v494_v17 = vadd.f32 %v493_v15, %v335_v14 }
  0xb6   : > { %v517_v25 = vpack.c.bf16 %v480_v23, %v478_v22 }
  0xb7   : > { %v1579_v19 = vpack.c.bf16 %v494_v17, %v492_v16  ;;  %v505_v24 = vpop.f32.mrf.mxu2 }
  0xb8   : > { %v506_v27 = vadd.f32 %v505_v24, %v336_v26 }
  0xb9   : > { %590 = vrot.lane.b32.xlu2 %v1579_v19, %s1356_s8  ;;  %v525_v21 = vsel %vm520_vm0, %v1579_v19, 0 }
  0xba   : > { %534 = vmatpush.bf16.xpose.msra.mxu3 %v525_v21 }
  0xbf   : > { %v507_v28 = vpop.f32.mrf.mxu2 }
  0xc0   : > { %v508_v29 = vadd.f32 %v507_v28, %v336_v26 }
  0xc1   : > { %587 = vrot.lane.b32.xlu2 %v517_v25, %s1356_s8  ;;  %1154 = vmatmul.msk.bf16.vlgmr.msra.gmra.mxu3 %vm520_vm0, %v517_v25 }
  0xc2   : > { %v1587_v30 = vpack.c.bf16 %v508_v29, %v506_v27 }
  0xc4   : > { %579 = vmatpush.bf16.msrb.mxu3 %v1587_v30 }
  0xc9   : > { %660 = vrot.lane.b32.xlu2 %v517_v25, %s1357_s9 }
  0xd1   : > { %731 = vrot.lane.b32.xlu2 %v517_v25, %s1358_s10 }
 0x113   : > { %v591_v31 = vpop.permute.xlu2 %590 }
 0x114   : > { %v596_v32 = vsel %vm520_vm0, %v591_v31, 0 }
 0x115   : > { %605 = vmatpush.bf16.xpose.msra.mxu3 %v596_v32 }
 0x11b   : > { %v588_v55 = vpop.permute.xlu2 %587 }
 0x123   : > { %v661_v58 = vpop.permute.xlu2 %660 }
 0x12b   : > { %v732_v10 = vpop.permute.xlu2 %731 }
 0x144   : > { %v536_v36 = vpop.f32.mrf.mxu3 }
 0x145   : > { %v541_v37 = vmul.f32 0.17677669, %v536_v36 }
 0x147   : > { %v543_v38 = vsel %vm515_vm1, %v541_v37, -1e+09 }
 0x148   : > { %v546_v39 = vsel %vm545_vm2, %v543_v38, -inf }
 0x149   : > { %547 = vmax.xlane.f32.xlu0 %v546_v39 }
 0x14c   : > { %v538_v41 = vpop.f32.mrf.mxu3 }
 0x14d   : > { %v542_v42 = vmul.f32 0.17677669, %v538_v41 }
 0x14f   : > { %v544_v43 = vsel %vm516_vm3, %v542_v42, -1e+09 }
 0x150   : > { %v549_v44 = vsel %vm545_vm2, %v544_v43, -inf }
 0x151   : > { %550 = vmax.xlane.f32.xlu0 %v549_v44 }
 0x165   : > { %662 = vrot.lane.b32.xlu0 %v1579_v19, %s1357_s9 }
 0x1bc   : > { %v548_v45 = vpop.xlane.xlu0 %547 }
 0x1bd   : > { %v552_v46 = vsub.f32 %v543_v38, %v548_v45 }
 0x1bf   : > { %v554_v47 = vmul.f32 1.442695, %v552_v46 }
 0x1c1   : > { %1273 = vpow2.f32 %v554_v47 }
 0x1c4   : > { %v551_v48 = vpop.xlane.xlu0 %550 }
 0x1c5   : > { %v553_v49 = vsub.f32 %v544_v43, %v551_v48 }
 0x1c7   : > { %v1274_v50 = vpop.eup %1273  ;;  %v556_v51 = vmul.f32 1.442695, %v553_v49 }
 0x1c8   : > { %v558_v52 = vsel %vm545_vm2, %v1274_v50, 0.0 }
 0x1c9   : > { %1275 = vpow2.f32 %v556_v51  ;;  %559 = vadd.xlane.f32.xlu1 %v558_v52 }
 0x1cf   : > { %v1276_v53 = vpop.eup %1275 }
 0x1d0   : > { %v561_v54 = vsel %vm545_vm2, %v1276_v53, 0.0 }
 0x1d1   : > { %562 = vadd.xlane.f32.xlu1 %v561_v54 }
 0x1d7   : > { %v663_v56 = vpop.permute.xlu0 %662 }
 0x1d8   : > { %v668_v57 = vsel %vm520_vm0, %v663_v56, 0 }
 0x1d9   : > { %677 = vmatpush.bf16.xpose.msrb.mxu2 %v668_v57 }
 0x1e0   : > { %1158 = vmatmul.msk.bf16.vlgmr.msrb.gmra.mxu2 %vm520_vm0, %v661_v58 }
 0x1ea   : > { %733 = vrot.lane.b32.xlu1 %v1579_v19, %s1358_s10 }
 0x23c   : > { %v560_v59 = vpop.xlane.xlu1 %559 }
 0x23d   : > { %1277 = vrcp.f32 %v560_v59 }
 0x243   : > { %v1278_v62 = vpop.eup %1277 }
 0x244   : > { %v563_v61 = vpop.xlane.xlu1 %562  ;;  %v566_v1 = vmul.f32 %v1278_v62, %v1274_v50 }
 0x245   : > { %1279 = vrcp.f32 %v563_v61 }
 0x24b   : > { %v1280_v0 = vpop.eup %1279 }
 0x24c   : > { %v567_v2 = vmul.f32 %v1280_v0, %v1276_v53 }
 0x24e   : > { %v568_v3 = vpack.c.bf16 %v567_v2, %v566_v1 }
 0x250   : > { %1155 = vmatmul.msk.bf16.vlgmr.msrb.gmra.mxu3 %vm545_vm2, %v568_v3 }
 0x25c   : > { %v734_v4 = vpop.permute.xlu1 %733 }
 0x25d   : > { %v739_v5 = vsel %vm520_vm0, %v734_v4, 0 }
 0x25e   : > { %748 = vmatpush.bf16.xpose.msrb.mxu3 %v739_v5 }
 0x260   : > { %1156 = vmatmul.msk.bf16.vlgmr.msra.gmra.mxu3 %vm520_vm0, %v588_v55 }
 0x263   : > { %v679_v6 = vpop.f32.mrf.mxu2 }
 0x264   : > { %v684_v7 = vmul.f32 0.17677669, %v679_v6 }
 0x266   : > { %v686_v8 = vsel %vm515_vm1, %v684_v7, -1e+09 }
 0x267   : > { %v688_v9 = vsel %vm545_vm2, %v686_v8, -inf }
 0x268   : > { %689 = vmax.xlane.f32.xlu1 %v688_v9 }
 0x26b   : > { %v681_v18 = vpop.f32.mrf.mxu2 }
 0x26c   : > { %v685_v23 = vmul.f32 0.17677669, %v681_v18 }
 0x26e   : > { %v687_v26 = vsel %vm516_vm3, %v685_v23, -1e+09 }
 0x26f   : > { %v691_v29 = vsel %vm545_vm2, %v687_v26, -inf }
 0x270   : > { %1160 = vmatmul.msk.bf16.vlgmr.msrb.gmra.mxu3 %vm520_vm0, %v732_v10 }
 0x2d3   : > { %v1628_v11 = vpop.f32.mrf.mxu3 }
 0x2db   : > { %v1630_v12 = vpop.f32.mrf.mxu3  ;;  %v690_v13 = vpop.xlane.xlu1 %689 }
 0x2dc   : > { %v694_v14 = vsub.f32 %v686_v8, %v690_v13 }
 0x2de   : > { %v696_v15 = vmul.f32 1.442695, %v694_v14 }
 0x2e0   : > { %1281 = vpow2.f32 %v696_v15 }
 0x2e3   : > { %v607_v16 = vpop.f32.mrf.mxu3 }
 0x2e4   : > { %v612_v17 = vmul.f32 0.17677669, %v607_v16 }
 0x2e6   : > { %v1632_v19 = vpop.eup %1281  ;;  %v614_v20 = vsel %vm515_vm1, %v612_v17, -1e+09 }
 0x2e7   : > { %v616_v21 = vsel %vm545_vm2, %v614_v20, -inf  ;;  %v700_v22 = vsel %vm545_vm2, %v1632_v19, 0.0 }
 0x2e8   : > { %617 = vmax.xlane.f32.xlu2 %v616_v21  ;;  %701 = vadd.xlane.f32.xlu1 %v700_v22 }
 0x2eb   : > { %v609_v24 = vpop.f32.mrf.mxu3 }
 0x2ec   : > { %v613_v25 = vmul.f32 0.17677669, %v609_v24 }
 0x2ee   : > { %v615_v27 = vsel %vm516_vm3, %v613_v25, -1e+09 }
 0x2ef   : > { %v619_v28 = vsel %vm545_vm2, %v615_v27, -inf }
 0x2f0   : > { %620 = vmax.xlane.f32.xlu0 %v619_v28  ;;  %692 = vmax.xlane.f32.xlu2 %v691_v29  ;;  %v1229_v29 = vld [vmem:[#allocation2 + $0x38] sm:$0xff] }
 0x2f1   : > { %903 = vmatpush.bf16.msrb.mxu1 %v1229_v29 }
 0x2f3   : > { %v750_v31 = vpop.f32.mrf.mxu3 }
 0x2f4   : > { %v755_v32 = vmul.f32 0.17677669, %v750_v31  ;;  %v1228_v31 = vld [vmem:[#allocation2 + $0x30] sm:$0xff] }
 0x2f5   : > { %904 = vmatpush.bf16.msrb.mxu1 %v1228_v31 }
 0x2f6   : > { %v757_v33 = vsel %vm515_vm1, %v755_v32, -1e+09 }
 0x2f7   : > { %v759_v36 = vsel %vm545_vm2, %v757_v33, -inf }
 0x2f8   : > { %760 = vmax.xlane.f32.xlu0 %v759_v36 }
 0x2fb   : > { %v752_v37 = vpop.f32.mrf.mxu3 }
 0x2fc   : > { %v756_v38 = vmul.f32 0.17677669, %v752_v37 }
 0x2fe   : > { %v758_v39 = vsel %vm516_vm3, %v756_v38, -1e+09 }
 0x2ff   : > { %v762_v41 = vsel %vm545_vm2, %v758_v39, -inf }
 0x300   : > { %763 = vmax.xlane.f32.xlu2 %v762_v41 }
 0x318   : > { %640 = vrot.lane.b32.xlu2 %v1587_v30, %s1356_s8 }
 0x35b   : > { %v618_v42 = vpop.xlane.xlu2 %617  ;;  %v702_v3 = vpop.xlane.xlu1 %701 }
 0x35c   : > { %v622_v43 = vsub.f32 %v614_v20, %v618_v42 }
 0x35e   : > { %v624_v44 = vmul.f32 1.442695, %v622_v43  ;;  %v1226_v43 = vld [vmem:[#allocation2 + $0x20] sm:$0xff] }
 0x360   : > { %1283 = vpow2.f32 %v624_v44  ;;  %v1225_v44 = vld [vmem:[#allocation2 + $0x18] sm:$0xff] }
 0x363   : > { %v693_v34 = vpop.xlane.xlu2 %692  ;;  %v621_v45 = vpop.xlane.xlu0 %620 }
 0x364   : > { %v695_v46 = vsub.f32 %v687_v26, %v693_v34  ;;  %v623_v49 = vsub.f32 %v615_v27, %v621_v45  ;;  %v1224_v34 = vld [vmem:[#allocation2 + $0x10] sm:$0xff]  ;;  %v1223_v45 = vld [vmem:[#allocation2 + $0x8] sm:$0xff] }
 0x366   : > { %v1284_v47 = vpop.eup %1283  ;;  %v698_v48 = vmul.f32 1.442695, %v695_v46  ;;  %v626_v35 = vmul.f32 1.442695, %v623_v49  ;;  %v1222_v46 = vld [vmem:[#allocation2] sm:$0xff] }
 0x367   : > { %v628_v50 = vsel %vm545_vm2, %v1284_v47, 0.0 }
 0x368   : > { %1285 = vpow2.f32 %v698_v48  ;;  %629 = vadd.xlane.f32.xlu1 %v628_v50 }
 0x369   : > { %1287 = vpow2.f32 %v626_v35 }
 0x36b   : > { %v761_v40 = vpop.xlane.xlu0 %760 }
 0x36c   : > { %v765_v51 = vsub.f32 %v757_v33, %v761_v40  ;;  %v1227_v33 = vld [vmem:[#allocation2 + $0x28] sm:$0xff] }
 0x36d   : > { %905 = vmatpush.bf16.msrb.mxu1 %v1227_v33 }
 0x36e   : > { %v1286_v52 = vpop.eup %1285  ;;  %v767_v53 = vmul.f32 1.442695, %v765_v51 }
 0x36f   : > { %v703_v54 = vsel %vm545_vm2, %v1286_v52, 0.0  ;;  %v1288_v56 = vpop.eup %1287 }
 0x370   : > { %1289 = vpow2.f32 %v767_v53  ;;  %704 = vadd.xlane.f32.xlu0 %v703_v54  ;;  %v631_v61 = vsel %vm545_vm2, %v1288_v56, 0.0 }
 0x371   : > { %906 = vmatpush.bf16.msrb.mxu1 %v1226_v43 }
 0x373   : > { %v764_v55 = vpop.xlane.xlu2 %763 }
 0x374   : > { %v766_v57 = vsub.f32 %v758_v39, %v764_v55 }
 0x375   : > { %907 = vmatpush.bf16.msrb.mxu1 %v1225_v44 }
 0x376   : > { %v1290_v58 = vpop.eup %1289  ;;  %v769_v59 = vmul.f32 1.442695, %v766_v57 }
 0x377   : > { %v771_v62 = vsel %vm545_vm2, %v1290_v58, 0.0 }
 0x378   : > { %1291 = vpow2.f32 %v769_v59  ;;  %632 = vadd.xlane.f32.xlu0 %v631_v61  ;;  %772 = vadd.xlane.f32.xlu1 %v771_v62 }
 0x379   : > { %908 = vmatpush.bf16.msrb.mxu1 %v1224_v34 }
 0x37b   : > { %v641_v0 = vpop.permute.xlu2 %640 }
 0x37c   : > { %653 = vmatpush.bf16.msrb.mxu0 %v641_v0 }
 0x37d   : > { %909 = vmatpush.bf16.msrb.mxu1 %v1223_v45 }
 0x37e   : > { %v1292_v1 = vpop.eup %1291 }
 0x37f   : > { %v774_v2 = vsel %vm545_vm2, %v1292_v1, 0.0 }
 0x380   : > { %775 = vadd.xlane.f32.xlu0 %v774_v2 }
 0x381   : > { %910 = vmatpush.bf16.msrb.mxu1 %v1222_v46 }
 0x391   : > { %711 = vrot.lane.b32.xlu1 %v1587_v30, %s1357_s9 }
 0x394   : > { %782 = vrot.lane.b32.xlu0 %v1587_v30, %s1358_s10 }
 0x3db   : > { %v630_v5 = vpop.xlane.xlu1 %629 }
 0x3dc   : > { %1293 = vrcp.f32 %v630_v5 }
 0x3e2   : > { %v1294_v7 = vpop.eup %1293 }
 0x3e3   : > { %v705_v4 = vpop.xlane.xlu0 %704  ;;  %v636_v9 = vmul.f32 %v1294_v7, %v1284_v47 }
 0x3eb   : > { %v633_v6 = vpop.xlane.xlu0 %632  ;;  %v773_v15 = vpop.xlane.xlu1 %772 }
 0x3ec   : > { %1295 = vrcp.f32 %v633_v6 }
 0x3ed   : > { %1297 = vrcp.f32 %v705_v4  ;;  %v1359_v4 = vmov 128.0  }
 0x3ee   : > { %1299 = vrcp.f32 %v702_v3 }
 0x3f2   : > { %v1296_v8 = vpop.eup %1295 }
 0x3f3   : > { %v637_v10 = vmul.f32 %v1296_v8, %v1288_v56  ;;  %v776_v14 = vpop.xlane.xlu0 %775  ;;  %v1298_v30 = vpop.eup %1297 }
 0x3f4   : > { %1301 = vrcp.f32 %v776_v14  ;;  %v1300_v16 = vpop.eup %1299  ;;  %v709_v18 = vmul.f32 %v1298_v30, %v1286_v52 }
 0x3f5   : > { %v638_v13 = vpack.c.bf16 %v637_v10, %v636_v9  ;;  %1303 = vrcp.f32 %v773_v15  ;;  %v708_v21 = vmul.f32 %v1300_v16, %v1632_v19 }
 0x3f6   : > { %1305 = vrcp.f32 %v1359_v4 }
 0x3f7   : > { %1157 = vmatmul.msk.bf16.vlgmr.msrb.gmra.mxu0 %vm545_vm2, %v638_v13  ;;  %v710_v24 = vpack.c.bf16 %v709_v18, %v708_v21 }
 0x3fa   : > { %v1302_v17 = vpop.eup %1301 }
 0x3fb   : > { %v1304_v20 = vpop.eup %1303  ;;  %v780_v23 = vmul.f32 %v1302_v17, %v1292_v1 }
 0x3fc   : > { %v779_v25 = vmul.f32 %v1304_v20, %v1290_v58  ;;  %v1306_v5 = vpop.eup %1305 }
 0x3fd   : > { %v926_v6 = vmul.f32 128.0, %v1306_v5  ;;  %vm930_vm6 = vweird.f32 %v1306_v5 }
 0x3fe   : > { %v781_v27 = vpack.c.bf16 %v780_v23, %v779_v25 }
 0x3ff   : > { %v927_v7 = vsub.f32 1.0, %v926_v6 }
 0x401   : > { %v928_v8 = vmul.f32 %v1306_v5, %v927_v7 }
 0x403   : > { %v712_v22 = vpop.permute.xlu1 %711  ;;  %v929_v9 = vadd.f32 %v1306_v5, %v928_v8 }
 0x404   : > { %724 = vmatpush.bf16.msra.mxu2 %v712_v22 }
 0x405   : > { %v931_v10 = vsel %vm930_vm6, %v1306_v5, %v929_v9 }
 0x406   : > { %v783_v26 = vpop.permute.xlu0 %782 }
 0x407   : > { %1159 = vmatmul.msk.bf16.vlgmr.msra.gmra.mxu2 %vm545_vm2, %v710_v24  ;;  %795 = vmatpush.bf16.msra.mxu0 %v783_v26 }
 0x40a   : > { %1161 = vmatmul.msk.bf16.vlgmr.msra.gmra.mxu0 %vm545_vm2, %v781_v27 }
 0x474   : > { %v655_v28 = vpop.f32.mrf.mxu0 }
 0x47c   : > { %v657_v19 = vpop.f32.mrf.mxu0 }
 0x47d   : > { %v1260_v39 = vpack.i.bf16 %v657_v19, %v655_v28  ;;  %v1271_v19 = vld [vmem:[%s1702_s5] ss:$0 sm:$0xff] }
 0x487   : > { %v797_v38 = vpop.f32.mrf.mxu0 }
 0x48a   : > { %v726_v32 = vpop.f32.mrf.mxu2 }
 0x48f   : > { %v799_v41 = vpop.f32.mrf.mxu0 }
 0x490   : > { %v1265_v42 = vpack.i.bf16 %v799_v41, %v797_v38  ;;  %v1272_v38 = vld [vmem:[%s1703_s6] ss:$0 sm:$0xff] }
 0x492   : > { %v728_v36 = vpop.f32.mrf.mxu2 }
 0x493   : > { %v1255_v37 = vpack.i.bf16 %v728_v36, %v726_v32 }
 0x495   : > { %1256 = vrot.lane.b32.xlu2 %v1255_v37, %s1357_s9 }
 0x49d   : > { %1261 = vrot.lane.b32.xlu2 %v1260_v39, %s1358_s10 }
 0x4a5   : > { %1266 = vrot.lane.b32.xlu2 %v1265_v42, %s1356_s8 }
 0x4ef   : > { %v1257_v47 = vpop.permute.xlu2 %1256 }
 0x4f0   : > { %v1259_v51 = vunpack.i.h.bf16 %v1257_v47  ;;  %v1258_v52 = vunpack.i.l.bf16 %v1257_v47 }
 0x4f7   : > { %v1262_v48 = vpop.permute.xlu2 %1261 }
 0x4f8   : > { %v1264_v49 = vunpack.i.h.bf16 %v1262_v48  ;;  %v1263_v50 = vunpack.i.l.bf16 %v1262_v48 }
 0x4fa   : > { %v827_v35 = vsel %vm520_vm0, %v1630_v12, %v1264_v49  ;;  %v826_v40 = vsel %vm520_vm0, %v1628_v11, %v1263_v50  ;;  %v1270_v12 = vld [vmem:[%s1701_s4] ss:$0 sm:$0xff] }
 0x4fb   : > { %v829_v56 = vsel %vm828_vm4, %v826_v40, %v1258_v52  ;;  %v830_v57 = vsel %vm828_vm4, %v827_v35, %v1259_v51 }
 0x4ff   : > { %v1267_v53 = vpop.permute.xlu2 %1266 }
 0x500   : > { %v1269_v54 = vunpack.i.h.bf16 %v1267_v53  ;;  %v1268_v55 = vunpack.i.l.bf16 %v1267_v53 }
 0x502   : > { %v832_v58 = vsel %vm831_vm5, %v829_v56, %v1268_v55  ;;  %v833_v59 = vsel %vm831_vm5, %v830_v57, %v1269_v54 }
 0x503   : > { %v834_v61 = vpack.c.bf16 %v833_v59, %v832_v58 }
 0x505   : > { %911 = vmatmul.bf16.vlgmr.msrb.gmra.mxu1 %v834_v61 }
 0x582   : > { %v912_v62 = vpop.f32.mrf.mxu1 }
 0x583   : > { %v913_v0 = vadd.f32 %v1270_v12, %v912_v62 }
 0x585   : > { %v917_v11 = vadd.f32 %v913_v0, %v1552_v60 }
 0x587   : > { %921 = vadd.xlane.f32.xlu0 %v917_v11 }
 0x58a   : > { %v914_v1 = vpop.f32.mrf.mxu1 }
 0x58b   : > { %v915_v2 = vadd.f32 %v1270_v12, %v914_v1 }
 0x58d   : > { %v918_v3 = vadd.f32 %v915_v2, %v1554_v63 }
 0x58f   : > { %923 = vadd.xlane.f32.xlu1 %v918_v3 }
 0x5fa   : > { %v922_v13 = vpop.xlane.xlu0 %921 }
 0x5fb   : > { %v932_v14 = vmul.f32 %v931_v10, %v922_v13 }
 0x5fd   : > { %v934_v15 = vsub.f32 %v917_v11, %v932_v14 }
 0x5ff   : > { %v936_v30 = vmul.f32 %v934_v15, %v934_v15 }
 0x601   : > { %938 = vadd.xlane.f32.xlu2 %v936_v30 }
 0x602   : > { %v924_v60 = vpop.xlane.xlu1 %923 }
 0x603   : > { %v933_v16 = vmul.f32 %v931_v10, %v924_v60 }
 0x605   : > { %v935_v17 = vsub.f32 %v918_v3, %v933_v16 }
 0x607   : > { %v937_v18 = vmul.f32 %v935_v17, %v935_v17 }
 0x609   : > { %940 = vadd.xlane.f32.xlu0 %v937_v18 }
 0x674   : > { %v939_v63 = vpop.xlane.xlu2 %938 }
 0x675   : > { %v942_v20 = vmul.f32 %v939_v63, %v931_v10 }
 0x677   : > { %v944_v21 = vadd.f32 1e-05, %v942_v20 }
 0x679   : > { %1307 = vrsqrt.f32 %v944_v21  ;;  %vm952_vm8 = vweird.f32 %v944_v21 }
 0x67c   : > { %v941_v22 = vpop.xlane.xlu0 %940 }
 0x67d   : > { %v943_v23 = vmul.f32 %v941_v22, %v931_v10 }
 0x67f   : > { %v1308_v24 = vpop.eup %1307  ;;  %v945_v25 = vadd.f32 1e-05, %v943_v23 }
 0x680   : > { %v947_v26 = vmul.f32 %v1308_v24, %v944_v21  ;;  %vm953_vm7 = vweird.f32 %v1308_v24 }
 0x681   : > { %1309 = vrsqrt.f32 %v945_v25  ;;  %vm954_vm9 = vmor %vm952_vm8, %vm953_vm7  ;;  %vm962_vm11 = vweird.f32 %v945_v25 }
 0x682   : > { %v948_v27 = vmul.f32 %v1308_v24, %v947_v26 }
 0x684   : > { %v949_v28 = vmul.f32 0.5, %v948_v27 }
 0x686   : > { %v950_v29 = vsub.f32 1.5, %v949_v28 }
 0x687   : > { %v1310_v31 = vpop.eup %1309 }
 0x688   : > { %v951_v32 = vmul.f32 %v1308_v24, %v950_v29  ;;  %v957_v33 = vmul.f32 %v1310_v31, %v945_v25  ;;  %vm963_vm10 = vweird.f32 %v1310_v31 }
 0x689   : > { %vm964_vm12 = vmor %vm962_vm11, %vm963_vm10 }
 0x68a   : > { %v955_v36 = vsel %vm954_vm9, %v1308_v24, %v951_v32  ;;  %v958_v37 = vmul.f32 %v1310_v31, %v957_v33 }
 0x68b   : > { %v966_v39 = vmul.f32 %v955_v36, %v934_v15 }
 0x68c   : > { %v959_v41 = vmul.f32 0.5, %v958_v37 }
 0x68d   : > { %v971_v42 = vmul.f32 %v1271_v19, %v966_v39 }
 0x68e   : > { %v960_v43 = vsub.f32 1.5, %v959_v41 }
 0x68f   : > { %v976_v44 = vadd.f32 %v1272_v38, %v971_v42 }
 0x690   : > { %v961_v34 = vmul.f32 %v1310_v31, %v960_v43 }
 0x691   : > { %978 = vst [vmem:[%s295_s20] sm:$0xff] %v976_v44 }
 0x692   : > { %v965_v45 = vsel %vm964_vm12, %v1310_v31, %v961_v34 }
 0x693   : > { %v967_v46 = vmul.f32 %v965_v45, %v935_v17 }
 0x695   : > { %v972_v47 = vmul.f32 %v1271_v19, %v967_v46 }
 0x697   : > { %v977_v48 = vadd.f32 %v1272_v38, %v972_v47 }
 0x699   : > { %979 = vst [vmem:[%s295_s20 + $0x8] sm:$0xff] %v977_v48 }
 0x69a PF: > { %s18_s24 = sadd.s32 1, %s1351_s24  }
 0x69b   : > { %p15_p7 = scmp.ge.s32.totalorder %s18_s24, 4  }
 0x69d   :  { %17 = sbr.rel (!%p15_p7) target bundleno = 1 (0x1), region = 83 }
 0x6a2   :  { %1001 = vsyncpa [#allocation3], 1 }
 0x6a3   :  { %1003 = vsyncpa [#allocation3 + $0x1], 1 }

// kernel: gpt2_forward.7
= control target key start
LH: loop header
LB: loop body
LE: loop exit
PB: predicated region body
PF: predicated region fallthrough
CT: control target
= control target key end

     0   :  { %12 = vsyncpa [#allocation3], 0  ;;  %s1652_s0 = inlined_call_operand.vmem [shape: f32[2,16,128], index: 0, kind: input, shape index: {}]   ;;  %s1653_s1 = inlined_call_operand.hbm [shape: bf16[128,384], index: 1, kind: input, shape index: {}]   ;;  %s1654_s2 = inlined_call_operand.vmem [shape: f32[1,384], index: 2, kind: input, shape index: {}]   ;;  %s1655_s3 = inlined_call_operand.hbm [shape: bf16[128,128], index: 3, kind: input, shape index: {}]   ;;  %s1656_s4 = inlined_call_operand.vmem [shape: f32[1,128], index: 4, kind: input, shape index: {}]   ;;  %s1657_s5 = inlined_call_operand.vmem [shape: f32[1,128], index: 5, kind: input, shape index: {}]   ;;  %s1658_s6 = inlined_call_operand.vmem [shape: f32[1,128], index: 6, kind: input, shape index: {}]   ;;  %s1659_s7 = inlined_call_operand.vmem [shape: f32[2,16,128], index: 7, kind: output, shape index: {}]  }
   0x1   :  { %13 = vsyncpa [#allocation5], 0  ;;  %s1478_s24 = smov 0  }
   0x2 LB: > { %s213_s27 = sshll.u32 %s1653_s1, 4  ;;  %s1487_s28 = sadd.s32 4294967295, %s1426_s24   ;;  %s1426_s24 = sphi %s1478_s24, %s19_s24   ;;  %s214_s27 = int_to_ptr.hbm [resolvable:$true] %s213_s27 }
   0x3   : > { %p1076_p0 = scmp.ge.s32.totalorder %s1426_s24, 1  ;;  %p202_p1 = scmp.lt.s32.totalorder %s1426_s24, 3 }
   0x4   : > { %p1274_p2 = scmp.eq.s32.totalorder %s1487_s28, 0  ;;  %s1428_s30 = smov [#allocation2]  }
   0x5   : > { %p1492_p3 = pnand %p1076_p0, %p202_p1  ;;  %s215_s8 = sshll.u32 %s1428_s30, 4  ;;  %s216_s8 = int_to_ptr.vmem [resolvable:$true] %s215_s8 }
   0x6   : > { %s230_s11 = sshll.u32 %s1655_s3, 4  ;;  %s1429_s12 = smov [#allocation4]   ;;  %s231_s11 = int_to_ptr.hbm [resolvable:$true] %s230_s11 }
   0x7   : > { %p1267_p4 = pneg %p1492_p3  ;;  %s232_s13 = sshll.u32 %s1429_s12, 4  ;;  %s233_s13 = int_to_ptr.vmem [resolvable:$true] %s232_s13 }
   0x8   : > { %s1430_s14 = smov 192   ;;  %s1431_s15 = smov 12  }
   0x9   : > { %p1268_p5 = pnand %p1274_p2, %p1267_p4  ;;  %s1432_s16 = smov 64  }
   0xa   : > { %s1433_s17 = smov 4   ;;  %265 = sbr.rel (%p1492_p3) target bundleno = 1696 (0x6a0), region = 48 }
   0xb   : > { %1270 = dma.hbm_to_vmem [thread:$0]  (!%p1268_p5), %s214_s27, 3072, %s216_s8, [#allocation3], %s1430_s14, %s1430_s14, %s1431_s15  }
   0xc   : > { %1273 = dma.hbm_to_vmem [thread:$0]  (!%p1268_p5), %s231_s11, 1024, %s233_s13, [#allocation5], %s1432_s16, %s1432_s16, %s1433_s17  }
   0xf   : > { %1417 = dma.done.wait (%p1274_p2), [#allocation3], 3072  }
  0x10   : > { %1419 = vsyncadd (%p1274_p2), [#allocation3], 4294964224 }
  0x11   : > { %1421 = dma.done.wait (%p1274_p2), [#allocation5], 1024  }
  0x12   : > { %1423 = vsyncadd (%p1274_p2), [#allocation5], 4294966272  ;;  %v1173_v0 = vld [vmem:[#allocation2 + $0xa8] sm:$0xf]  ;;  %v1249_v1 = vld [vmem:[#allocation2 + $0xb0] sm:$0xf0] }
  0x13   : > { %v1248_v2 = vld [vmem:[#allocation2 + $0xac] sm:$0xf]  ;;  %v1174_v3 = vor.u32 %v1249_v1, %v1173_v0  ;;  %v1175_v4 = vld [vmem:[#allocation2 + $0xb4] sm:$0xf0]  ;;  %v1161_v5 = vld [vmem:[#allocation2 + $0x90] sm:$0xf] }
  0x14   : > { %v1246_v6 = vld [vmem:[#allocation2 + $0x98] sm:$0xf0]  ;;  %v1178_v7 = vor.u32 %v1248_v2, %v1175_v4  ;;  %v1245_v8 = vld [vmem:[#allocation2 + $0x94] sm:$0xf]  ;;  %v1163_v9 = vld [vmem:[#allocation2 + $0x9c] sm:$0xf0] }
  0x15   : > { %485 = vmatpush.bf16.msra.mxu0 %v1174_v3  ;;  %v1162_v10 = vor.u32 %v1246_v6, %v1161_v5  ;;  %v1166_v11 = vor.u32 %v1245_v8, %v1163_v9  ;;  %v1149_v12 = vld [vmem:[#allocation2 + $0x78] sm:$0xf]  ;;  %v1243_v13 = vld [vmem:[#allocation2 + $0x80] sm:$0xf0]  ;;  %v1242_v14 = vld [vmem:[#allocation2 + $0x7c] sm:$0xf] }
  0x16   : > { %499 = vmatpush.bf16.msra.mxu1 %v1178_v7  ;;  %v1151_v15 = vld [vmem:[#allocation2 + $0x84] sm:$0xf0]  ;;  %v1150_v16 = vor.u32 %v1243_v13, %v1149_v12  ;;  %v1137_v18 = vld [vmem:[#allocation2 + $0x60] sm:$0xf]  ;;  %v1240_v19 = vld [vmem:[#allocation2 + $0x68] sm:$0xf0] }
  0x17   : > { %v1154_v17 = vor.u32 %v1242_v14, %v1151_v15  ;;  %v1239_v20 = vld [vmem:[#allocation2 + $0x64] sm:$0xf]  ;;  %v1139_v21 = vld [vmem:[#allocation2 + $0x6c] sm:$0xf0]  ;;  %p303_p6 = scmp.lt.s32.totalorder %s1487_s28, 1  ;;  %v1138_v22 = vor.u32 %v1240_v19, %v1137_v18  ;;  %vm537_vm0 = vcmask 261120  }
  0x18   : > { %v1125_v23 = vld [vmem:[#allocation2 + $0x48] sm:$0xf]  ;;  %v1181_v24 = vld [vmem:[#allocation2 + $0xb0] sm:$0xf]  ;;  %v1250_v25 = vld [vmem:[#allocation2 + $0xb8] sm:$0xf0]  ;;  %v1142_v26 = vor.u32 %v1239_v20, %v1139_v21 }
  0x19   : > { %486 = vmatpush.bf16.msra.mxu0 %v1162_v10  ;;  %v1237_v27 = vld [vmem:[#allocation2 + $0x50] sm:$0xf0]  ;;  %v1182_v28 = vor.u32 %v1250_v25, %v1181_v24  ;;  %v1169_v29 = vld [vmem:[#allocation2 + $0x98] sm:$0xf]  ;;  %v1247_v30 = vld [vmem:[#allocation2 + $0xa0] sm:$0xf0] }
  0x1a   : > { %500 = vmatpush.bf16.msra.mxu1 %v1166_v11  ;;  %v1236_v31 = vld [vmem:[#allocation2 + $0x4c] sm:$0xf]  ;;  %v1127_v32 = vld [vmem:[#allocation2 + $0x54] sm:$0xf0]  ;;  %v1170_v33 = vor.u32 %v1247_v30, %v1169_v29  ;;  %v1126_v34 = vor.u32 %v1237_v27, %v1125_v23  ;;  %s1662_s28 = smov (!%p303_p6, %s1487_s28), 1  ;;  %s1434_s25 = smov 96  }
  0x1b   : > { %513 = vmatpush.bf16.msra.mxu2 %v1182_v28  ;;  %v1157_v35 = vld [vmem:[#allocation2 + $0x80] sm:$0xf]  ;;  %v1244_v36 = vld [vmem:[#allocation2 + $0x88] sm:$0xf0]  ;;  %v1130_v37 = vor.u32 %v1236_v31, %v1127_v32  ;;  %v1113_v38 = vld [vmem:[#allocation2 + $0x30] sm:$0xf] }
  0x1c   : > { %v1234_v39 = vld [vmem:[#allocation2 + $0x38] sm:$0xf0]  ;;  %v1233_v40 = vld [vmem:[#allocation2 + $0x34] sm:$0xf]  ;;  %v1115_v41 = vld [vmem:[#allocation2 + $0x3c] sm:$0xf0]  ;;  %v1158_v42 = vor.u32 %v1244_v36, %v1157_v35 }
  0x1d   : > { %487 = vmatpush.bf16.msra.mxu0 %v1150_v16  ;;  %v1114_v43 = vor.u32 %v1234_v39, %v1113_v38  ;;  %v1145_v44 = vld [vmem:[#allocation2 + $0x68] sm:$0xf]  ;;  %v1241_v45 = vld [vmem:[#allocation2 + $0x70] sm:$0xf0]  ;;  %v1118_v46 = vor.u32 %v1233_v40, %v1115_v41  ;;  %v1101_v47 = vld [vmem:[#allocation2 + $0x18] sm:$0xf] }
  0x1e   : > { %501 = vmatpush.bf16.msra.mxu1 %v1154_v17  ;;  %v1231_v48 = vld [vmem:[#allocation2 + $0x20] sm:$0xf0]  ;;  %s1225_s18 = sshll.u32 %s1662_s28, 4  ;;  %v1230_v49 = vld [vmem:[#allocation2 + $0x1c] sm:$0xf]  ;;  %v1146_v51 = vor.u32 %v1241_v45, %v1145_v44  ;;  %s1435_s26 = smov 64  }
  0x1f   : > { %514 = vmatpush.bf16.msra.mxu2 %v1170_v33  ;;  %v1103_v50 = vld [vmem:[#allocation2 + $0x24] sm:$0xf0]  ;;  %v1102_v52 = vor.u32 %v1231_v48, %v1101_v47  ;;  %s307_s21 = scalar_lea.vmem %s1652_s0, %s1225_s18  ;;  %v1133_v53 = vld [vmem:[#allocation2 + $0x50] sm:$0xf]  ;;  %v1238_v54 = vld [vmem:[#allocation2 + $0x58] sm:$0xf0]  ;;  %v527_v33 = vlaneseq  ;;  %s312_s14 = scalar_lea.vmem %s1659_s7, %s1225_s18 }
  0x20   : > { %v1106_v55 = vor.u32 %v1230_v49, %v1103_v50  ;;  %v1089_v56 = vld [vmem:[#allocation2] sm:$0xf]  ;;  %v1228_v57 = vld [vmem:[#allocation2 + $0x8] sm:$0xf0]  ;;  %v1227_v58 = vld [vmem:[#allocation2 + $0x4] sm:$0xf]  ;;  %v1134_v61 = vor.u32 %v1238_v54, %v1133_v53 }
  0x21   : > { %488 = vmatpush.bf16.msra.mxu0 %v1138_v22  ;;  %v1091_v59 = vld [vmem:[#allocation2 + $0xc] sm:$0xf0]  ;;  %v1525_v60 = vld [vmem:[%s307_s21] sm:$0xff]  ;;  %v1090_v62 = vor.u32 %v1228_v57, %v1089_v56  ;;  %v1527_v63 = vld [vmem:[%s307_s21 + $0x8] sm:$0xff]  ;;  %s1436_s27 = smov 32   ;;  %v1550_v35 = vand.u32 127, %v527_v33 }
  0x22   : > { %502 = vmatpush.bf16.msra.mxu1 %v1142_v26  ;;  %v1121_v0 = vld [vmem:[#allocation2 + $0x38] sm:$0xf]  ;;  %v1235_v1 = vld [vmem:[#allocation2 + $0x40] sm:$0xf0]  ;;  %v1094_v2 = vor.u32 %v1227_v58, %v1091_v59  ;;  %v316_v3 = vpack.c.bf16 %v1527_v63, %v1525_v60  ;;  %v1109_v5 = vld [vmem:[#allocation2 + $0x20] sm:$0xf] }
  0x23   : > { %515 = vmatpush.bf16.msra.mxu2 %v1158_v42  ;;  %v1122_v4 = vor.u32 %v1235_v1, %v1121_v0  ;;  %v1232_v6 = vld [vmem:[#allocation2 + $0x28] sm:$0xf0]  ;;  %v1097_v8 = vld [vmem:[#allocation2 + $0x8] sm:$0xf]  ;;  %v1229_v9 = vld [vmem:[#allocation2 + $0x10] sm:$0xf0] }
  0x24   : > { %v1110_v7 = vor.u32 %v1232_v6, %v1109_v5  ;;  %v1098_v10 = vor.u32 %v1229_v9, %v1097_v8  ;;  %v349_v12 = vld [vmem:[%s1654_s2] sm:$0x7]  ;;  %vm562_vm2 = vcmask 130048   ;;  %vm845_vm4 = vcmask 523264  }
  0x25   : > { %489 = vmatpush.bf16.msra.mxu0 %v1126_v34  ;;  %v352_v14 = vperm.slane %v349_v12, 1  ;;  %v351_v18 = vperm.slane %v349_v12, 0  ;;  %v353_v26 = vperm.slane %v349_v12, 2  ;;  %v1548_v34 = vshrl.u32 %v527_v33, 7 }
  0x26   : > { %503 = vmatpush.bf16.msra.mxu1 %v1130_v37  ;;  %vm848_vm5 = vcmask 785408  }
  0x27   : > { %516 = vmatpush.bf16.msra.mxu2 %v1146_v51  ;;  %vm532_vm1 = vcmp.le.s32.totalorder %v1550_v35, %v1548_v34  ;;  %v1559_v40 = vadd.s32 8, %v1548_v34 }
  0x29   : > { %490 = vmatpush.bf16.msra.mxu0 %v1114_v43  ;;  %vm533_vm3 = vcmp.le.s32.totalorder %v1550_v35, %v1559_v40 }
  0x2a   : > { %504 = vmatpush.bf16.msra.mxu1 %v1118_v46 }
  0x2b   : > { %517 = vmatpush.bf16.msra.mxu2 %v1134_v61 }
  0x2d   : > { %491 = vmatpush.bf16.msra.mxu0 %v1102_v52 }
  0x2e   : > { %505 = vmatpush.bf16.msra.mxu1 %v1106_v55 }
  0x2f   : > { %518 = vmatpush.bf16.msra.mxu2 %v1122_v4 }
  0x31   : > { %492 = vmatpush.bf16.msra.mxu0 %v1090_v62 }
  0x32   : > { %506 = vmatpush.bf16.msra.mxu1 %v1094_v2 }
  0x33   : > { %519 = vmatpush.bf16.msra.mxu2 %v1110_v7 }
  0x34   : > { %493 = vmatmul.bf16.vlgmr.msra.gmra.mxu0 %v316_v3 }
  0x35   : > { %507 = vmatmul.bf16.vlgmr.msra.gmra.mxu1 %v316_v3 }
  0x37   : > { %520 = vmatpush.bf16.msra.mxu2 %v1098_v10 }
  0x3a   : > { %521 = vmatmul.bf16.vlgmr.msra.gmra.mxu2 %v316_v3 }
  0xb1   : > { %v494_v13 = vpop.f32.mrf.mxu0 }
  0xb2   : > { %v508_v11 = vpop.f32.mrf.mxu1  ;;  %v495_v22 = vadd.f32 %v494_v13, %v351_v18 }
  0xb3   : > { %v509_v16 = vadd.f32 %v508_v11, %v352_v14 }
  0xb9   : > { %v496_v20 = vpop.f32.mrf.mxu0 }
  0xba   : > { %v510_v15 = vpop.f32.mrf.mxu1  ;;  %v497_v23 = vadd.f32 %v496_v20, %v351_v18 }
  0xbb   : > { %v511_v17 = vadd.f32 %v510_v15, %v352_v14 }
  0xbc   : > { %v534_v25 = vpack.c.bf16 %v497_v23, %v495_v22 }
  0xbd   : > { %v1534_v19 = vpack.c.bf16 %v511_v17, %v509_v16  ;;  %v522_v24 = vpop.f32.mrf.mxu2 }
  0xbe   : > { %v523_v27 = vadd.f32 %v522_v24, %v353_v26 }
  0xbf   : > { %607 = vrot.lane.b32.xlu2 %v1534_v19, %s1434_s25  ;;  %v542_v21 = vsel %vm537_vm0, %v1534_v19, 0 }
  0xc0   : > { %551 = vmatpush.bf16.xpose.msra.mxu3 %v542_v21 }
  0xc5   : > { %v524_v28 = vpop.f32.mrf.mxu2 }
  0xc6   : > { %v525_v29 = vadd.f32 %v524_v28, %v353_v26 }
  0xc7   : > { %604 = vrot.lane.b32.xlu2 %v534_v25, %s1434_s25  ;;  %1183 = vmatmul.msk.bf16.vlgmr.msra.gmra.mxu3 %vm537_vm0, %v534_v25 }
  0xc8   : > { %v1542_v30 = vpack.c.bf16 %v525_v29, %v523_v27 }
  0xca   : > { %596 = vmatpush.bf16.msrb.mxu3 %v1542_v30 }
  0xcf   : > { %677 = vrot.lane.b32.xlu2 %v534_v25, %s1435_s26 }
  0xd7   : > { %748 = vrot.lane.b32.xlu2 %v534_v25, %s1436_s27 }
 0x119   : > { %v608_v31 = vpop.permute.xlu2 %607 }
 0x11a   : > { %v613_v32 = vsel %vm537_vm0, %v608_v31, 0 }
 0x11b   : > { %622 = vmatpush.bf16.xpose.msra.mxu3 %v613_v32 }
 0x121   : > { %v605_v55 = vpop.permute.xlu2 %604 }
 0x129   : > { %v678_v58 = vpop.permute.xlu2 %677 }
 0x131   : > { %v749_v10 = vpop.permute.xlu2 %748 }
 0x14a   : > { %v553_v36 = vpop.f32.mrf.mxu3 }
 0x14b   : > { %v558_v37 = vmul.f32 0.17677669, %v553_v36 }
 0x14d   : > { %v560_v38 = vsel %vm532_vm1, %v558_v37, -1e+09 }
 0x14e   : > { %v563_v39 = vsel %vm562_vm2, %v560_v38, -inf }
 0x14f   : > { %564 = vmax.xlane.f32.xlu0 %v563_v39 }
 0x152   : > { %v555_v41 = vpop.f32.mrf.mxu3 }
 0x153   : > { %v559_v42 = vmul.f32 0.17677669, %v555_v41 }
 0x155   : > { %v561_v43 = vsel %vm533_vm3, %v559_v42, -1e+09 }
 0x156   : > { %v566_v44 = vsel %vm562_vm2, %v561_v43, -inf }
 0x157   : > { %567 = vmax.xlane.f32.xlu0 %v566_v44 }
 0x16b   : > { %679 = vrot.lane.b32.xlu0 %v1534_v19, %s1435_s26 }
 0x1c2   : > { %v565_v45 = vpop.xlane.xlu0 %564 }
 0x1c3   : > { %v569_v46 = vsub.f32 %v560_v38, %v565_v45 }
 0x1c5   : > { %v571_v47 = vmul.f32 1.442695, %v569_v46 }
 0x1c7   : > { %1314 = vpow2.f32 %v571_v47 }
 0x1ca   : > { %v568_v48 = vpop.xlane.xlu0 %567 }
 0x1cb   : > { %v570_v49 = vsub.f32 %v561_v43, %v568_v48 }
 0x1cd   : > { %v1315_v50 = vpop.eup %1314  ;;  %v573_v51 = vmul.f32 1.442695, %v570_v49 }
 0x1ce   : > { %v575_v52 = vsel %vm562_vm2, %v1315_v50, 0.0 }
 0x1cf   : > { %1316 = vpow2.f32 %v573_v51  ;;  %576 = vadd.xlane.f32.xlu1 %v575_v52 }
 0x1d5   : > { %v1317_v53 = vpop.eup %1316 }
 0x1d6   : > { %v578_v54 = vsel %vm562_vm2, %v1317_v53, 0.0 }
 0x1d7   : > { %579 = vadd.xlane.f32.xlu1 %v578_v54 }
 0x1dd   : > { %v680_v56 = vpop.permute.xlu0 %679 }
 0x1de   : > { %v685_v57 = vsel %vm537_vm0, %v680_v56, 0 }
 0x1df   : > { %694 = vmatpush.bf16.xpose.msrb.mxu2 %v685_v57 }
 0x1e6   : > { %1187 = vmatmul.msk.bf16.vlgmr.msrb.gmra.mxu2 %vm537_vm0, %v678_v58 }
 0x1f0   : > { %750 = vrot.lane.b32.xlu1 %v1534_v19, %s1436_s27 }
 0x242   : > { %v577_v59 = vpop.xlane.xlu1 %576 }
 0x243   : > { %1318 = vrcp.f32 %v577_v59 }
 0x249   : > { %v1319_v62 = vpop.eup %1318 }
 0x24a   : > { %v580_v61 = vpop.xlane.xlu1 %579  ;;  %v583_v1 = vmul.f32 %v1319_v62, %v1315_v50 }
 0x24b   : > { %1320 = vrcp.f32 %v580_v61 }
 0x251   : > { %v1321_v0 = vpop.eup %1320 }
 0x252   : > { %v584_v2 = vmul.f32 %v1321_v0, %v1317_v53 }
 0x254   : > { %v585_v3 = vpack.c.bf16 %v584_v2, %v583_v1 }
 0x256   : > { %1184 = vmatmul.msk.bf16.vlgmr.msrb.gmra.mxu3 %vm562_vm2, %v585_v3 }
 0x262   : > { %v751_v4 = vpop.permute.xlu1 %750 }
 0x263   : > { %v756_v5 = vsel %vm537_vm0, %v751_v4, 0 }
 0x264   : > { %765 = vmatpush.bf16.xpose.msrb.mxu3 %v756_v5 }
 0x266   : > { %1185 = vmatmul.msk.bf16.vlgmr.msra.gmra.mxu3 %vm537_vm0, %v605_v55 }
 0x269   : > { %v696_v6 = vpop.f32.mrf.mxu2 }
 0x26a   : > { %v701_v7 = vmul.f32 0.17677669, %v696_v6 }
 0x26c   : > { %v703_v8 = vsel %vm532_vm1, %v701_v7, -1e+09 }
 0x26d   : > { %v705_v9 = vsel %vm562_vm2, %v703_v8, -inf }
 0x26e   : > { %706 = vmax.xlane.f32.xlu1 %v705_v9 }
 0x271   : > { %v698_v18 = vpop.f32.mrf.mxu2 }
 0x272   : > { %v702_v23 = vmul.f32 0.17677669, %v698_v18 }
 0x274   : > { %v704_v26 = vsel %vm533_vm3, %v702_v23, -1e+09 }
 0x275   : > { %v708_v29 = vsel %vm562_vm2, %v704_v26, -inf }
 0x276   : > { %1189 = vmatmul.msk.bf16.vlgmr.msrb.gmra.mxu3 %vm537_vm0, %v749_v10 }
 0x2d9   : > { %v1583_v11 = vpop.f32.mrf.mxu3 }
 0x2e1   : > { %v1585_v12 = vpop.f32.mrf.mxu3  ;;  %v707_v13 = vpop.xlane.xlu1 %706 }
 0x2e2   : > { %v711_v14 = vsub.f32 %v703_v8, %v707_v13 }
 0x2e4   : > { %v713_v15 = vmul.f32 1.442695, %v711_v14 }
 0x2e6   : > { %1322 = vpow2.f32 %v713_v15 }
 0x2e9   : > { %v624_v16 = vpop.f32.mrf.mxu3 }
 0x2ea   : > { %v629_v17 = vmul.f32 0.17677669, %v624_v16 }
 0x2ec   : > { %v1587_v19 = vpop.eup %1322  ;;  %v631_v20 = vsel %vm532_vm1, %v629_v17, -1e+09 }
 0x2ed   : > { %v633_v21 = vsel %vm562_vm2, %v631_v20, -inf  ;;  %v717_v22 = vsel %vm562_vm2, %v1587_v19, 0.0 }
 0x2ee   : > { %634 = vmax.xlane.f32.xlu2 %v633_v21  ;;  %718 = vadd.xlane.f32.xlu1 %v717_v22 }
 0x2f1   : > { %v626_v24 = vpop.f32.mrf.mxu3 }
 0x2f2   : > { %v630_v25 = vmul.f32 0.17677669, %v626_v24 }
 0x2f4   : > { %v632_v27 = vsel %vm533_vm3, %v630_v25, -1e+09 }
 0x2f5   : > { %v636_v28 = vsel %vm562_vm2, %v632_v27, -inf }
 0x2f6   : > { %637 = vmax.xlane.f32.xlu0 %v636_v28  ;;  %709 = vmax.xlane.f32.xlu2 %v708_v29  ;;  %v1258_v29 = vld [vmem:[#allocation4 + $0x38] sm:$0xff] }
 0x2f7   : > { %920 = vmatpush.bf16.msrb.mxu1 %v1258_v29 }
 0x2f9   : > { %v767_v31 = vpop.f32.mrf.mxu3 }
 0x2fa   : > { %v772_v32 = vmul.f32 0.17677669, %v767_v31  ;;  %v1257_v31 = vld [vmem:[#allocation4 + $0x30] sm:$0xff] }
 0x2fb   : > { %921 = vmatpush.bf16.msrb.mxu1 %v1257_v31 }
 0x2fc   : > { %v774_v33 = vsel %vm532_vm1, %v772_v32, -1e+09 }
 0x2fd   : > { %v776_v36 = vsel %vm562_vm2, %v774_v33, -inf }
 0x2fe   : > { %777 = vmax.xlane.f32.xlu0 %v776_v36 }
 0x301   : > { %v769_v37 = vpop.f32.mrf.mxu3 }
 0x302   : > { %v773_v38 = vmul.f32 0.17677669, %v769_v37 }
 0x304   : > { %v775_v39 = vsel %vm533_vm3, %v773_v38, -1e+09 }
 0x305   : > { %v779_v41 = vsel %vm562_vm2, %v775_v39, -inf }
 0x306   : > { %780 = vmax.xlane.f32.xlu2 %v779_v41 }
 0x31e   : > { %657 = vrot.lane.b32.xlu2 %v1542_v30, %s1434_s25 }
 0x361   : > { %v635_v42 = vpop.xlane.xlu2 %634  ;;  %v719_v3 = vpop.xlane.xlu1 %718 }
 0x362   : > { %v639_v43 = vsub.f32 %v631_v20, %v635_v42 }
 0x364   : > { %v641_v44 = vmul.f32 1.442695, %v639_v43  ;;  %v1255_v43 = vld [vmem:[#allocation4 + $0x20] sm:$0xff] }
 0x366   : > { %1324 = vpow2.f32 %v641_v44  ;;  %v1254_v44 = vld [vmem:[#allocation4 + $0x18] sm:$0xff] }
 0x369   : > { %v710_v34 = vpop.xlane.xlu2 %709  ;;  %v638_v45 = vpop.xlane.xlu0 %637 }
 0x36a   : > { %v712_v46 = vsub.f32 %v704_v26, %v710_v34  ;;  %v640_v49 = vsub.f32 %v632_v27, %v638_v45  ;;  %v1253_v34 = vld [vmem:[#allocation4 + $0x10] sm:$0xff]  ;;  %v1252_v45 = vld [vmem:[#allocation4 + $0x8] sm:$0xff] }
 0x36c   : > { %v1325_v47 = vpop.eup %1324  ;;  %v715_v48 = vmul.f32 1.442695, %v712_v46  ;;  %v643_v35 = vmul.f32 1.442695, %v640_v49  ;;  %v1251_v46 = vld [vmem:[#allocation4] sm:$0xff] }
 0x36d   : > { %v645_v50 = vsel %vm562_vm2, %v1325_v47, 0.0 }
 0x36e   : > { %1326 = vpow2.f32 %v715_v48  ;;  %646 = vadd.xlane.f32.xlu1 %v645_v50 }
 0x36f   : > { %1328 = vpow2.f32 %v643_v35 }
 0x371   : > { %v778_v40 = vpop.xlane.xlu0 %777 }
 0x372   : > { %v782_v51 = vsub.f32 %v774_v33, %v778_v40  ;;  %v1256_v33 = vld [vmem:[#allocation4 + $0x28] sm:$0xff] }
 0x373   : > { %922 = vmatpush.bf16.msrb.mxu1 %v1256_v33 }
 0x374   : > { %v1327_v52 = vpop.eup %1326  ;;  %v784_v53 = vmul.f32 1.442695, %v782_v51 }
 0x375   : > { %v720_v54 = vsel %vm562_vm2, %v1327_v52, 0.0  ;;  %v1329_v56 = vpop.eup %1328 }
 0x376   : > { %1330 = vpow2.f32 %v784_v53  ;;  %721 = vadd.xlane.f32.xlu0 %v720_v54  ;;  %v648_v61 = vsel %vm562_vm2, %v1329_v56, 0.0 }
 0x377   : > { %923 = vmatpush.bf16.msrb.mxu1 %v1255_v43 }
 0x379   : > { %v781_v55 = vpop.xlane.xlu2 %780 }
 0x37a   : > { %v783_v57 = vsub.f32 %v775_v39, %v781_v55 }
 0x37b   : > { %924 = vmatpush.bf16.msrb.mxu1 %v1254_v44 }
 0x37c   : > { %v1331_v58 = vpop.eup %1330  ;;  %v786_v59 = vmul.f32 1.442695, %v783_v57 }
 0x37d   : > { %v788_v62 = vsel %vm562_vm2, %v1331_v58, 0.0 }
 0x37e   : > { %1332 = vpow2.f32 %v786_v59  ;;  %649 = vadd.xlane.f32.xlu0 %v648_v61  ;;  %789 = vadd.xlane.f32.xlu1 %v788_v62 }
 0x37f   : > { %925 = vmatpush.bf16.msrb.mxu1 %v1253_v34 }
 0x381   : > { %v658_v0 = vpop.permute.xlu2 %657 }
 0x382   : > { %670 = vmatpush.bf16.msrb.mxu0 %v658_v0 }
 0x383   : > { %926 = vmatpush.bf16.msrb.mxu1 %v1252_v45 }
 0x384   : > { %v1333_v1 = vpop.eup %1332 }
 0x385   : > { %v791_v2 = vsel %vm562_vm2, %v1333_v1, 0.0 }
 0x386   : > { %792 = vadd.xlane.f32.xlu0 %v791_v2 }
 0x387   : > { %927 = vmatpush.bf16.msrb.mxu1 %v1251_v46 }
 0x397   : > { %728 = vrot.lane.b32.xlu1 %v1542_v30, %s1435_s26 }
 0x39a   : > { %799 = vrot.lane.b32.xlu0 %v1542_v30, %s1436_s27 }
 0x3e1   : > { %v647_v5 = vpop.xlane.xlu1 %646 }
 0x3e2   : > { %1334 = vrcp.f32 %v647_v5 }
 0x3e8   : > { %v1335_v7 = vpop.eup %1334 }
 0x3e9   : > { %v722_v4 = vpop.xlane.xlu0 %721  ;;  %v653_v9 = vmul.f32 %v1335_v7, %v1325_v47 }
 0x3f1   : > { %v650_v6 = vpop.xlane.xlu0 %649  ;;  %v790_v15 = vpop.xlane.xlu1 %789 }
 0x3f2   : > { %1336 = vrcp.f32 %v650_v6 }
 0x3f3   : > { %1338 = vrcp.f32 %v722_v4  ;;  %v1437_v4 = vmov 128.0  }
 0x3f4   : > { %1340 = vrcp.f32 %v719_v3 }
 0x3f8   : > { %v1337_v8 = vpop.eup %1336 }
 0x3f9   : > { %v654_v10 = vmul.f32 %v1337_v8, %v1329_v56  ;;  %v793_v14 = vpop.xlane.xlu0 %792  ;;  %v1339_v30 = vpop.eup %1338 }
 0x3fa   : > { %1342 = vrcp.f32 %v793_v14  ;;  %v1341_v16 = vpop.eup %1340  ;;  %v726_v18 = vmul.f32 %v1339_v30, %v1327_v52 }
 0x3fb   : > { %v655_v13 = vpack.c.bf16 %v654_v10, %v653_v9  ;;  %1344 = vrcp.f32 %v790_v15  ;;  %v725_v21 = vmul.f32 %v1341_v16, %v1587_v19 }
 0x3fc   : > { %1346 = vrcp.f32 %v1437_v4 }
 0x3fd   : > { %1186 = vmatmul.msk.bf16.vlgmr.msrb.gmra.mxu0 %vm562_vm2, %v655_v13  ;;  %v727_v24 = vpack.c.bf16 %v726_v18, %v725_v21 }
 0x400   : > { %v1343_v17 = vpop.eup %1342 }
 0x401   : > { %v1345_v20 = vpop.eup %1344  ;;  %v797_v23 = vmul.f32 %v1343_v17, %v1333_v1 }
 0x402   : > { %v796_v25 = vmul.f32 %v1345_v20, %v1331_v58  ;;  %v1347_v5 = vpop.eup %1346 }
 0x403   : > { %v943_v6 = vmul.f32 128.0, %v1347_v5  ;;  %vm947_vm6 = vweird.f32 %v1347_v5 }
 0x404   : > { %v798_v27 = vpack.c.bf16 %v797_v23, %v796_v25 }
 0x405   : > { %v944_v7 = vsub.f32 1.0, %v943_v6 }
 0x407   : > { %v945_v8 = vmul.f32 %v1347_v5, %v944_v7 }
 0x409   : > { %v729_v22 = vpop.permute.xlu1 %728  ;;  %v946_v9 = vadd.f32 %v1347_v5, %v945_v8 }
 0x40a   : > { %741 = vmatpush.bf16.msra.mxu2 %v729_v22 }
 0x40b   : > { %v948_v10 = vsel %vm947_vm6, %v1347_v5, %v946_v9 }
 0x40c   : > { %v800_v26 = vpop.permute.xlu0 %799 }
 0x40d   : > { %1188 = vmatmul.msk.bf16.vlgmr.msra.gmra.mxu2 %vm562_vm2, %v727_v24  ;;  %812 = vmatpush.bf16.msra.mxu0 %v800_v26 }
 0x410   : > { %1190 = vmatmul.msk.bf16.vlgmr.msra.gmra.mxu0 %vm562_vm2, %v798_v27 }
 0x47a   : > { %v672_v28 = vpop.f32.mrf.mxu0 }
 0x482   : > { %v674_v19 = vpop.f32.mrf.mxu0 }
 0x483   : > { %v1301_v39 = vpack.i.bf16 %v674_v19, %v672_v28  ;;  %v1312_v19 = vld [vmem:[%s1657_s5] ss:$0 sm:$0xff] }
 0x48d   : > { %v814_v38 = vpop.f32.mrf.mxu0 }
 0x490   : > { %v743_v32 = vpop.f32.mrf.mxu2 }
 0x495   : > { %v816_v41 = vpop.f32.mrf.mxu0 }
 0x496   : > { %v1306_v42 = vpack.i.bf16 %v816_v41, %v814_v38  ;;  %v1313_v38 = vld [vmem:[%s1658_s6] ss:$0 sm:$0xff] }
 0x498   : > { %v745_v36 = vpop.f32.mrf.mxu2 }
 0x499   : > { %v1296_v37 = vpack.i.bf16 %v745_v36, %v743_v32 }
 0x49b   : > { %1297 = vrot.lane.b32.xlu2 %v1296_v37, %s1435_s26 }
 0x4a3   : > { %1302 = vrot.lane.b32.xlu2 %v1301_v39, %s1436_s27 }
 0x4ab   : > { %1307 = vrot.lane.b32.xlu2 %v1306_v42, %s1434_s25 }
 0x4f5   : > { %v1298_v47 = vpop.permute.xlu2 %1297 }
 0x4f6   : > { %v1300_v51 = vunpack.i.h.bf16 %v1298_v47  ;;  %v1299_v52 = vunpack.i.l.bf16 %v1298_v47 }
 0x4fd   : > { %v1303_v48 = vpop.permute.xlu2 %1302 }
 0x4fe   : > { %v1305_v49 = vunpack.i.h.bf16 %v1303_v48  ;;  %v1304_v50 = vunpack.i.l.bf16 %v1303_v48 }
 0x500   : > { %v844_v35 = vsel %vm537_vm0, %v1585_v12, %v1305_v49  ;;  %v843_v40 = vsel %vm537_vm0, %v1583_v11, %v1304_v50  ;;  %v1311_v12 = vld [vmem:[%s1656_s4] ss:$0 sm:$0xff] }
 0x501   : > { %v846_v56 = vsel %vm845_vm4, %v843_v40, %v1299_v52  ;;  %v847_v57 = vsel %vm845_vm4, %v844_v35, %v1300_v51 }
 0x505   : > { %v1308_v53 = vpop.permute.xlu2 %1307 }
 0x506   : > { %v1310_v54 = vunpack.i.h.bf16 %v1308_v53  ;;  %v1309_v55 = vunpack.i.l.bf16 %v1308_v53 }
 0x508   : > { %v849_v58 = vsel %vm848_vm5, %v846_v56, %v1309_v55  ;;  %v850_v59 = vsel %vm848_vm5, %v847_v57, %v1310_v54 }
 0x509   : > { %v851_v61 = vpack.c.bf16 %v850_v59, %v849_v58 }
 0x50b   : > { %928 = vmatmul.bf16.vlgmr.msrb.gmra.mxu1 %v851_v61 }
 0x588   : > { %v929_v62 = vpop.f32.mrf.mxu1 }
 0x589   : > { %v930_v0 = vadd.f32 %v1311_v12, %v929_v62 }
 0x58b   : > { %v934_v11 = vadd.f32 %v930_v0, %v1525_v60 }
 0x58d   : > { %938 = vadd.xlane.f32.xlu0 %v934_v11 }
 0x590   : > { %v931_v1 = vpop.f32.mrf.mxu1 }
 0x591   : > { %v932_v2 = vadd.f32 %v1311_v12, %v931_v1 }
 0x593   : > { %v935_v3 = vadd.f32 %v932_v2, %v1527_v63 }
 0x595   : > { %940 = vadd.xlane.f32.xlu1 %v935_v3 }
 0x600   : > { %v939_v13 = vpop.xlane.xlu0 %938 }
 0x601   : > { %v949_v14 = vmul.f32 %v948_v10, %v939_v13 }
 0x603   : > { %v951_v15 = vsub.f32 %v934_v11, %v949_v14 }
 0x605   : > { %v953_v30 = vmul.f32 %v951_v15, %v951_v15 }
 0x607   : > { %955 = vadd.xlane.f32.xlu2 %v953_v30 }
 0x608   : > { %v941_v60 = vpop.xlane.xlu1 %940 }
 0x609   : > { %v950_v16 = vmul.f32 %v948_v10, %v941_v60 }
 0x60b   : > { %v952_v17 = vsub.f32 %v935_v3, %v950_v16 }
 0x60d   : > { %v954_v18 = vmul.f32 %v952_v17, %v952_v17 }
 0x60f   : > { %957 = vadd.xlane.f32.xlu0 %v954_v18 }
 0x67a   : > { %v956_v63 = vpop.xlane.xlu2 %955 }
 0x67b   : > { %v959_v20 = vmul.f32 %v956_v63, %v948_v10 }
 0x67d   : > { %v961_v21 = vadd.f32 1e-05, %v959_v20 }
 0x67f   : > { %1348 = vrsqrt.f32 %v961_v21  ;;  %vm969_vm8 = vweird.f32 %v961_v21 }
 0x682   : > { %v958_v22 = vpop.xlane.xlu0 %957 }
 0x683   : > { %v960_v23 = vmul.f32 %v958_v22, %v948_v10 }
 0x685   : > { %v1349_v24 = vpop.eup %1348  ;;  %v962_v25 = vadd.f32 1e-05, %v960_v23 }
 0x686   : > { %v964_v26 = vmul.f32 %v1349_v24, %v961_v21  ;;  %vm970_vm7 = vweird.f32 %v1349_v24 }
 0x687   : > { %1350 = vrsqrt.f32 %v962_v25  ;;  %vm971_vm9 = vmor %vm969_vm8, %vm970_vm7  ;;  %vm979_vm11 = vweird.f32 %v962_v25 }
 0x688   : > { %v965_v27 = vmul.f32 %v1349_v24, %v964_v26 }
 0x68a   : > { %v966_v28 = vmul.f32 0.5, %v965_v27 }
 0x68c   : > { %v967_v29 = vsub.f32 1.5, %v966_v28 }
 0x68d   : > { %v1351_v31 = vpop.eup %1350 }
 0x68e   : > { %v968_v32 = vmul.f32 %v1349_v24, %v967_v29  ;;  %v974_v33 = vmul.f32 %v1351_v31, %v962_v25  ;;  %vm980_vm10 = vweird.f32 %v1351_v31 }
 0x68f   : > { %vm981_vm12 = vmor %vm979_vm11, %vm980_vm10 }
 0x690   : > { %v972_v36 = vsel %vm971_vm9, %v1349_v24, %v968_v32  ;;  %v975_v37 = vmul.f32 %v1351_v31, %v974_v33 }
 0x691   : > { %v983_v39 = vmul.f32 %v972_v36, %v951_v15 }
 0x692   : > { %v976_v41 = vmul.f32 0.5, %v975_v37 }
 0x693   : > { %v988_v42 = vmul.f32 %v1312_v19, %v983_v39 }
 0x694   : > { %v977_v43 = vsub.f32 1.5, %v976_v41 }
 0x695   : > { %v993_v44 = vadd.f32 %v1313_v38, %v988_v42 }
 0x696   : > { %v978_v34 = vmul.f32 %v1351_v31, %v977_v43 }
 0x697   : > { %995 = vst [vmem:[%s312_s14] sm:$0xff] %v993_v44 }
 0x698   : > { %v982_v45 = vsel %vm981_vm12, %v1351_v31, %v978_v34 }
 0x699   : > { %v984_v46 = vmul.f32 %v982_v45, %v952_v17 }
 0x69b   : > { %v989_v47 = vmul.f32 %v1312_v19, %v984_v46 }
 0x69d   : > { %v994_v48 = vadd.f32 %v1313_v38, %v989_v47 }
 0x69f   : > { %996 = vst [vmem:[%s312_s14 + $0x8] sm:$0xff] %v994_v48 }
 0x6a0 PF: > { %s19_s24 = sadd.s32 1, %s1426_s24  }
 0x6a1   : > { %p16_p7 = scmp.ge.s32.totalorder %s19_s24, 4  }
 0x6a3   :  { %18 = sbr.rel (!%p16_p7) target bundleno = 2 (0x2), region = 87 }
 0x6a8   :  { %1018 = vsyncpa [#allocation3], 1 }
 0x6a9   :  { %1020 = vsyncpa [#allocation3 + $0x1], 1 }
 0x6aa   :  { %1021 = vsyncpa [#allocation5], 1 }

// kernel: gpt2_forward.9
= control target key start
LH: loop header
LB: loop body
LE: loop exit
PB: predicated region body
PF: predicated region fallthrough
CT: control target
= control target key end

     0   :  { %8 = vsyncpa [#allocation3], 0  ;;  %s893_s0 = inlined_call_operand.vmem [shape: f32[2,16,128], index: 0, kind: input, shape index: {}]   ;;  %s894_s1 = inlined_call_operand.hbm [shape: bf16[128,256], index: 1, kind: input, shape index: {}]   ;;  %s895_s2 = inlined_call_operand.vmem [shape: f32[1,256], index: 2, kind: input, shape index: {}]   ;;  %s896_s3 = inlined_call_operand.hbm [shape: f32[2,16,256], index: 3, kind: output, shape index: {}]  }
   0x1   :  { %9 = vsyncpa [#allocation4], 0 }
   0x2   :  { %11 = vsyncpa [#allocation4 + $0x1], 0  ;;  %s790_s12 = smov 0   ;;  %s792_s13 = smov 0  }
   0x3   :  { %s794_s14 = smov 0   ;;  %s796_s15 = smov 0  }
   0x4   :  { %s798_s16 = smov 0   ;;  %s800_s17 = smov 0  }
   0x5 LB: > { %s483_s18 = sadd.s32 4294967295, %s763_s17   ;;  %s484_s19 = sadd.s32 4294967294, %s763_s17   ;;  %s763_s17 = sphi %s800_s17, %s17_s17   ;;  %s759_s16 = sphi %s798_s16, %s903_s16   ;;  %s755_s15 = sphi %s796_s15, %s902_s15   ;;  %s751_s14 = sphi %s794_s14, %s901_s14   ;;  %s747_s13 = sphi %s792_s13, %s900_s13   ;;  %s743_s12 = sphi %s790_s12, %s899_s12  }
   0x6   : > { %s29_s20 = sadd.s32 1, %s759_s16  ;;  %s116_s21 = sadd.s32 1, %s751_s14 }
   0x7   : > { %p31_p0 = scmp.ge.s32.totalorder %s29_s20, 2  ;;  %p126_p1 = scmp.ne.s32.totalorder %s751_s14, %s747_s13 }
   0x8   : > { %p127_p2 = scmp.eq.s32.totalorder %s483_s18, 1  ;;  %p132_p3 = scmp.ne.s32.totalorder %s747_s13, %s743_s12 }
   0x9   : > { %s905_s20 = smov (%p31_p0, %s29_s20), 0  ;;  %p133_p5 = scmp.eq.s32.totalorder %s484_s19, 1 }
   0xa   : > { %p830_p4 = por %p127_p2, %p126_p1  ;;  %s111_s23 = ssub.s32 %s759_s16, %s905_s20 }
   0xb   : > { %p485_p6 = scmp.ge.s32.totalorder %s763_s17, 1  ;;  %p114_p7 = scmp.eq.s32.totalorder %s111_s23, 0 }
   0xc   : > { %p837_p8 = por %p133_p5, %p132_p3  ;;  %p140_p9 = scmp.lt.s32.totalorder %s763_s17, 3 }
   0xd   : > { %s843_s25 = scalar_select %p114_p7, %s751_s14, %s116_s21  }
   0xe   : > { %p141_p10 = pnand %p485_p6, %p140_p9  ;;  %p595_p11 = scmp.eq.s32.totalorder %s483_s18, 0 }
   0xf   : > { %s154_s28 = sshll.u32 %s894_s1, 4  ;;  %s765_s29 = smov [#allocation2]   ;;  %s155_s28 = int_to_ptr.hbm [resolvable:$true] %s154_s28 }
  0x10   : > { %p587_p12 = pneg %p141_p10  ;;  %s156_s30 = sshll.u32 %s765_s29, 4  ;;  %s157_s30 = int_to_ptr.vmem [resolvable:$true] %s156_s30 }
  0x11   : > { %s766_s4 = smov 128   ;;  %s767_s5 = smov 8  }
  0x12   : > { %p588_p13 = pnand %p595_p11, %p587_p12  ;;  %188 = sbr.rel (%p141_p10) target bundleno = 199 (0xc7), region = 32 }
  0x14   : > { %590 = dma.hbm_to_vmem [thread:$0]  (!%p588_p13), %s155_s28, 2048, %s157_s30, [#allocation3], %s766_s4, %s766_s4, %s767_s5  }
  0x17   : > { %734 = dma.done.wait (%p595_p11), [#allocation3], 2048  }
  0x18   : > { %736 = vsyncadd (%p595_p11), [#allocation3], 4294965248  ;;  %v552_v0 = vld [vmem:[#allocation2 + $0x70] sm:$0xf]  ;;  %v579_v1 = vld [vmem:[#allocation2 + $0x74] sm:$0xf0] }
  0x19   : > { %v578_v2 = vld [vmem:[#allocation2 + $0x74] sm:$0xf]  ;;  %v553_v3 = vor.u32 %v579_v1, %v552_v0  ;;  %v554_v4 = vld [vmem:[#allocation2 + $0x78] sm:$0xf0]  ;;  %v544_v5 = vld [vmem:[#allocation2 + $0x60] sm:$0xf] }
  0x1a   : > { %v577_v6 = vld [vmem:[#allocation2 + $0x64] sm:$0xf0]  ;;  %v557_v7 = vor.u32 %v578_v2, %v554_v4  ;;  %v576_v8 = vld [vmem:[#allocation2 + $0x64] sm:$0xf]  ;;  %v546_v9 = vld [vmem:[#allocation2 + $0x68] sm:$0xf0] }
  0x1b   : > { %334 = vmatpush.bf16.msra.mxu0 %v553_v3  ;;  %v545_v10 = vor.u32 %v577_v6, %v544_v5  ;;  %v549_v11 = vor.u32 %v576_v8, %v546_v9  ;;  %v536_v12 = vld [vmem:[#allocation2 + $0x50] sm:$0xf]  ;;  %v575_v13 = vld [vmem:[#allocation2 + $0x54] sm:$0xf0]  ;;  %v574_v14 = vld [vmem:[#allocation2 + $0x54] sm:$0xf] }
  0x1c   : > { %348 = vmatpush.bf16.msra.mxu1 %v557_v7  ;;  %v538_v15 = vld [vmem:[#allocation2 + $0x58] sm:$0xf0]  ;;  %v537_v16 = vor.u32 %v575_v13, %v536_v12  ;;  %v528_v18 = vld [vmem:[#allocation2 + $0x40] sm:$0xf]  ;;  %v573_v19 = vld [vmem:[#allocation2 + $0x44] sm:$0xf0] }
  0x1d   : > { %v541_v17 = vor.u32 %v574_v14, %v538_v15  ;;  %v572_v20 = vld [vmem:[#allocation2 + $0x44] sm:$0xf]  ;;  %v530_v21 = vld [vmem:[#allocation2 + $0x48] sm:$0xf0]  ;;  %v529_v22 = vor.u32 %v573_v19, %v528_v18  ;;  %v520_v24 = vld [vmem:[#allocation2 + $0x30] sm:$0xf] }
  0x1e   : > { %v533_v23 = vor.u32 %v572_v20, %v530_v21  ;;  %v571_v25 = vld [vmem:[#allocation2 + $0x34] sm:$0xf0]  ;;  %v570_v26 = vld [vmem:[#allocation2 + $0x34] sm:$0xf]  ;;  %v522_v27 = vld [vmem:[#allocation2 + $0x38] sm:$0xf0] }
  0x1f   : > { %335 = vmatpush.bf16.msra.mxu0 %v545_v10  ;;  %p217_p0 = scmp.lt.s32.totalorder %s755_s15, 1  ;;  %v521_v28 = vor.u32 %v571_v25, %v520_v24  ;;  %v525_v29 = vor.u32 %v570_v26, %v522_v27  ;;  %v512_v30 = vld [vmem:[#allocation2 + $0x20] sm:$0xf]  ;;  %v569_v31 = vld [vmem:[#allocation2 + $0x24] sm:$0xf0]  ;;  %s214_s11 = sand.u32 1, %s747_s13  }
  0x20   : > { %349 = vmatpush.bf16.msra.mxu1 %v549_v11  ;;  %v568_v32 = vld [vmem:[#allocation2 + $0x24] sm:$0xf]  ;;  %v514_v33 = vld [vmem:[#allocation2 + $0x28] sm:$0xf0]  ;;  %v513_v34 = vor.u32 %v569_v31, %v512_v30  ;;  %v504_v36 = vld [vmem:[#allocation2 + $0x10] sm:$0xf] }
  0x21   : > { %s218_s6 = scalar_select %p217_p0, %s755_s15, 1  ;;  %v517_v35 = vor.u32 %v568_v32, %v514_v33  ;;  %v567_v37 = vld [vmem:[#allocation2 + $0x14] sm:$0xf0]  ;;  %v566_v38 = vld [vmem:[#allocation2 + $0x14] sm:$0xf] }
  0x22   : > { %v506_v39 = vld [vmem:[#allocation2 + $0x18] sm:$0xf0]  ;;  %v505_v40 = vor.u32 %v567_v37, %v504_v36  ;;  %v496_v42 = vld [vmem:[#allocation2] sm:$0xf]  ;;  %v565_v43 = vld [vmem:[#allocation2 + $0x4] sm:$0xf0] }
  0x23   : > { %336 = vmatpush.bf16.msra.mxu0 %v537_v16  ;;  %s563_s7 = sshll.u32 %s218_s6, 4  ;;  %v509_v41 = vor.u32 %v566_v38, %v506_v39  ;;  %v564_v44 = vld [vmem:[#allocation2 + $0x4] sm:$0xf]  ;;  %v498_v45 = vld [vmem:[#allocation2 + $0x8] sm:$0xf0]  ;;  %v497_v46 = vor.u32 %v565_v43, %v496_v42  ;;  %s491_s21 = sshll.u32 %s214_s11, 5 }
  0x24   : > { %350 = vmatpush.bf16.msra.mxu1 %v541_v17  ;;  %s221_s10 = scalar_lea.vmem %s893_s0, %s563_s7  ;;  %v501_v49 = vor.u32 %v564_v44, %v498_v45  ;;  %v248_v51 = vld [vmem:[%s895_s2] sm:$0x3]  ;;  %s580_s23 = sshll.u32 %s755_s15, 5 }
  0x25   : > { %v229_v47 = vld [vmem:[%s221_s10] sm:$0xff]  ;;  %v230_v48 = vld [vmem:[%s221_s10 + $0x8] sm:$0xff]  ;;  %v250_v52 = vperm.slane %v248_v51, 0  ;;  %v251_v53 = vperm.slane %v248_v51, 1  ;;  %s216_s26 = scalar_lea.vmem [#allocation5], %s491_s21  ;;  %s380_s29 = scalar_lea.hbm %s896_s3, %s580_s23 }
  0x26   : > { %v231_v50 = vpack.c.bf16 %v230_v48, %v229_v47  ;;  %s381_s30 = sshll.u32 %s216_s26, 4  ;;  %s383_s4 = sshll.u32 %s380_s29, 4  ;;  %s382_s30 = int_to_ptr.vmem [resolvable:$true] %s381_s30  ;;  %s384_s4 = int_to_ptr.hbm [resolvable:$true] %s383_s4 }
  0x27   : > { %337 = vmatpush.bf16.msra.mxu0 %v529_v22  ;;  %s367_s15 = scalar_lea.sflag [#allocation4], %s214_s11  ;;  %s695_s5 = sshra.s32 %s384_s4, 4  ;;  %s696_s5 = int_to_ptr.hbm [resolvable:$true] %s695_s5 }
  0x28   : > { %351 = vmatpush.bf16.msra.mxu1 %v533_v23  ;;  %s697_s6 = scalar_lea.hbm %s696_s5, 32  ;;  %s701_s9 = scalar_lea.hbm %s896_s3, 64 }
  0x29   : > { %p698_p1 = scmp.ne.s32.totalorder %s696_s5, %s697_s6  ;;  %p702_p5 = scmp.lt.s32.totalorder %s696_s5, %s896_s3 }
  0x2a   : > { %p703_p6 = scmp.lt.s32.totalorder %s701_s9, %s697_s6 }
  0x2b   : > { %338 = vmatpush.bf16.msra.mxu0 %v521_v28  ;;  %p699_p2 = pnand %p698_p1, %p830_p4 }
  0x2c   : > { %352 = vmatpush.bf16.msra.mxu1 %v525_v29  ;;  %p704_p7 = por %p703_p6, %p702_p5 }
  0x2d   : > { %p700_p3 = pneg %p699_p2 }
  0x2f   : > { %339 = vmatpush.bf16.msra.mxu0 %v513_v34  ;;  %p705_p9 = pnand %p704_p7, %p700_p3 }
  0x30   : > { %353 = vmatpush.bf16.msra.mxu1 %v517_v35 }
  0x33   : > { %340 = vmatpush.bf16.msra.mxu0 %v505_v40 }
  0x34   : > { %354 = vmatpush.bf16.msra.mxu1 %v509_v41 }
  0x37   : > { %341 = vmatpush.bf16.msra.mxu0 %v497_v46 }
  0x38   : > { %355 = vmatpush.bf16.msra.mxu1 %v501_v49 }
  0x3a   : > { %342 = vmatmul.bf16.vlgmr.msra.gmra.mxu0 %v231_v50 }
  0x3b   : > { %356 = vmatmul.bf16.vlgmr.msra.gmra.mxu1 %v231_v50 }
  0xb7   : > { %v343_v54 = vpop.f32.mrf.mxu0 }
  0xb8   : > { %v344_v55 = vadd.f32 %v343_v54, %v250_v52  ;;  %v357_v56 = vpop.f32.mrf.mxu1 }
  0xb9   : > { %v358_v57 = vadd.f32 %v357_v56, %v251_v53 }
  0xba   : > { %362 = vst [vmem:[%s216_s26] sm:$0xff] %v344_v55 }
  0xbb   : > { %363 = vst [vmem:[%s216_s26 + $0x8] sm:$0xff] %v358_v57 }
  0xbf   : > { %v345_v58 = vpop.f32.mrf.mxu0 }
  0xc0   : > { %v346_v59 = vadd.f32 %v345_v58, %v250_v52  ;;  %v359_v60 = vpop.f32.mrf.mxu1 }
  0xc1   : > { %v360_v61 = vadd.f32 %v359_v60, %v251_v53 }
  0xc2   : > { %364 = vst [vmem:[%s216_s26 + $0x10] sm:$0xff] %v346_v59 }
  0xc3   : > { %365 = vst [vmem:[%s216_s26 + $0x18] sm:$0xff] %v360_v61 }
  0xc4   : > { %708 = shalt.err (!%p705_p9)
}
  0xc5   : > { %s768_s11 = smov 256   ;;  %s769_s19 = smov 16  }
  0xc6   : > { %585 = dma.vmem_to_hbm [thread:$0]  (%p830_p4), %s382_s30, 512, %s384_s4, %s367_s15, %s768_s11, %s768_s11, %s769_s19  }
  0xc7 PF: > { %p597_p10 = scmp.ge.s32.totalorder %s763_s17, 2  ;;  %s398_s21 = sand.u32 1, %s743_s12  }
  0xc8   : > { %s399_s23 = scalar_lea.sflag [#allocation4], %s398_s21 }
  0xc9   : > { %p592_p11 = pnand %p597_p10, %p837_p8 }
  0xcb   : > { %p593_p12 = pneg %p592_p11 }
  0xcd   : > { %738 = dma.done.wait (%p593_p12), %s399_s23, 512  }
  0xce   : > { %740 = vsyncadd (%p593_p12), %s399_s23, 4294966784  ;;  %s17_s17 = sadd.s32 1, %s763_s17   ;;  %s899_s12 = smov %s747_s13 }
  0xcf   : > { %p14_p13 = scmp.ge.s32.totalorder %s17_s17, 4   ;;  %s900_s13 = smov %s751_s14 }
  0xd0   : > { %s901_s14 = smov %s843_s25  ;;  %s902_s15 = smov %s759_s16 }
  0xd1   : > { %s903_s16 = smov %s905_s20  ;;  %16 = sbr.rel (!%p14_p13) target bundleno = 5 (0x5), region = 76 }
  0xd6   :  { %405 = vsyncpa [#allocation3], 1 }
  0xd7   :  { %407 = vsyncpa [#allocation3 + $0x1], 1 }
  0xd8   :  { %408 = vsyncpa [#allocation4], 1 }
  0xd9   :  { %410 = vsyncpa [#allocation4 + $0x1], 1 }

</bundles_post_ra>
